<compile_context>
chip_gen: v7x
topology: tpu7x:2x2x1
jax: 0.10.0
libtpu: 0.0.40
codegen_flags: <defaults>
</compile_context>

<pallas_src>
import functools

import jax
import jax.numpy as jnp
from jax.experimental import pallas as pl
from jax.experimental.pallas import tpu as pltpu


def _discriminator_kernel(xt_ref, w1_ref, b1_ref, w2_ref, b2_ref, o_ref):
    # Layer 1 on the MXU: (H, D_in)bf16 @ (D_in, tb)bf16 -> (H, tb) f32 accum.
    h = jnp.dot(w1_ref[...], xt_ref[...], preferred_element_type=jnp.float32)
    h = jnp.maximum(h + b1_ref[...], 0.0)          # bias (H,1) broadcasts over lanes; ReLU on VPU
    # Layer 2 (H -> 1) off the MXU: multiply by the w2 column and reduce over H
    # (sublane axis). Result is already the lane-dense (1, tb) output row.
    z = jnp.sum(h * w2_ref[...], axis=0, keepdims=True) + b2_ref[...]
    o_ref[...] = jax.nn.sigmoid(z)                 # sigmoid via EUP, unmasked lane-dense store


@functools.partial(jax.jit, static_argnames=("block_b",))
def discriminator_forward(x, w1, b1, w2, b2, *, block_b=512):
    """Forward pass of the Discriminator.

    Args (PyTorch layouts):
      x:  (B, D_in)  float32
      w1: (H, D_in)  float32   (nn.Linear weight)
      b1: (H,)       float32
      w2: (1, H)     float32
      b2: (1,)       float32
    Returns: (B, 1) float32 probabilities.
    """
    B, D_in = x.shape
    H = w1.shape[0]
    assert w1.shape == (H, D_in)
    assert w2.shape == (1, H) and b2.shape == (1,)
    assert block_b % 128 == 0, "batch tile must be a multiple of 128 (lane width)"

    n_tiles = pl.cdiv(B, block_b)
    b_pad = n_tiles * block_b

    # bf16 cast + pad + transpose for the lane-dense (batch-on-lanes) layout.
    # The cast already forces one materialization pass, so the transpose rides along.
    x_bf = x.astype(jnp.bfloat16)
    if b_pad != B:
        x_bf = jnp.pad(x_bf, ((0, b_pad - B), (0, 0)))
    xt = x_bf.T                                    # (D_in, B_pad) bf16

    w1_bf = w1.astype(jnp.bfloat16)                # (H, D_in) bf16 (PyTorch layout as-is)
    b1_col = b1.reshape(H, 1).astype(jnp.float32)  # (H, 1)
    w2_col = w2.T.astype(jnp.float32)              # (H, 1)
    b2_sc = b2.reshape(1, 1).astype(jnp.float32)   # (1, 1)

    out_row = pl.pallas_call(
        _discriminator_kernel,
        out_shape=jax.ShapeDtypeStruct((1, b_pad), jnp.float32),
        grid_spec=pltpu.PrefetchScalarGridSpec(
            num_scalar_prefetch=0,
            grid=(n_tiles,),
            in_specs=[
                # batch-tiled transposed activations (batch on lanes)
                pl.BlockSpec((D_in, block_b), lambda i: (0, i)),
                # weights / biases: full arrays, resident across the grid
                pl.BlockSpec((H, D_in), lambda i: (0, 0)),
                pl.BlockSpec((H, 1), lambda i: (0, 0)),
                pl.BlockSpec((H, 1), lambda i: (0, 0)),
                pl.BlockSpec((1, 1), lambda i: (0, 0)),
            ],
            out_specs=pl.BlockSpec((1, block_b), lambda i: (0, i)),
        ),
        compiler_params=pltpu.CompilerParams(
            dimension_semantics=("parallel",),     # batch tiles shard across TCs (v7x megacore)
        ),
    )(xt, w1_bf, b1_col, w2_col, b2_sc)

    return out_row[0, :B].reshape(B, 1)


def init_discriminator_params(key, input_size=784, hidden_size=400, output_size=1):
    """Deterministic init mimicking PyTorch nn.Linear defaults (uniform +/- 1/sqrt(fan_in)).
    Weights kept in PyTorch (out_features, in_features) layout."""
    assert output_size == 1, "this kernel implements the Discriminator's 1-logit head"
    k1, k2, k3, k4 = jax.random.split(key, 4)
    lim1 = 1.0 / jnp.sqrt(jnp.float32(input_size))
    lim2 = 1.0 / jnp.sqrt(jnp.float32(hidden_size))
    w1 = jax.random.uniform(k1, (hidden_size, input_size), jnp.float32, -lim1, lim1)
    b1 = jax.random.uniform(k2, (hidden_size,), jnp.float32, -lim1, lim1)
    w2 = jax.random.uniform(k3, (output_size, hidden_size), jnp.float32, -lim2, lim2)
    b2 = jax.random.uniform(k4, (output_size,), jnp.float32, -lim2, lim2)
    return w1, b1, w2, b2


if __name__ == "__main__":
    key = jax.random.PRNGKey(0)
    k_params, k_x = jax.random.split(key)

    INPUT_SIZE = 784
    HIDDEN_SIZE = 400
    OUTPUT_SIZE = 1
    BATCH = 1000          # non-multiple of the tile -> exercises padding; >=2 grid steps for v7x

    w1, b1, w2, b2 = init_discriminator_params(
        k_params, INPUT_SIZE, HIDDEN_SIZE, OUTPUT_SIZE
    )
    x = jax.random.normal(k_x, (BATCH, INPUT_SIZE), jnp.float32)

    out = discriminator_forward(x, w1, b1, w2, b2, block_b=512)
    out = jax.block_until_ready(out)
    assert out.shape == (BATCH, OUTPUT_SIZE)

    # Tight check against a reference that uses the same bf16-rounded operands
    # the kernel sees (f32 accumulation both sides).
    xb = x.astype(jnp.bfloat16).astype(jnp.float32)
    w1b = w1.astype(jnp.bfloat16).astype(jnp.float32)
    ref_bf = jax.nn.sigmoid(
        jnp.maximum(xb @ w1b.T + b1[None, :], 0.0) @ w2.T + b2[None, :]
    )
    assert jnp.allclose(out, ref_bf, atol=1e-4), float(jnp.max(jnp.abs(out - ref_bf)))

    # Looser sanity check against the full-f32 PyTorch-equivalent math.
    ref_f32 = jax.nn.sigmoid(
        jnp.maximum(x @ w1.T + b1[None, :], 0.0) @ w2.T + b2[None, :]
    )
    assert jnp.allclose(out, ref_f32, atol=2e-2), float(jnp.max(jnp.abs(out - ref_f32)))

    print("KERNEL_OK")
</pallas_src>

<mosaic_0001>
module attributes {stable_mosaic.version = 11 : i64} {
  func.func @_discriminator_kernel(%arg0: i32, %arg1: memref<784x512xbf16, #tpu.memory_space<vmem>>, %arg2: memref<400x784xbf16, #tpu.memory_space<vmem>>, %arg3: memref<400x1xf32, #tpu.memory_space<vmem>>, %arg4: memref<400x1xf32, #tpu.memory_space<vmem>>, %arg5: memref<1x1xf32, #tpu.memory_space<vmem>>, %arg6: memref<1x512xf32, #tpu.memory_space<vmem>>) attributes {dimension_semantics = [#tpu.dimension_semantics<parallel>], iteration_bounds = array<i64: 2>, scalar_prefetch = 0 : i64, scratch_operands = 0 : i64, tpu.core_type = #tpu.core_type<tc>, window_params = [{transform_indices = @transform_0, window_bounds = array<i64: 784, 512>}, {pipeline_mode = #tpu.pipeline_mode<synchronous>, transform_indices = @transform_1, window_bounds = array<i64: 400, 784>}, {pipeline_mode = #tpu.pipeline_mode<synchronous>, transform_indices = @transform_2, window_bounds = array<i64: 400, 1>}, {pipeline_mode = #tpu.pipeline_mode<synchronous>, transform_indices = @transform_3, window_bounds = array<i64: 400, 1>}, {pipeline_mode = #tpu.pipeline_mode<synchronous>, transform_indices = @transform_4, window_bounds = array<i64: 1, 1>}, {transform_indices = @transform_5, window_bounds = array<i64: 1, 512>}]} {
    %c0 = arith.constant 0 : index
    %c0_0 = arith.constant 0 : index
    %0 = vector.load %arg2[%c0, %c0_0] : memref<400x784xbf16, #tpu.memory_space<vmem>>, vector<400x784xbf16>
    %c0_1 = arith.constant 0 : index
    %c0_2 = arith.constant 0 : index
    %1 = vector.load %arg1[%c0_1, %c0_2] : memref<784x512xbf16, #tpu.memory_space<vmem>>, vector<784x512xbf16>
    %cst = arith.constant dense<0.000000e+00> : vector<400x512xf32>
    %2 = tpu.matmul %0, %1, %cst {dimension_numbers = #tpu.dot_dimension_numbers<[1], [0], [0], [1], [0, 0, 1, 1], [], []>} : vector<400x784xbf16>, vector<784x512xbf16>, vector<400x512xf32> -> vector<400x512xf32>
    %c0_3 = arith.constant 0 : index
    %c0_4 = arith.constant 0 : index
    %3 = vector.load %arg3[%c0_3, %c0_4] : memref<400x1xf32, #tpu.memory_space<vmem>>, vector<400x1xf32>
    %4 = vector.broadcast %3 : vector<400x1xf32> to vector<400x512xf32>
    %5 = arith.addf %2, %4 : vector<400x512xf32>
    %cst_5 = arith.constant 0.000000e+00 : f32
    %6 = vector.broadcast %cst_5 : f32 to vector<400x512xf32>
    %7 = arith.maximumf %5, %6 : vector<400x512xf32>
    %c0_6 = arith.constant 0 : index
    %c0_7 = arith.constant 0 : index
    %8 = vector.load %arg4[%c0_6, %c0_7] : memref<400x1xf32, #tpu.memory_space<vmem>>, vector<400x1xf32>
    %9 = vector.broadcast %8 : vector<400x1xf32> to vector<400x512xf32>
    %10 = arith.mulf %7, %9 : vector<400x512xf32>
    %cst_8 = arith.constant dense<0.000000e+00> : vector<512xf32>
    %11 = vector.multi_reduction <add>, %10, %cst_8 [0] : vector<400x512xf32> to vector<512xf32>
    %12 = vector.shape_cast %11 : vector<512xf32> to vector<1x512xf32>
    %c0_9 = arith.constant 0 : index
    %c0_10 = arith.constant 0 : index
    %13 = vector.load %arg5[%c0_9, %c0_10] : memref<1x1xf32, #tpu.memory_space<vmem>>, vector<1x1xf32>
    %14 = vector.broadcast %13 : vector<1x1xf32> to vector<1x512xf32>
    %15 = arith.addf %12, %14 : vector<1x512xf32>
    %16 = arith.negf %15 : vector<1x512xf32>
    %17 = math.exp %16 : vector<1x512xf32>
    %cst_11 = arith.constant 1.000000e+00 : f32
    %18 = vector.broadcast %cst_11 : f32 to vector<1x512xf32>
    %19 = arith.addf %18, %17 : vector<1x512xf32>
    %20 = arith.divf %18, %19 : vector<1x512xf32>
    %c0_12 = arith.constant 0 : index
    %c0_13 = arith.constant 0 : index
    %21 = vector.load %arg6[%c0_12, %c0_13] : memref<1x512xf32, #tpu.memory_space<vmem>>, vector<1x512xf32>
    tpu.vector_store %arg6[%c0_12, %c0_13], %20 {strides = array<i32>} : memref<1x512xf32, #tpu.memory_space<vmem>>, vector<1x512xf32>,
    return
  }
  func.func @transform_0(%arg0: i32) -> (i32, i32) {
    %c0_i32 = arith.constant 0 : i32
    %c0_i32_0 = arith.constant 0 : i32
    return %c0_i32, %arg0 : i32, i32
  }
  func.func @transform_1(%arg0: i32) -> (i32, i32) {
    %c0_i32 = arith.constant 0 : i32
    %c0_i32_0 = arith.constant 0 : i32
    %c0_i32_1 = arith.constant 0 : i32
    return %c0_i32, %c0_i32_0 : i32, i32
  }
  func.func @transform_2(%arg0: i32) -> (i32, i32) {
    %c0_i32 = arith.constant 0 : i32
    %c0_i32_0 = arith.constant 0 : i32
    %c0_i32_1 = arith.constant 0 : i32
    return %c0_i32, %c0_i32_0 : i32, i32
  }
  func.func @transform_3(%arg0: i32) -> (i32, i32) {
    %c0_i32 = arith.constant 0 : i32
    %c0_i32_0 = arith.constant 0 : i32
    %c0_i32_1 = arith.constant 0 : i32
    return %c0_i32, %c0_i32_0 : i32, i32
  }
  func.func @transform_4(%arg0: i32) -> (i32, i32) {
    %c0_i32 = arith.constant 0 : i32
    %c0_i32_0 = arith.constant 0 : i32
    %c0_i32_1 = arith.constant 0 : i32
    return %c0_i32, %c0_i32_0 : i32, i32
  }
  func.func @transform_5(%arg0: i32) -> (i32, i32) {
    %c0_i32 = arith.constant 0 : i32
    %c0_i32_0 = arith.constant 0 : i32
    return %c0_i32, %arg0 : i32, i32
  }
}

</mosaic_0001>

<bundles_post_ra>
// kernel: discriminator_forward.1
= control target key start
LH: loop header
LB: loop body
LE: loop exit
PB: predicated region body
PF: predicated region fallthrough
CT: control target
= control target key end

     0   :  { %s10331_s0 = inlined_call_operand.vmem [shape: bf16[784,1024], index: 0, kind: input, shape index: {}]   ;;  %s10332_s1 = inlined_call_operand.vmem [shape: bf16[400,784], index: 1, kind: input, shape index: {}]   ;;  %s10333_s2 = inlined_call_operand.vmem [shape: f32[400,1], index: 2, kind: input, shape index: {}]   ;;  %s10334_s3 = inlined_call_operand.vmem [shape: f32[400,1], index: 3, kind: input, shape index: {}]   ;;  %s10335_s4 = inlined_call_operand.<no memory space> [shape: f32[1,1], index: 4, kind: input, shape index: {}]   ;;  %s10336_s5 = inlined_call_operand.vmem [shape: f32[1,1024], index: 5, kind: output, shape index: {}]  }
   0x1   :  { %v10_v0 = vstv %s10335_s4 }
   0x2   :  { %11 = vst [vmem:[#allocation2] sm:$0x1] %v10_v0 }
   0x3   :  { %s8462_s20 = smov 0   ;;  %s8464_s21 = smov 0  }
   0x4   :  { %s8466_s22 = smov 0  }
   0x5 LB: > { %s6577_s4 = sadd.s32 4294967295, %s8425_s22   ;;  %s8479_s23 = sadd.s32 1, %s8425_s22   ;;  %s8425_s22 = sphi %s8466_s22, %s10384_s22   ;;  %s8421_s21 = sphi %s8464_s21, %s10383_s21   ;;  %s8417_s20 = sphi %s8462_s20, %s10382_s20  }
   0x6   : > { %s21_s24 = ssub.s32 %s8425_s22, %s8479_s23  ;;  %s24_s25 = sadd.s32 1, %s8421_s21 }
   0x7   : > { %p22_p0 = scmp.eq.s32.totalorder %s21_s24, 0  ;;  %p31_p1 = scmp.ne.s32.totalorder %s8421_s21, %s8417_s20 }
   0x8   : > { %p32_p2 = scmp.eq.s32.totalorder %s8425_s22, 0  ;;  %p6580_p4 = scmp.ge.s32.totalorder %s8425_s22, 2 }
   0x9   : > { %s8488_s26 = scalar_select %p22_p0, %s8421_s21, %s24_s25  }
   0xa   : > { %p33_p3 = por %p32_p2, %p31_p1  ;;  %179 = sbr.rel (%p6580_p4) target bundleno = 119 (0x77), region = 32 }
  0x11   : > { %182 = sbr.rel (!%p33_p3) target bundleno = 119 (0x77), region = 36  ;;  %s184_s27 = sand.u32 (%p33_p3), 1, %s8421_s21  }
  0x12   : > { %s7012_s28 = sshll.u32 (%p33_p3), %s8425_s22, 4  ;;  %s7813_s29 = smul.u32 (%p33_p3), 1568, %s184_s27 }
  0x13   : > { %s8496_s7 = scalar_lea.vmem (%p33_p3), %s10331_s0, %s7012_s28 }
  0x14   : > { %v202_v1 = vld [vmem:[%s8496_s7] sm:$0xff] (%p33_p3)  ;;  %v204_v2 = vld [vmem:[%s8496_s7 + $0x8] sm:$0xff] (%p33_p3)  ;;  %s8504_s8 = scalar_lea.vmem (%p33_p3), [#allocation3], %s7813_s29 }
  0x15   : > { %v206_v3 = vld [vmem:[%s8496_s7 + $0x20] sm:$0xff] (%p33_p3)  ;;  %v208_v4 = vld [vmem:[%s8496_s7 + $0x28] sm:$0xff] (%p33_p3)  ;;  %203 = vst [vmem:[%s8504_s8] sm:$0xff] (%p33_p3), %v202_v1  ;;  %205 = vst [vmem:[%s8504_s8 + $0x8] sm:$0xff] (%p33_p3), %v204_v2 }
  0x16   : > { %v210_v5 = vld [vmem:[%s8496_s7 + $0x40] sm:$0xff] (%p33_p3)  ;;  %v212_v6 = vld [vmem:[%s8496_s7 + $0x48] sm:$0xff] (%p33_p3)  ;;  %207 = vst [vmem:[%s8504_s8 + $0x10] sm:$0xff] (%p33_p3), %v206_v3  ;;  %209 = vst [vmem:[%s8504_s8 + $0x18] sm:$0xff] (%p33_p3), %v208_v4 }
  0x17   : > { %211 = vst [vmem:[%s8504_s8 + $0x20] sm:$0xff] (%p33_p3), %v210_v5  ;;  %213 = vst [vmem:[%s8504_s8 + $0x28] sm:$0xff] (%p33_p3), %v212_v6  ;;  %v214_v7 = vld [vmem:[%s8496_s7 + $0x60] sm:$0xff] (%p33_p3)  ;;  %v216_v8 = vld [vmem:[%s8496_s7 + $0x68] sm:$0xff] (%p33_p3) }
  0x18   : > { %v218_v9 = vld [vmem:[%s8496_s7 + $0x80] sm:$0xff]  ;;  %215 = vst [vmem:[%s8504_s8 + $0x30] sm:$0xff] %v214_v7  ;;  %217 = vst [vmem:[%s8504_s8 + $0x38] sm:$0xff] %v216_v8  ;;  %v220_v10 = vld [vmem:[%s8496_s7 + $0x88] sm:$0xff] }
  0x19   : > { %219 = vst [vmem:[%s8504_s8 + $0x40] sm:$0xff] %v218_v9  ;;  %v222_v11 = vld [vmem:[%s8496_s7 + $0xa0] sm:$0xff]  ;;  %v224_v12 = vld [vmem:[%s8496_s7 + $0xa8] sm:$0xff]  ;;  %221 = vst [vmem:[%s8504_s8 + $0x48] sm:$0xff] %v220_v10 }
  0x1a   : > { %223 = vst [vmem:[%s8504_s8 + $0x50] sm:$0xff] %v222_v11  ;;  %225 = vst [vmem:[%s8504_s8 + $0x58] sm:$0xff] %v224_v12  ;;  %v226_v13 = vld [vmem:[%s8496_s7 + $0xc0] sm:$0xff]  ;;  %v228_v14 = vld [vmem:[%s8496_s7 + $0xc8] sm:$0xff] }
  0x1b   : > { %v230_v15 = vld [vmem:[%s8496_s7 + $0xe0] sm:$0xff]  ;;  %227 = vst [vmem:[%s8504_s8 + $0x60] sm:$0xff] %v226_v13  ;;  %229 = vst [vmem:[%s8504_s8 + $0x68] sm:$0xff] %v228_v14  ;;  %v232_v16 = vld [vmem:[%s8496_s7 + $0xe8] sm:$0xff] }
  0x1c   : > { %231 = vst [vmem:[%s8504_s8 + $0x70] sm:$0xff] %v230_v15  ;;  %v234_v17 = vld [vmem:[%s8496_s7 + $0x100] sm:$0xff]  ;;  %v236_v18 = vld [vmem:[%s8496_s7 + $0x108] sm:$0xff]  ;;  %233 = vst [vmem:[%s8504_s8 + $0x78] sm:$0xff] %v232_v16 }
  0x1d   : > { %235 = vst [vmem:[%s8504_s8 + $0x80] sm:$0xff] %v234_v17  ;;  %237 = vst [vmem:[%s8504_s8 + $0x88] sm:$0xff] %v236_v18  ;;  %v238_v19 = vld [vmem:[%s8496_s7 + $0x120] sm:$0xff]  ;;  %v240_v20 = vld [vmem:[%s8496_s7 + $0x128] sm:$0xff] }
  0x1e   : > { %v242_v21 = vld [vmem:[%s8496_s7 + $0x140] sm:$0xff]  ;;  %239 = vst [vmem:[%s8504_s8 + $0x90] sm:$0xff] %v238_v19  ;;  %241 = vst [vmem:[%s8504_s8 + $0x98] sm:$0xff] %v240_v20  ;;  %v244_v22 = vld [vmem:[%s8496_s7 + $0x148] sm:$0xff] }
  0x1f   : > { %243 = vst [vmem:[%s8504_s8 + $0xa0] sm:$0xff] %v242_v21  ;;  %v246_v23 = vld [vmem:[%s8496_s7 + $0x160] sm:$0xff]  ;;  %v248_v24 = vld [vmem:[%s8496_s7 + $0x168] sm:$0xff]  ;;  %245 = vst [vmem:[%s8504_s8 + $0xa8] sm:$0xff] %v244_v22 }
  0x20   : > { %247 = vst [vmem:[%s8504_s8 + $0xb0] sm:$0xff] %v246_v23  ;;  %249 = vst [vmem:[%s8504_s8 + $0xb8] sm:$0xff] %v248_v24  ;;  %v250_v25 = vld [vmem:[%s8496_s7 + $0x180] sm:$0xff]  ;;  %v252_v26 = vld [vmem:[%s8496_s7 + $0x188] sm:$0xff] }
  0x21   : > { %v254_v27 = vld [vmem:[%s8496_s7 + $0x1a0] sm:$0xff]  ;;  %251 = vst [vmem:[%s8504_s8 + $0xc0] sm:$0xff] %v250_v25  ;;  %253 = vst [vmem:[%s8504_s8 + $0xc8] sm:$0xff] %v252_v26  ;;  %v256_v28 = vld [vmem:[%s8496_s7 + $0x1a8] sm:$0xff] }
  0x22   : > { %255 = vst [vmem:[%s8504_s8 + $0xd0] sm:$0xff] %v254_v27  ;;  %v258_v29 = vld [vmem:[%s8496_s7 + $0x1c0] sm:$0xff]  ;;  %v260_v30 = vld [vmem:[%s8496_s7 + $0x1c8] sm:$0xff]  ;;  %257 = vst [vmem:[%s8504_s8 + $0xd8] sm:$0xff] %v256_v28 }
  0x23   : > { %259 = vst [vmem:[%s8504_s8 + $0xe0] sm:$0xff] %v258_v29  ;;  %261 = vst [vmem:[%s8504_s8 + $0xe8] sm:$0xff] %v260_v30  ;;  %v262_v31 = vld [vmem:[%s8496_s7 + $0x1e0] sm:$0xff]  ;;  %v264_v32 = vld [vmem:[%s8496_s7 + $0x1e8] sm:$0xff] }
  0x24   : > { %v266_v33 = vld [vmem:[%s8496_s7 + $0x200] sm:$0xff]  ;;  %263 = vst [vmem:[%s8504_s8 + $0xf0] sm:$0xff] %v262_v31  ;;  %265 = vst [vmem:[%s8504_s8 + $0xf8] sm:$0xff] %v264_v32  ;;  %v268_v34 = vld [vmem:[%s8496_s7 + $0x208] sm:$0xff] }
  0x25   : > { %267 = vst [vmem:[%s8504_s8 + $0x100] sm:$0xff] %v266_v33  ;;  %v270_v35 = vld [vmem:[%s8496_s7 + $0x220] sm:$0xff]  ;;  %v272_v36 = vld [vmem:[%s8496_s7 + $0x228] sm:$0xff]  ;;  %269 = vst [vmem:[%s8504_s8 + $0x108] sm:$0xff] %v268_v34 }
  0x26   : > { %271 = vst [vmem:[%s8504_s8 + $0x110] sm:$0xff] %v270_v35  ;;  %273 = vst [vmem:[%s8504_s8 + $0x118] sm:$0xff] %v272_v36  ;;  %v274_v37 = vld [vmem:[%s8496_s7 + $0x240] sm:$0xff]  ;;  %v276_v38 = vld [vmem:[%s8496_s7 + $0x248] sm:$0xff] }
  0x27   : > { %v278_v39 = vld [vmem:[%s8496_s7 + $0x260] sm:$0xff]  ;;  %275 = vst [vmem:[%s8504_s8 + $0x120] sm:$0xff] %v274_v37  ;;  %277 = vst [vmem:[%s8504_s8 + $0x128] sm:$0xff] %v276_v38  ;;  %v280_v40 = vld [vmem:[%s8496_s7 + $0x268] sm:$0xff] }
  0x28   : > { %279 = vst [vmem:[%s8504_s8 + $0x130] sm:$0xff] %v278_v39  ;;  %v282_v41 = vld [vmem:[%s8496_s7 + $0x280] sm:$0xff]  ;;  %v284_v42 = vld [vmem:[%s8496_s7 + $0x288] sm:$0xff]  ;;  %281 = vst [vmem:[%s8504_s8 + $0x138] sm:$0xff] %v280_v40 }
  0x29   : > { %283 = vst [vmem:[%s8504_s8 + $0x140] sm:$0xff] %v282_v41  ;;  %285 = vst [vmem:[%s8504_s8 + $0x148] sm:$0xff] %v284_v42  ;;  %v286_v43 = vld [vmem:[%s8496_s7 + $0x2a0] sm:$0xff]  ;;  %v288_v44 = vld [vmem:[%s8496_s7 + $0x2a8] sm:$0xff] }
  0x2a   : > { %v290_v45 = vld [vmem:[%s8496_s7 + $0x2c0] sm:$0xff]  ;;  %287 = vst [vmem:[%s8504_s8 + $0x150] sm:$0xff] %v286_v43  ;;  %289 = vst [vmem:[%s8504_s8 + $0x158] sm:$0xff] %v288_v44  ;;  %v292_v46 = vld [vmem:[%s8496_s7 + $0x2c8] sm:$0xff] }
  0x2b   : > { %291 = vst [vmem:[%s8504_s8 + $0x160] sm:$0xff] %v290_v45  ;;  %v294_v47 = vld [vmem:[%s8496_s7 + $0x2e0] sm:$0xff]  ;;  %v296_v48 = vld [vmem:[%s8496_s7 + $0x2e8] sm:$0xff]  ;;  %293 = vst [vmem:[%s8504_s8 + $0x168] sm:$0xff] %v292_v46 }
  0x2c   : > { %295 = vst [vmem:[%s8504_s8 + $0x170] sm:$0xff] %v294_v47  ;;  %297 = vst [vmem:[%s8504_s8 + $0x178] sm:$0xff] %v296_v48  ;;  %v298_v49 = vld [vmem:[%s8496_s7 + $0x300] sm:$0xff]  ;;  %v300_v50 = vld [vmem:[%s8496_s7 + $0x308] sm:$0xff] }
  0x2d   : > { %v302_v51 = vld [vmem:[%s8496_s7 + $0x320] sm:$0xff]  ;;  %299 = vst [vmem:[%s8504_s8 + $0x180] sm:$0xff] %v298_v49  ;;  %301 = vst [vmem:[%s8504_s8 + $0x188] sm:$0xff] %v300_v50  ;;  %v304_v52 = vld [vmem:[%s8496_s7 + $0x328] sm:$0xff] }
  0x2e   : > { %303 = vst [vmem:[%s8504_s8 + $0x190] sm:$0xff] %v302_v51  ;;  %v306_v53 = vld [vmem:[%s8496_s7 + $0x340] sm:$0xff]  ;;  %v308_v54 = vld [vmem:[%s8496_s7 + $0x348] sm:$0xff]  ;;  %305 = vst [vmem:[%s8504_s8 + $0x198] sm:$0xff] %v304_v52 }
  0x2f   : > { %307 = vst [vmem:[%s8504_s8 + $0x1a0] sm:$0xff] %v306_v53  ;;  %309 = vst [vmem:[%s8504_s8 + $0x1a8] sm:$0xff] %v308_v54  ;;  %v310_v55 = vld [vmem:[%s8496_s7 + $0x360] sm:$0xff]  ;;  %v312_v56 = vld [vmem:[%s8496_s7 + $0x368] sm:$0xff] }
  0x30   : > { %v314_v57 = vld [vmem:[%s8496_s7 + $0x380] sm:$0xff]  ;;  %311 = vst [vmem:[%s8504_s8 + $0x1b0] sm:$0xff] %v310_v55  ;;  %313 = vst [vmem:[%s8504_s8 + $0x1b8] sm:$0xff] %v312_v56  ;;  %v316_v58 = vld [vmem:[%s8496_s7 + $0x388] sm:$0xff] }
  0x31   : > { %315 = vst [vmem:[%s8504_s8 + $0x1c0] sm:$0xff] %v314_v57  ;;  %v318_v59 = vld [vmem:[%s8496_s7 + $0x3a0] sm:$0xff]  ;;  %v320_v60 = vld [vmem:[%s8496_s7 + $0x3a8] sm:$0xff]  ;;  %317 = vst [vmem:[%s8504_s8 + $0x1c8] sm:$0xff] %v316_v58 }
  0x32   : > { %319 = vst [vmem:[%s8504_s8 + $0x1d0] sm:$0xff] %v318_v59  ;;  %321 = vst [vmem:[%s8504_s8 + $0x1d8] sm:$0xff] %v320_v60  ;;  %v322_v61 = vld [vmem:[%s8496_s7 + $0x3c0] sm:$0xff]  ;;  %v324_v62 = vld [vmem:[%s8496_s7 + $0x3c8] sm:$0xff] }
  0x33   : > { %v326_v63 = vld [vmem:[%s8496_s7 + $0x3e0] sm:$0xff]  ;;  %323 = vst [vmem:[%s8504_s8 + $0x1e0] sm:$0xff] %v322_v61  ;;  %325 = vst [vmem:[%s8504_s8 + $0x1e8] sm:$0xff] %v324_v62  ;;  %v328_v0 = vld [vmem:[%s8496_s7 + $0x3e8] sm:$0xff] }
  0x34   : > { %327 = vst [vmem:[%s8504_s8 + $0x1f0] sm:$0xff] %v326_v63  ;;  %v330_v1 = vld [vmem:[%s8496_s7 + $0x400] sm:$0xff]  ;;  %v332_v2 = vld [vmem:[%s8496_s7 + $0x408] sm:$0xff]  ;;  %329 = vst [vmem:[%s8504_s8 + $0x1f8] sm:$0xff] %v328_v0 }
  0x35   : > { %331 = vst [vmem:[%s8504_s8 + $0x200] sm:$0xff] %v330_v1  ;;  %333 = vst [vmem:[%s8504_s8 + $0x208] sm:$0xff] %v332_v2  ;;  %v334_v3 = vld [vmem:[%s8496_s7 + $0x420] sm:$0xff]  ;;  %v336_v4 = vld [vmem:[%s8496_s7 + $0x428] sm:$0xff] }
  0x36   : > { %v338_v5 = vld [vmem:[%s8496_s7 + $0x440] sm:$0xff]  ;;  %335 = vst [vmem:[%s8504_s8 + $0x210] sm:$0xff] %v334_v3  ;;  %337 = vst [vmem:[%s8504_s8 + $0x218] sm:$0xff] %v336_v4  ;;  %v340_v6 = vld [vmem:[%s8496_s7 + $0x448] sm:$0xff] }
  0x37   : > { %339 = vst [vmem:[%s8504_s8 + $0x220] sm:$0xff] %v338_v5  ;;  %v342_v7 = vld [vmem:[%s8496_s7 + $0x460] sm:$0xff]  ;;  %v344_v8 = vld [vmem:[%s8496_s7 + $0x468] sm:$0xff]  ;;  %341 = vst [vmem:[%s8504_s8 + $0x228] sm:$0xff] %v340_v6 }
  0x38   : > { %343 = vst [vmem:[%s8504_s8 + $0x230] sm:$0xff] %v342_v7  ;;  %345 = vst [vmem:[%s8504_s8 + $0x238] sm:$0xff] %v344_v8  ;;  %v346_v9 = vld [vmem:[%s8496_s7 + $0x480] sm:$0xff]  ;;  %v348_v10 = vld [vmem:[%s8496_s7 + $0x488] sm:$0xff] }
  0x39   : > { %v350_v11 = vld [vmem:[%s8496_s7 + $0x4a0] sm:$0xff]  ;;  %347 = vst [vmem:[%s8504_s8 + $0x240] sm:$0xff] %v346_v9  ;;  %349 = vst [vmem:[%s8504_s8 + $0x248] sm:$0xff] %v348_v10  ;;  %v352_v12 = vld [vmem:[%s8496_s7 + $0x4a8] sm:$0xff] }
  0x3a   : > { %351 = vst [vmem:[%s8504_s8 + $0x250] sm:$0xff] %v350_v11  ;;  %v354_v13 = vld [vmem:[%s8496_s7 + $0x4c0] sm:$0xff]  ;;  %v356_v14 = vld [vmem:[%s8496_s7 + $0x4c8] sm:$0xff]  ;;  %353 = vst [vmem:[%s8504_s8 + $0x258] sm:$0xff] %v352_v12 }
  0x3b   : > { %355 = vst [vmem:[%s8504_s8 + $0x260] sm:$0xff] %v354_v13  ;;  %357 = vst [vmem:[%s8504_s8 + $0x268] sm:$0xff] %v356_v14  ;;  %v358_v15 = vld [vmem:[%s8496_s7 + $0x4e0] sm:$0xff]  ;;  %v360_v16 = vld [vmem:[%s8496_s7 + $0x4e8] sm:$0xff] }
  0x3c   : > { %v362_v17 = vld [vmem:[%s8496_s7 + $0x500] sm:$0xff]  ;;  %359 = vst [vmem:[%s8504_s8 + $0x270] sm:$0xff] %v358_v15  ;;  %361 = vst [vmem:[%s8504_s8 + $0x278] sm:$0xff] %v360_v16  ;;  %v364_v18 = vld [vmem:[%s8496_s7 + $0x508] sm:$0xff] }
  0x3d   : > { %363 = vst [vmem:[%s8504_s8 + $0x280] sm:$0xff] %v362_v17  ;;  %v366_v19 = vld [vmem:[%s8496_s7 + $0x520] sm:$0xff]  ;;  %v368_v20 = vld [vmem:[%s8496_s7 + $0x528] sm:$0xff]  ;;  %365 = vst [vmem:[%s8504_s8 + $0x288] sm:$0xff] %v364_v18 }
  0x3e   : > { %367 = vst [vmem:[%s8504_s8 + $0x290] sm:$0xff] %v366_v19  ;;  %369 = vst [vmem:[%s8504_s8 + $0x298] sm:$0xff] %v368_v20  ;;  %v370_v21 = vld [vmem:[%s8496_s7 + $0x540] sm:$0xff]  ;;  %v372_v22 = vld [vmem:[%s8496_s7 + $0x548] sm:$0xff] }
  0x3f   : > { %v374_v23 = vld [vmem:[%s8496_s7 + $0x560] sm:$0xff]  ;;  %371 = vst [vmem:[%s8504_s8 + $0x2a0] sm:$0xff] %v370_v21  ;;  %373 = vst [vmem:[%s8504_s8 + $0x2a8] sm:$0xff] %v372_v22  ;;  %v376_v24 = vld [vmem:[%s8496_s7 + $0x568] sm:$0xff] }
  0x40   : > { %375 = vst [vmem:[%s8504_s8 + $0x2b0] sm:$0xff] %v374_v23  ;;  %v378_v25 = vld [vmem:[%s8496_s7 + $0x580] sm:$0xff]  ;;  %v380_v26 = vld [vmem:[%s8496_s7 + $0x588] sm:$0xff]  ;;  %377 = vst [vmem:[%s8504_s8 + $0x2b8] sm:$0xff] %v376_v24 }
  0x41   : > { %379 = vst [vmem:[%s8504_s8 + $0x2c0] sm:$0xff] %v378_v25  ;;  %381 = vst [vmem:[%s8504_s8 + $0x2c8] sm:$0xff] %v380_v26  ;;  %v382_v27 = vld [vmem:[%s8496_s7 + $0x5a0] sm:$0xff]  ;;  %v384_v28 = vld [vmem:[%s8496_s7 + $0x5a8] sm:$0xff] }
  0x42   : > { %v386_v29 = vld [vmem:[%s8496_s7 + $0x5c0] sm:$0xff]  ;;  %383 = vst [vmem:[%s8504_s8 + $0x2d0] sm:$0xff] %v382_v27  ;;  %385 = vst [vmem:[%s8504_s8 + $0x2d8] sm:$0xff] %v384_v28  ;;  %v388_v30 = vld [vmem:[%s8496_s7 + $0x5c8] sm:$0xff] }
  0x43   : > { %387 = vst [vmem:[%s8504_s8 + $0x2e0] sm:$0xff] %v386_v29  ;;  %v390_v31 = vld [vmem:[%s8496_s7 + $0x5e0] sm:$0xff]  ;;  %v392_v32 = vld [vmem:[%s8496_s7 + $0x5e8] sm:$0xff]  ;;  %389 = vst [vmem:[%s8504_s8 + $0x2e8] sm:$0xff] %v388_v30 }
  0x44   : > { %391 = vst [vmem:[%s8504_s8 + $0x2f0] sm:$0xff] %v390_v31  ;;  %393 = vst [vmem:[%s8504_s8 + $0x2f8] sm:$0xff] %v392_v32  ;;  %v394_v33 = vld [vmem:[%s8496_s7 + $0x600] sm:$0xff]  ;;  %v396_v34 = vld [vmem:[%s8496_s7 + $0x608] sm:$0xff] }
  0x45   : > { %v398_v35 = vld [vmem:[%s8496_s7 + $0x620] sm:$0xff]  ;;  %395 = vst [vmem:[%s8504_s8 + $0x300] sm:$0xff] %v394_v33  ;;  %397 = vst [vmem:[%s8504_s8 + $0x308] sm:$0xff] %v396_v34  ;;  %v400_v36 = vld [vmem:[%s8496_s7 + $0x628] sm:$0xff] }
  0x46   : > { %399 = vst [vmem:[%s8504_s8 + $0x310] sm:$0xff] %v398_v35  ;;  %v402_v37 = vld [vmem:[%s8496_s7 + $0x640] sm:$0xff]  ;;  %v404_v38 = vld [vmem:[%s8496_s7 + $0x648] sm:$0xff]  ;;  %401 = vst [vmem:[%s8504_s8 + $0x318] sm:$0xff] %v400_v36 }
  0x47   : > { %403 = vst [vmem:[%s8504_s8 + $0x320] sm:$0xff] %v402_v37  ;;  %405 = vst [vmem:[%s8504_s8 + $0x328] sm:$0xff] %v404_v38  ;;  %v406_v39 = vld [vmem:[%s8496_s7 + $0x660] sm:$0xff]  ;;  %v408_v40 = vld [vmem:[%s8496_s7 + $0x668] sm:$0xff] }
  0x48   : > { %v410_v41 = vld [vmem:[%s8496_s7 + $0x680] sm:$0xff]  ;;  %407 = vst [vmem:[%s8504_s8 + $0x330] sm:$0xff] %v406_v39  ;;  %409 = vst [vmem:[%s8504_s8 + $0x338] sm:$0xff] %v408_v40  ;;  %v412_v42 = vld [vmem:[%s8496_s7 + $0x688] sm:$0xff] }
  0x49   : > { %411 = vst [vmem:[%s8504_s8 + $0x340] sm:$0xff] %v410_v41  ;;  %v414_v43 = vld [vmem:[%s8496_s7 + $0x6a0] sm:$0xff]  ;;  %v416_v44 = vld [vmem:[%s8496_s7 + $0x6a8] sm:$0xff]  ;;  %413 = vst [vmem:[%s8504_s8 + $0x348] sm:$0xff] %v412_v42 }
  0x4a   : > { %415 = vst [vmem:[%s8504_s8 + $0x350] sm:$0xff] %v414_v43  ;;  %417 = vst [vmem:[%s8504_s8 + $0x358] sm:$0xff] %v416_v44  ;;  %v418_v45 = vld [vmem:[%s8496_s7 + $0x6c0] sm:$0xff]  ;;  %v420_v46 = vld [vmem:[%s8496_s7 + $0x6c8] sm:$0xff] }
  0x4b   : > { %v422_v47 = vld [vmem:[%s8496_s7 + $0x6e0] sm:$0xff]  ;;  %419 = vst [vmem:[%s8504_s8 + $0x360] sm:$0xff] %v418_v45  ;;  %421 = vst [vmem:[%s8504_s8 + $0x368] sm:$0xff] %v420_v46  ;;  %v424_v48 = vld [vmem:[%s8496_s7 + $0x6e8] sm:$0xff] }
  0x4c   : > { %423 = vst [vmem:[%s8504_s8 + $0x370] sm:$0xff] %v422_v47  ;;  %v426_v49 = vld [vmem:[%s8496_s7 + $0x700] sm:$0xff]  ;;  %v428_v50 = vld [vmem:[%s8496_s7 + $0x708] sm:$0xff]  ;;  %425 = vst [vmem:[%s8504_s8 + $0x378] sm:$0xff] %v424_v48 }
  0x4d   : > { %427 = vst [vmem:[%s8504_s8 + $0x380] sm:$0xff] %v426_v49  ;;  %429 = vst [vmem:[%s8504_s8 + $0x388] sm:$0xff] %v428_v50  ;;  %v430_v51 = vld [vmem:[%s8496_s7 + $0x720] sm:$0xff]  ;;  %v432_v52 = vld [vmem:[%s8496_s7 + $0x728] sm:$0xff] }
  0x4e   : > { %v434_v53 = vld [vmem:[%s8496_s7 + $0x740] sm:$0xff]  ;;  %431 = vst [vmem:[%s8504_s8 + $0x390] sm:$0xff] %v430_v51  ;;  %433 = vst [vmem:[%s8504_s8 + $0x398] sm:$0xff] %v432_v52  ;;  %v436_v54 = vld [vmem:[%s8496_s7 + $0x748] sm:$0xff] }
  0x4f   : > { %435 = vst [vmem:[%s8504_s8 + $0x3a0] sm:$0xff] %v434_v53  ;;  %v438_v55 = vld [vmem:[%s8496_s7 + $0x760] sm:$0xff]  ;;  %v440_v56 = vld [vmem:[%s8496_s7 + $0x768] sm:$0xff]  ;;  %437 = vst [vmem:[%s8504_s8 + $0x3a8] sm:$0xff] %v436_v54 }
  0x50   : > { %439 = vst [vmem:[%s8504_s8 + $0x3b0] sm:$0xff] %v438_v55  ;;  %441 = vst [vmem:[%s8504_s8 + $0x3b8] sm:$0xff] %v440_v56  ;;  %v442_v57 = vld [vmem:[%s8496_s7 + $0x780] sm:$0xff]  ;;  %v444_v58 = vld [vmem:[%s8496_s7 + $0x788] sm:$0xff] }
  0x51   : > { %v446_v59 = vld [vmem:[%s8496_s7 + $0x7a0] sm:$0xff]  ;;  %443 = vst [vmem:[%s8504_s8 + $0x3c0] sm:$0xff] %v442_v57  ;;  %445 = vst [vmem:[%s8504_s8 + $0x3c8] sm:$0xff] %v444_v58  ;;  %v448_v60 = vld [vmem:[%s8496_s7 + $0x7a8] sm:$0xff] }
  0x52   : > { %447 = vst [vmem:[%s8504_s8 + $0x3d0] sm:$0xff] %v446_v59  ;;  %v450_v61 = vld [vmem:[%s8496_s7 + $0x7c0] sm:$0xff]  ;;  %v452_v62 = vld [vmem:[%s8496_s7 + $0x7c8] sm:$0xff]  ;;  %449 = vst [vmem:[%s8504_s8 + $0x3d8] sm:$0xff] %v448_v60 }
  0x53   : > { %451 = vst [vmem:[%s8504_s8 + $0x3e0] sm:$0xff] %v450_v61  ;;  %453 = vst [vmem:[%s8504_s8 + $0x3e8] sm:$0xff] %v452_v62  ;;  %v454_v63 = vld [vmem:[%s8496_s7 + $0x7e0] sm:$0xff]  ;;  %v456_v0 = vld [vmem:[%s8496_s7 + $0x7e8] sm:$0xff] }
  0x54   : > { %v458_v1 = vld [vmem:[%s8496_s7 + $0x800] sm:$0xff]  ;;  %455 = vst [vmem:[%s8504_s8 + $0x3f0] sm:$0xff] %v454_v63  ;;  %457 = vst [vmem:[%s8504_s8 + $0x3f8] sm:$0xff] %v456_v0  ;;  %v460_v2 = vld [vmem:[%s8496_s7 + $0x808] sm:$0xff] }
  0x55   : > { %459 = vst [vmem:[%s8504_s8 + $0x400] sm:$0xff] %v458_v1  ;;  %v462_v3 = vld [vmem:[%s8496_s7 + $0x820] sm:$0xff]  ;;  %v464_v4 = vld [vmem:[%s8496_s7 + $0x828] sm:$0xff]  ;;  %461 = vst [vmem:[%s8504_s8 + $0x408] sm:$0xff] %v460_v2 }
  0x56   : > { %463 = vst [vmem:[%s8504_s8 + $0x410] sm:$0xff] %v462_v3  ;;  %465 = vst [vmem:[%s8504_s8 + $0x418] sm:$0xff] %v464_v4  ;;  %v466_v5 = vld [vmem:[%s8496_s7 + $0x840] sm:$0xff]  ;;  %v468_v6 = vld [vmem:[%s8496_s7 + $0x848] sm:$0xff] }
  0x57   : > { %v470_v7 = vld [vmem:[%s8496_s7 + $0x860] sm:$0xff]  ;;  %467 = vst [vmem:[%s8504_s8 + $0x420] sm:$0xff] %v466_v5  ;;  %469 = vst [vmem:[%s8504_s8 + $0x428] sm:$0xff] %v468_v6  ;;  %v472_v8 = vld [vmem:[%s8496_s7 + $0x868] sm:$0xff] }
  0x58   : > { %471 = vst [vmem:[%s8504_s8 + $0x430] sm:$0xff] %v470_v7  ;;  %v474_v9 = vld [vmem:[%s8496_s7 + $0x880] sm:$0xff]  ;;  %v476_v10 = vld [vmem:[%s8496_s7 + $0x888] sm:$0xff]  ;;  %473 = vst [vmem:[%s8504_s8 + $0x438] sm:$0xff] %v472_v8 }
  0x59   : > { %475 = vst [vmem:[%s8504_s8 + $0x440] sm:$0xff] %v474_v9  ;;  %477 = vst [vmem:[%s8504_s8 + $0x448] sm:$0xff] %v476_v10  ;;  %v478_v11 = vld [vmem:[%s8496_s7 + $0x8a0] sm:$0xff]  ;;  %v480_v12 = vld [vmem:[%s8496_s7 + $0x8a8] sm:$0xff] }
  0x5a   : > { %v482_v13 = vld [vmem:[%s8496_s7 + $0x8c0] sm:$0xff]  ;;  %479 = vst [vmem:[%s8504_s8 + $0x450] sm:$0xff] %v478_v11  ;;  %481 = vst [vmem:[%s8504_s8 + $0x458] sm:$0xff] %v480_v12  ;;  %v484_v14 = vld [vmem:[%s8496_s7 + $0x8c8] sm:$0xff] }
  0x5b   : > { %483 = vst [vmem:[%s8504_s8 + $0x460] sm:$0xff] %v482_v13  ;;  %v486_v15 = vld [vmem:[%s8496_s7 + $0x8e0] sm:$0xff]  ;;  %v488_v16 = vld [vmem:[%s8496_s7 + $0x8e8] sm:$0xff]  ;;  %485 = vst [vmem:[%s8504_s8 + $0x468] sm:$0xff] %v484_v14 }
  0x5c   : > { %487 = vst [vmem:[%s8504_s8 + $0x470] sm:$0xff] %v486_v15  ;;  %489 = vst [vmem:[%s8504_s8 + $0x478] sm:$0xff] %v488_v16  ;;  %v490_v17 = vld [vmem:[%s8496_s7 + $0x900] sm:$0xff]  ;;  %v492_v18 = vld [vmem:[%s8496_s7 + $0x908] sm:$0xff] }
  0x5d   : > { %v494_v19 = vld [vmem:[%s8496_s7 + $0x920] sm:$0xff]  ;;  %491 = vst [vmem:[%s8504_s8 + $0x480] sm:$0xff] %v490_v17  ;;  %493 = vst [vmem:[%s8504_s8 + $0x488] sm:$0xff] %v492_v18  ;;  %v496_v20 = vld [vmem:[%s8496_s7 + $0x928] sm:$0xff] }
  0x5e   : > { %495 = vst [vmem:[%s8504_s8 + $0x490] sm:$0xff] %v494_v19  ;;  %v498_v21 = vld [vmem:[%s8496_s7 + $0x940] sm:$0xff]  ;;  %v500_v22 = vld [vmem:[%s8496_s7 + $0x948] sm:$0xff]  ;;  %497 = vst [vmem:[%s8504_s8 + $0x498] sm:$0xff] %v496_v20 }
  0x5f   : > { %499 = vst [vmem:[%s8504_s8 + $0x4a0] sm:$0xff] %v498_v21  ;;  %501 = vst [vmem:[%s8504_s8 + $0x4a8] sm:$0xff] %v500_v22  ;;  %v502_v23 = vld [vmem:[%s8496_s7 + $0x960] sm:$0xff]  ;;  %v504_v24 = vld [vmem:[%s8496_s7 + $0x968] sm:$0xff] }
  0x60   : > { %v506_v25 = vld [vmem:[%s8496_s7 + $0x980] sm:$0xff]  ;;  %503 = vst [vmem:[%s8504_s8 + $0x4b0] sm:$0xff] %v502_v23  ;;  %505 = vst [vmem:[%s8504_s8 + $0x4b8] sm:$0xff] %v504_v24  ;;  %v508_v26 = vld [vmem:[%s8496_s7 + $0x988] sm:$0xff] }
  0x61   : > { %507 = vst [vmem:[%s8504_s8 + $0x4c0] sm:$0xff] %v506_v25  ;;  %v510_v27 = vld [vmem:[%s8496_s7 + $0x9a0] sm:$0xff]  ;;  %v512_v28 = vld [vmem:[%s8496_s7 + $0x9a8] sm:$0xff]  ;;  %509 = vst [vmem:[%s8504_s8 + $0x4c8] sm:$0xff] %v508_v26 }
  0x62   : > { %511 = vst [vmem:[%s8504_s8 + $0x4d0] sm:$0xff] %v510_v27  ;;  %513 = vst [vmem:[%s8504_s8 + $0x4d8] sm:$0xff] %v512_v28  ;;  %v514_v29 = vld [vmem:[%s8496_s7 + $0x9c0] sm:$0xff]  ;;  %v516_v30 = vld [vmem:[%s8496_s7 + $0x9c8] sm:$0xff] }
  0x63   : > { %v518_v31 = vld [vmem:[%s8496_s7 + $0x9e0] sm:$0xff]  ;;  %515 = vst [vmem:[%s8504_s8 + $0x4e0] sm:$0xff] %v514_v29  ;;  %517 = vst [vmem:[%s8504_s8 + $0x4e8] sm:$0xff] %v516_v30  ;;  %v520_v32 = vld [vmem:[%s8496_s7 + $0x9e8] sm:$0xff] }
  0x64   : > { %519 = vst [vmem:[%s8504_s8 + $0x4f0] sm:$0xff] %v518_v31  ;;  %v522_v33 = vld [vmem:[%s8496_s7 + $0xa00] sm:$0xff]  ;;  %v524_v34 = vld [vmem:[%s8496_s7 + $0xa08] sm:$0xff]  ;;  %521 = vst [vmem:[%s8504_s8 + $0x4f8] sm:$0xff] %v520_v32 }
  0x65   : > { %523 = vst [vmem:[%s8504_s8 + $0x500] sm:$0xff] %v522_v33  ;;  %525 = vst [vmem:[%s8504_s8 + $0x508] sm:$0xff] %v524_v34  ;;  %v526_v35 = vld [vmem:[%s8496_s7 + $0xa20] sm:$0xff]  ;;  %v528_v36 = vld [vmem:[%s8496_s7 + $0xa28] sm:$0xff] }
  0x66   : > { %v530_v37 = vld [vmem:[%s8496_s7 + $0xa40] sm:$0xff]  ;;  %527 = vst [vmem:[%s8504_s8 + $0x510] sm:$0xff] %v526_v35  ;;  %529 = vst [vmem:[%s8504_s8 + $0x518] sm:$0xff] %v528_v36  ;;  %v532_v38 = vld [vmem:[%s8496_s7 + $0xa48] sm:$0xff] }
  0x67   : > { %531 = vst [vmem:[%s8504_s8 + $0x520] sm:$0xff] %v530_v37  ;;  %v534_v39 = vld [vmem:[%s8496_s7 + $0xa60] sm:$0xff]  ;;  %v536_v40 = vld [vmem:[%s8496_s7 + $0xa68] sm:$0xff]  ;;  %533 = vst [vmem:[%s8504_s8 + $0x528] sm:$0xff] %v532_v38 }
  0x68   : > { %535 = vst [vmem:[%s8504_s8 + $0x530] sm:$0xff] %v534_v39  ;;  %537 = vst [vmem:[%s8504_s8 + $0x538] sm:$0xff] %v536_v40  ;;  %v538_v41 = vld [vmem:[%s8496_s7 + $0xa80] sm:$0xff]  ;;  %v540_v42 = vld [vmem:[%s8496_s7 + $0xa88] sm:$0xff] }
  0x69   : > { %v542_v43 = vld [vmem:[%s8496_s7 + $0xaa0] sm:$0xff]  ;;  %539 = vst [vmem:[%s8504_s8 + $0x540] sm:$0xff] %v538_v41  ;;  %541 = vst [vmem:[%s8504_s8 + $0x548] sm:$0xff] %v540_v42  ;;  %v544_v44 = vld [vmem:[%s8496_s7 + $0xaa8] sm:$0xff] }
  0x6a   : > { %543 = vst [vmem:[%s8504_s8 + $0x550] sm:$0xff] %v542_v43  ;;  %v546_v45 = vld [vmem:[%s8496_s7 + $0xac0] sm:$0xff]  ;;  %v548_v46 = vld [vmem:[%s8496_s7 + $0xac8] sm:$0xff]  ;;  %545 = vst [vmem:[%s8504_s8 + $0x558] sm:$0xff] %v544_v44 }
  0x6b   : > { %547 = vst [vmem:[%s8504_s8 + $0x560] sm:$0xff] %v546_v45  ;;  %549 = vst [vmem:[%s8504_s8 + $0x568] sm:$0xff] %v548_v46  ;;  %v550_v47 = vld [vmem:[%s8496_s7 + $0xae0] sm:$0xff]  ;;  %v552_v48 = vld [vmem:[%s8496_s7 + $0xae8] sm:$0xff] }
  0x6c   : > { %v554_v49 = vld [vmem:[%s8496_s7 + $0xb00] sm:$0xff]  ;;  %551 = vst [vmem:[%s8504_s8 + $0x570] sm:$0xff] %v550_v47  ;;  %553 = vst [vmem:[%s8504_s8 + $0x578] sm:$0xff] %v552_v48  ;;  %v556_v50 = vld [vmem:[%s8496_s7 + $0xb08] sm:$0xff] }
  0x6d   : > { %555 = vst [vmem:[%s8504_s8 + $0x580] sm:$0xff] %v554_v49  ;;  %v558_v51 = vld [vmem:[%s8496_s7 + $0xb20] sm:$0xff]  ;;  %v560_v52 = vld [vmem:[%s8496_s7 + $0xb28] sm:$0xff]  ;;  %557 = vst [vmem:[%s8504_s8 + $0x588] sm:$0xff] %v556_v50 }
  0x6e   : > { %559 = vst [vmem:[%s8504_s8 + $0x590] sm:$0xff] %v558_v51  ;;  %561 = vst [vmem:[%s8504_s8 + $0x598] sm:$0xff] %v560_v52  ;;  %v562_v53 = vld [vmem:[%s8496_s7 + $0xb40] sm:$0xff]  ;;  %v564_v54 = vld [vmem:[%s8496_s7 + $0xb48] sm:$0xff] }
  0x6f   : > { %v566_v55 = vld [vmem:[%s8496_s7 + $0xb60] sm:$0xff]  ;;  %563 = vst [vmem:[%s8504_s8 + $0x5a0] sm:$0xff] %v562_v53  ;;  %565 = vst [vmem:[%s8504_s8 + $0x5a8] sm:$0xff] %v564_v54  ;;  %v568_v56 = vld [vmem:[%s8496_s7 + $0xb68] sm:$0xff] }
  0x70   : > { %567 = vst [vmem:[%s8504_s8 + $0x5b0] sm:$0xff] %v566_v55  ;;  %v570_v57 = vld [vmem:[%s8496_s7 + $0xb80] sm:$0xff]  ;;  %v572_v58 = vld [vmem:[%s8496_s7 + $0xb88] sm:$0xff]  ;;  %569 = vst [vmem:[%s8504_s8 + $0x5b8] sm:$0xff] %v568_v56 }
  0x71   : > { %571 = vst [vmem:[%s8504_s8 + $0x5c0] sm:$0xff] %v570_v57  ;;  %573 = vst [vmem:[%s8504_s8 + $0x5c8] sm:$0xff] %v572_v58  ;;  %v574_v59 = vld [vmem:[%s8496_s7 + $0xba0] sm:$0xff]  ;;  %v576_v60 = vld [vmem:[%s8496_s7 + $0xba8] sm:$0xff] }
  0x72   : > { %v578_v61 = vld [vmem:[%s8496_s7 + $0xbc0] sm:$0xff]  ;;  %575 = vst [vmem:[%s8504_s8 + $0x5d0] sm:$0xff] %v574_v59  ;;  %577 = vst [vmem:[%s8504_s8 + $0x5d8] sm:$0xff] %v576_v60  ;;  %v580_v62 = vld [vmem:[%s8496_s7 + $0xbc8] sm:$0xff] }
  0x73   : > { %579 = vst [vmem:[%s8504_s8 + $0x5e0] sm:$0xff] %v578_v61  ;;  %v582_v63 = vld [vmem:[%s8496_s7 + $0xbe0] sm:$0xff]  ;;  %v584_v0 = vld [vmem:[%s8496_s7 + $0xbe8] sm:$0xff]  ;;  %581 = vst [vmem:[%s8504_s8 + $0x5e8] sm:$0xff] %v580_v62 }
  0x74   : > { %583 = vst [vmem:[%s8504_s8 + $0x5f0] sm:$0xff] %v582_v63  ;;  %585 = vst [vmem:[%s8504_s8 + $0x5f8] sm:$0xff] %v584_v0  ;;  %v586_v1 = vld [vmem:[%s8496_s7 + $0xc00] sm:$0xff]  ;;  %v588_v2 = vld [vmem:[%s8496_s7 + $0xc08] sm:$0xff] }
  0x75   : > { %v590_v3 = vld [vmem:[%s8496_s7 + $0xc20] sm:$0xff]  ;;  %587 = vst [vmem:[%s8504_s8 + $0x600] sm:$0xff] %v586_v1  ;;  %589 = vst [vmem:[%s8504_s8 + $0x608] sm:$0xff] %v588_v2  ;;  %v592_v4 = vld [vmem:[%s8496_s7 + $0xc28] sm:$0xff] }
  0x76   : > { %591 = vst [vmem:[%s8504_s8 + $0x610] sm:$0xff] %v590_v3  ;;  %593 = vst [vmem:[%s8504_s8 + $0x618] sm:$0xff] %v592_v4 }
  0x77 PF: > { %p6583_p5 = scmp.ge.s32.totalorder %s8425_s22, 1  ;;  %p598_p6 = scmp.lt.s32.totalorder %s8425_s22, 3 }
  0x79   : > { %p599_p7 = pnand %p6583_p5, %p598_p6 }
  0x7b   : > { %602 = sbr.rel (%p599_p7) target bundleno = 1265 (0x4f1), region = 59 }
  0x82   : > { %s605_s9 = sand.u32 1, %s8417_s20   ;;  %v7941_v5 = vld [vmem:[%s10332_s1 + $0x4] ss:$28 sps:$4 sm:$0xff]   ;;  %vm3189_vm0 = vcmask 130048   ;;  %s6584_s6 = sshll.u32 %s6577_s4, 2 }
  0x83   : > { %s7814_s10 = smul.u32 1568, %s605_s9  ;;  %3297 = vmatprep.mubr.bf16.mxu0 %v7941_v5  ;;  %4429 = vmatprep.mubr.bf16.mxu1 %v7941_v5  ;;  %p633_p8 = scmp.lt.s32.totalorder %s6584_s6, 7 }
  0x85   : > { %s8898_s13 = scalar_lea.vmem [#allocation3], %s7814_s10  ;;  %s10386_s6 = smov (!%p633_p8, %s6584_s6), 7 }
  0x86   : > { %v7843_v6 = vld [vmem:[%s8898_s13 + $0x4] ss:$16 sps:$4 sm:$0xff]   ;;  %v7845_v7 = vld [vmem:[%s8898_s13 + $0xc] ss:$16 sps:$4 sm:$0xff]   ;;  %v7847_v8 = vld [vmem:[%s8898_s13] ss:$16 sps:$4 sm:$0xff]   ;;  %s635_s9 = scalar_lea.vmem %s10336_s5, %s10386_s6 }
  0x87   : > { %3265 = vmatprep.subr.bf16.mxu0 %v7843_v6  ;;  %v7848_v9 = vld [vmem:[%s8898_s13 + $0x8] ss:$16 sps:$4 sm:$0xff]   ;;  %4397 = vmatprep.subr.bf16.mxu1 %v7845_v7  ;;  %v7849_v10 = vld [vmem:[%s8898_s13 + $0x24] ss:$16 sps:$4 sm:$0xff]   ;;  %v7851_v11 = vld [vmem:[%s8898_s13 + $0x2c] ss:$16 sps:$4 sm:$0xff]  }
  0x88   : > { %3266 = vmatpush1.bf16.msra.mxu0 %v7847_v8  ;;  %4398 = vmatpush1.bf16.msra.mxu1 %v7848_v9  ;;  %v7853_v12 = vld [vmem:[%s8898_s13 + $0x20] ss:$16 sps:$4 sm:$0xff]   ;;  %v7854_v13 = vld [vmem:[%s8898_s13 + $0x28] ss:$16 sps:$4 sm:$0xff]   ;;  %v7855_v14 = vld [vmem:[%s8898_s13 + $0x44] ss:$16 sps:$4 sm:$0xff]  }
  0x89   : > { %3267 = vmatprep.subr.bf16.mxu0 %v7849_v10  ;;  %4399 = vmatprep.subr.bf16.mxu1 %v7851_v11  ;;  %v7857_v15 = vld [vmem:[%s8898_s13 + $0x4c] ss:$16 sps:$4 sm:$0xff]   ;;  %v7859_v16 = vld [vmem:[%s8898_s13 + $0x40] ss:$16 sps:$4 sm:$0xff]   ;;  %v7860_v17 = vld [vmem:[%s8898_s13 + $0x48] ss:$16 sps:$4 sm:$0xff]  }
  0x8a   : > { %v7861_v18 = vld [vmem:[%s8898_s13 + $0x64] ss:$16 sps:$4 sm:$0xff]   ;;  %v7863_v19 = vld [vmem:[%s8898_s13 + $0x6c] ss:$16 sps:$4 sm:$0xff]   ;;  %v7865_v20 = vld [vmem:[%s8898_s13 + $0x60] ss:$16 sps:$4 sm:$0xff]  }
  0x8b   : > { %v7866_v21 = vld [vmem:[%s8898_s13 + $0x68] ss:$16 sps:$4 sm:$0xff]   ;;  %v7867_v22 = vld [vmem:[%s8898_s13 + $0x84] ss:$16 sps:$4 sm:$0xff]   ;;  %v7869_v23 = vld [vmem:[%s8898_s13 + $0x8c] ss:$16 sps:$4 sm:$0xff]  }
  0x8c   : > { %3268 = vmatpush1.bf16.msra.mxu0 %v7853_v12  ;;  %4400 = vmatpush1.bf16.msra.mxu1 %v7854_v13  ;;  %v7871_v24 = vld [vmem:[%s8898_s13 + $0x80] ss:$16 sps:$4 sm:$0xff]   ;;  %v7872_v25 = vld [vmem:[%s8898_s13 + $0x88] ss:$16 sps:$4 sm:$0xff]   ;;  %v7873_v26 = vld [vmem:[%s8898_s13 + $0xa4] ss:$16 sps:$4 sm:$0xff]  }
  0x8d   : > { %3269 = vmatprep.subr.bf16.mxu0 %v7855_v14  ;;  %4401 = vmatprep.subr.bf16.mxu1 %v7857_v15  ;;  %v7875_v27 = vld [vmem:[%s8898_s13 + $0xac] ss:$16 sps:$4 sm:$0xff]   ;;  %v7877_v28 = vld [vmem:[%s8898_s13 + $0xa0] ss:$16 sps:$4 sm:$0xff]   ;;  %v7878_v29 = vld [vmem:[%s8898_s13 + $0xa8] ss:$16 sps:$4 sm:$0xff]  }
  0x8e   : > { %v7879_v30 = vld [vmem:[%s8898_s13 + $0xc4] ss:$16 sps:$4 sm:$0xff]   ;;  %v7881_v31 = vld [vmem:[%s8898_s13 + $0xcc] ss:$16 sps:$4 sm:$0xff]   ;;  %v7883_v32 = vld [vmem:[%s8898_s13 + $0xc0] ss:$16 sps:$4 sm:$0xff]  }
  0x8f   : > { %v7884_v33 = vld [vmem:[%s8898_s13 + $0xc8] ss:$16 sps:$4 sm:$0xff]   ;;  %v7885_v34 = vld [vmem:[%s8898_s13 + $0xe4] ss:$16 sps:$4 sm:$0xff]   ;;  %v7887_v35 = vld [vmem:[%s8898_s13 + $0xec] ss:$16 sps:$4 sm:$0xff]  }
  0x90   : > { %3270 = vmatpush1.bf16.msra.mxu0 %v7859_v16  ;;  %4402 = vmatpush1.bf16.msra.mxu1 %v7860_v17  ;;  %v7889_v36 = vld [vmem:[%s8898_s13 + $0xe0] ss:$16 sps:$4 sm:$0xff]   ;;  %v7890_v37 = vld [vmem:[%s8898_s13 + $0xe8] ss:$16 sps:$4 sm:$0xff]   ;;  %v7891_v38 = vld [vmem:[%s8898_s13 + $0x104] ss:$16 sps:$4 sm:$0xff]  }
  0x91   : > { %3271 = vmatprep.subr.bf16.mxu0 %v7861_v18  ;;  %4403 = vmatprep.subr.bf16.mxu1 %v7863_v19  ;;  %v7893_v39 = vld [vmem:[%s8898_s13 + $0x10c] ss:$16 sps:$4 sm:$0xff]   ;;  %v7895_v40 = vld [vmem:[%s8898_s13 + $0x100] ss:$16 sps:$4 sm:$0xff]   ;;  %v7896_v41 = vld [vmem:[%s8898_s13 + $0x108] ss:$16 sps:$4 sm:$0xff]  }
  0x92   : > { %v7897_v42 = vld [vmem:[%s8898_s13 + $0x124] ss:$16 sps:$4 sm:$0xff]   ;;  %v7899_v43 = vld [vmem:[%s8898_s13 + $0x12c] ss:$16 sps:$4 sm:$0xff]   ;;  %v7901_v44 = vld [vmem:[%s8898_s13 + $0x120] ss:$16 sps:$4 sm:$0xff]  }
  0x93   : > { %v7902_v45 = vld [vmem:[%s8898_s13 + $0x128] ss:$16 sps:$4 sm:$0xff]   ;;  %v7903_v46 = vld [vmem:[%s8898_s13 + $0x144] ss:$16 sps:$4 sm:$0xff]   ;;  %v7905_v47 = vld [vmem:[%s8898_s13 + $0x14c] ss:$16 sps:$4 sm:$0xff]  }
  0x94   : > { %3272 = vmatpush1.bf16.msra.mxu0 %v7865_v20  ;;  %4404 = vmatpush1.bf16.msra.mxu1 %v7866_v21  ;;  %v7907_v48 = vld [vmem:[%s8898_s13 + $0x140] ss:$16 sps:$4 sm:$0xff]   ;;  %v7908_v49 = vld [vmem:[%s8898_s13 + $0x148] ss:$16 sps:$4 sm:$0xff]   ;;  %v7909_v50 = vld [vmem:[%s8898_s13 + $0x164] ss:$16 sps:$4 sm:$0xff]  }
  0x95   : > { %3273 = vmatprep.subr.bf16.mxu0 %v7867_v22  ;;  %4405 = vmatprep.subr.bf16.mxu1 %v7869_v23  ;;  %v7911_v51 = vld [vmem:[%s8898_s13 + $0x16c] ss:$16 sps:$4 sm:$0xff]   ;;  %v7913_v52 = vld [vmem:[%s8898_s13 + $0x160] ss:$16 sps:$4 sm:$0xff]   ;;  %v7914_v53 = vld [vmem:[%s8898_s13 + $0x168] ss:$16 sps:$4 sm:$0xff]  }
  0x96   : > { %v7915_v54 = vld [vmem:[%s8898_s13 + $0x184] ss:$16 sps:$4 sm:$0xff]   ;;  %v7917_v55 = vld [vmem:[%s8898_s13 + $0x18c] ss:$16 sps:$4 sm:$0xff]   ;;  %v7919_v56 = vld [vmem:[%s8898_s13 + $0x180] ss:$16 sps:$4 sm:$0xff]  }
  0x97   : > { %v7920_v57 = vld [vmem:[%s8898_s13 + $0x188] ss:$16 sps:$4 sm:$0xff]   ;;  %v7921_v58 = vld [vmem:[%s8898_s13 + $0x1a4] ss:$16 sps:$4 sm:$0xff]   ;;  %v7923_v59 = vld [vmem:[%s8898_s13 + $0x1ac] ss:$16 sps:$4 sm:$0xff]  }
  0x98   : > { %3274 = vmatpush1.bf16.msra.mxu0 %v7871_v24  ;;  %4406 = vmatpush1.bf16.msra.mxu1 %v7872_v25  ;;  %v7925_v60 = vld [vmem:[%s8898_s13 + $0x1a0] ss:$16 sps:$4 sm:$0xff]   ;;  %v7926_v61 = vld [vmem:[%s8898_s13 + $0x1a8] ss:$16 sps:$4 sm:$0xff]   ;;  %v7927_v62 = vld [vmem:[%s8898_s13 + $0x1c4] ss:$16 sps:$4 sm:$0xff]  }
  0x99   : > { %3275 = vmatprep.subr.bf16.mxu0 %v7873_v26  ;;  %4407 = vmatprep.subr.bf16.mxu1 %v7875_v27  ;;  %v7929_v63 = vld [vmem:[%s8898_s13 + $0x1cc] ss:$16 sps:$4 sm:$0xff]   ;;  %v7931_v0 = vld [vmem:[%s8898_s13 + $0x1c0] ss:$16 sps:$4 sm:$0xff]   ;;  %v7932_v1 = vld [vmem:[%s8898_s13 + $0x1c8] ss:$16 sps:$4 sm:$0xff]  }
  0x9a   : > { %v7933_v2 = vld [vmem:[%s8898_s13 + $0x1e4] ss:$16 sps:$4 sm:$0xff]   ;;  %v7935_v3 = vld [vmem:[%s8898_s13 + $0x1ec] ss:$16 sps:$4 sm:$0xff]   ;;  %v7937_v4 = vld [vmem:[%s8898_s13 + $0x1e0] ss:$16 sps:$4 sm:$0xff]  }
  0x9b   : > { %v7938_v5 = vld [vmem:[%s8898_s13 + $0x1e8] ss:$16 sps:$4 sm:$0xff]   ;;  %v7944_v6 = vld [vmem:[%s8898_s13 + $0x204] ss:$16 sps:$4 sm:$0xff]   ;;  %v7947_v7 = vld [vmem:[%s8898_s13 + $0x20c] ss:$16 sps:$4 sm:$0xff]  }
  0x9c   : > { %3276 = vmatpush1.bf16.msra.mxu0 %v7877_v28  ;;  %4408 = vmatpush1.bf16.msra.mxu1 %v7878_v29  ;;  %v7939_v8 = vld [vmem:[%s10332_s1] ss:$28 sps:$4 sm:$0xff]   ;;  %v7953_v12 = vld [vmem:[%s8898_s13 + $0x224] ss:$16 sps:$4 sm:$0xff]   ;;  %v7959_v28 = vld [vmem:[%s10332_s1 + $0x70] ss:$28 sps:$4 sm:$0xff]  }
  0x9d   : > { %3277 = vmatprep.subr.bf16.mxu0 %v7879_v30  ;;  %4409 = vmatprep.subr.bf16.mxu1 %v7881_v31  ;;  %v7942_v9 = vld [vmem:[%s8898_s13 + $0x200] ss:$16 sps:$4 sm:$0xff]   ;;  %v7945_v10 = vld [vmem:[%s8898_s13 + $0x208] ss:$16 sps:$4 sm:$0xff]   ;;  %v7956_v13 = vld [vmem:[%s8898_s13 + $0x22c] ss:$16 sps:$4 sm:$0xff]  }
  0x9e   : > { %v7948_v11 = vld [vmem:[%s10332_s1 + $0x3c] ss:$28 sps:$4 sm:$0xff]   ;;  %v7951_v14 = vld [vmem:[%s8898_s13 + $0x220] ss:$16 sps:$4 sm:$0xff]   ;;  %v7960_v29 = vld [vmem:[%s10332_s1 + $0xac] ss:$28 sps:$4 sm:$0xff]  }
  0x9f   : > { %v7954_v15 = vld [vmem:[%s8898_s13 + $0x228] ss:$16 sps:$4 sm:$0xff]   ;;  %v7965_v16 = vld [vmem:[%s8898_s13 + $0x244] ss:$16 sps:$4 sm:$0xff]   ;;  %v7968_v17 = vld [vmem:[%s8898_s13 + $0x24c] ss:$16 sps:$4 sm:$0xff]  }
  0xa0   : > { %3278 = vmatpush1.bf16.msra.mxu0 %v7883_v32  ;;  %4410 = vmatpush1.bf16.msra.mxu1 %v7884_v33  ;;  %v7950_v18 = vld [vmem:[%s10332_s1 + $0x38] ss:$28 sps:$4 sm:$0xff]   ;;  %v7977_v23 = vld [vmem:[%s8898_s13 + $0x26c] ss:$16 sps:$4 sm:$0xff]  }
  0xa1   : > { %3279 = vmatprep.subr.bf16.mxu0 %v7885_v34  ;;  %4411 = vmatprep.subr.bf16.mxu1 %v7887_v35  ;;  %v7957_v19 = vld [vmem:[%s10332_s1 + $0x74] ss:$28 sps:$4 sm:$0xff]   ;;  %v7966_v21 = vld [vmem:[%s8898_s13 + $0x248] ss:$16 sps:$4 sm:$0xff]  }
  0xa2   : > { %v7963_v20 = vld [vmem:[%s8898_s13 + $0x240] ss:$16 sps:$4 sm:$0xff]   ;;  %v7974_v22 = vld [vmem:[%s8898_s13 + $0x264] ss:$16 sps:$4 sm:$0xff]   ;;  %v7975_v25 = vld [vmem:[%s8898_s13 + $0x268] ss:$16 sps:$4 sm:$0xff]  }
  0xa3   : > { %v7972_v24 = vld [vmem:[%s8898_s13 + $0x260] ss:$16 sps:$4 sm:$0xff]   ;;  %v7986_v26 = vld [vmem:[%s8898_s13 + $0x284] ss:$16 sps:$4 sm:$0xff]   ;;  %v7989_v27 = vld [vmem:[%s8898_s13 + $0x28c] ss:$16 sps:$4 sm:$0xff]  }
  0xa4   : > { %3280 = vmatpush1.bf16.msra.mxu0 %v7889_v36  ;;  %4412 = vmatpush1.bf16.msra.mxu1 %v7890_v37  ;;  %v7984_v30 = vld [vmem:[%s8898_s13 + $0x280] ss:$16 sps:$4 sm:$0xff]   ;;  %v7987_v31 = vld [vmem:[%s8898_s13 + $0x288] ss:$16 sps:$4 sm:$0xff]   ;;  %v7997_v32 = vld [vmem:[%s8898_s13 + $0x2a4] ss:$16 sps:$4 sm:$0xff]  }
  0xa5   : > { %3281 = vmatprep.subr.bf16.mxu0 %v7891_v38  ;;  %4413 = vmatprep.subr.bf16.mxu1 %v7893_v39  ;;  %v8000_v33 = vld [vmem:[%s8898_s13 + $0x2ac] ss:$16 sps:$4 sm:$0xff]   ;;  %v7995_v34 = vld [vmem:[%s8898_s13 + $0x2a0] ss:$16 sps:$4 sm:$0xff]   ;;  %v7998_v35 = vld [vmem:[%s8898_s13 + $0x2a8] ss:$16 sps:$4 sm:$0xff]  }
  0xa6   : > { %v8007_v36 = vld [vmem:[%s8898_s13 + $0x2c4] ss:$16 sps:$4 sm:$0xff]   ;;  %v8010_v37 = vld [vmem:[%s8898_s13 + $0x2cc] ss:$16 sps:$4 sm:$0xff]  }
  0xa7   : > { %v7962_v38 = vld [vmem:[%s10332_s1 + $0xa8] ss:$28 sps:$4 sm:$0xff]  }
  0xa8   : > { %3282 = vmatpush1.bf16.msra.mxu0 %v7895_v40  ;;  %4414 = vmatpush1.bf16.msra.mxu1 %v7896_v41  ;;  %v7969_v39 = vld [vmem:[%s10332_s1 + $0xe4] ss:$28 sps:$4 sm:$0xff]   ;;  %v8008_v41 = vld [vmem:[%s8898_s13 + $0x2c8] ss:$16 sps:$4 sm:$0xff]  }
  0xa9   : > { %3283 = vmatprep.subr.bf16.mxu0 %v7897_v42  ;;  %4415 = vmatprep.subr.bf16.mxu1 %v7899_v43  ;;  %v8005_v40 = vld [vmem:[%s8898_s13 + $0x2c0] ss:$16 sps:$4 sm:$0xff]   ;;  %v8019_v42 = vld [vmem:[%s8898_s13 + $0x2e4] ss:$16 sps:$4 sm:$0xff]   ;;  %v8022_v43 = vld [vmem:[%s8898_s13 + $0x2ec] ss:$16 sps:$4 sm:$0xff]  }
  0xac   : > { %3284 = vmatpush1.bf16.msra.mxu0 %v7901_v44  ;;  %4416 = vmatpush1.bf16.msra.mxu1 %v7902_v45  ;;  %v8017_v44 = vld [vmem:[%s8898_s13 + $0x2e0] ss:$16 sps:$4 sm:$0xff]   ;;  %v8020_v45 = vld [vmem:[%s8898_s13 + $0x2e8] ss:$16 sps:$4 sm:$0xff]  }
  0xad   : > { %3285 = vmatprep.subr.bf16.mxu0 %v7903_v46  ;;  %4417 = vmatprep.subr.bf16.mxu1 %v7905_v47  ;;  %v8028_v46 = vld [vmem:[%s8898_s13 + $0x304] ss:$16 sps:$4 sm:$0xff]   ;;  %v8031_v47 = vld [vmem:[%s8898_s13 + $0x30c] ss:$16 sps:$4 sm:$0xff]  }
  0xb0   : > { %3286 = vmatpush1.bf16.msra.mxu0 %v7907_v48  ;;  %4418 = vmatpush1.bf16.msra.mxu1 %v7908_v49  ;;  %v7971_v48 = vld [vmem:[%s10332_s1 + $0xe0] ss:$28 sps:$4 sm:$0xff]  }
  0xb1   : > { %3287 = vmatprep.subr.bf16.mxu0 %v7909_v50  ;;  %4419 = vmatprep.subr.bf16.mxu1 %v7911_v51  ;;  %v7978_v49 = vld [vmem:[%s10332_s1 + $0x11c] ss:$28 sps:$4 sm:$0xff]   ;;  %v8026_v50 = vld [vmem:[%s8898_s13 + $0x300] ss:$16 sps:$4 sm:$0xff]  }
  0xb2   : > { %v8029_v51 = vld [vmem:[%s8898_s13 + $0x308] ss:$16 sps:$4 sm:$0xff]  }
  0xb4   : > { %3288 = vmatpush1.bf16.msra.mxu0 %v7913_v52  ;;  %4420 = vmatpush1.bf16.msra.mxu1 %v7914_v53  ;;  %v8040_v52 = vld [vmem:[%s8898_s13 + $0x324] ss:$16 sps:$4 sm:$0xff]   ;;  %v8043_v53 = vld [vmem:[%s8898_s13 + $0x32c] ss:$16 sps:$4 sm:$0xff]  }
  0xb5   : > { %3289 = vmatprep.subr.bf16.mxu0 %v7915_v54  ;;  %4421 = vmatprep.subr.bf16.mxu1 %v7917_v55  ;;  %v8038_v54 = vld [vmem:[%s8898_s13 + $0x320] ss:$16 sps:$4 sm:$0xff]  }
  0xb6   : > { %v7980_v55 = vld [vmem:[%s10332_s1 + $0x118] ss:$28 sps:$4 sm:$0xff]  }
  0xb8   : > { %3290 = vmatpush1.bf16.msra.mxu0 %v7919_v56  ;;  %4422 = vmatpush1.bf16.msra.mxu1 %v7920_v57  ;;  %v8041_v56 = vld [vmem:[%s8898_s13 + $0x328] ss:$16 sps:$4 sm:$0xff]   ;;  %v7981_v57 = vld [vmem:[%s10332_s1 + $0x154] ss:$28 sps:$4 sm:$0xff]  }
  0xb9   : > { %3291 = vmatprep.subr.bf16.mxu0 %v7921_v58  ;;  %4423 = vmatprep.subr.bf16.mxu1 %v7923_v59  ;;  %v8049_v58 = vld [vmem:[%s8898_s13 + $0x344] ss:$16 sps:$4 sm:$0xff]   ;;  %v8052_v59 = vld [vmem:[%s8898_s13 + $0x34c] ss:$16 sps:$4 sm:$0xff]  }
  0xbc   : > { %3292 = vmatpush1.bf16.msra.mxu0 %v7925_v60  ;;  %4424 = vmatpush1.bf16.msra.mxu1 %v7926_v61  ;;  %v8047_v60 = vld [vmem:[%s8898_s13 + $0x340] ss:$16 sps:$4 sm:$0xff]   ;;  %v8050_v61 = vld [vmem:[%s8898_s13 + $0x348] ss:$16 sps:$4 sm:$0xff]  }
  0xbd   : > { %3293 = vmatprep.subr.bf16.mxu0 %v7927_v62  ;;  %4425 = vmatprep.subr.bf16.mxu1 %v7929_v63  ;;  %v8061_v62 = vld [vmem:[%s8898_s13 + $0x364] ss:$16 sps:$4 sm:$0xff]   ;;  %v8064_v63 = vld [vmem:[%s8898_s13 + $0x36c] ss:$16 sps:$4 sm:$0xff]  }
  0xc0   : > { %3294 = vmatpush1.bf16.msra.mxu0 %v7931_v0  ;;  %4426 = vmatpush1.bf16.msra.mxu1 %v7932_v1  ;;  %v8059_v0 = vld [vmem:[%s8898_s13 + $0x360] ss:$16 sps:$4 sm:$0xff]   ;;  %v8062_v1 = vld [vmem:[%s8898_s13 + $0x368] ss:$16 sps:$4 sm:$0xff]  }
  0xc1   : > { %3295 = vmatprep.subr.bf16.mxu0 %v7933_v2  ;;  %4427 = vmatprep.subr.bf16.mxu1 %v7935_v3  ;;  %v7983_v2 = vld [vmem:[%s10332_s1 + $0x150] ss:$28 sps:$4 sm:$0xff]   ;;  %v8070_v3 = vld [vmem:[%s8898_s13 + $0x384] ss:$16 sps:$4 sm:$0xff]  }
  0xc4   : > { %3296 = vmatpush1.bf16.msra.mxu0 %v7937_v4  ;;  %4428 = vmatpush1.bf16.msra.mxu1 %v7938_v5  ;;  %v8073_v4 = vld [vmem:[%s8898_s13 + $0x38c] ss:$16 sps:$4 sm:$0xff]  }
  0xc5   : > { %3548 = vmatprep.subr.bf16.mxu0 %v7944_v6  ;;  %4680 = vmatprep.subr.bf16.mxu1 %v7947_v7  ;;  %v7990_v5 = vld [vmem:[%s10332_s1 + $0x18c] ss:$28 sps:$4 sm:$0xff]   ;;  %v8068_v6 = vld [vmem:[%s8898_s13 + $0x380] ss:$16 sps:$4 sm:$0xff]  }
  0xc6   : > { %v8071_v7 = vld [vmem:[%s8898_s13 + $0x388] ss:$16 sps:$4 sm:$0xff]  }
  0xc7   : > { %3298 = vmatmul.mubr.bf16.vlgmr.msra.gmra.mrb[0].mxu0 %v7939_v8  ;;  %4430 = vmatmul.mubr.bf16.vlgmr.msra.gmra.mrb[0].mxu1 %v7939_v8  ;;  %v8082_v8 = vld [vmem:[%s8898_s13 + $0x3a4] ss:$16 sps:$4 sm:$0xff]  }
  0xc8   : > { %3549 = vmatpush1.bf16.msra.mxu0 %v7942_v9  ;;  %4681 = vmatpush1.bf16.msra.mxu1 %v7945_v10  ;;  %v8085_v9 = vld [vmem:[%s8898_s13 + $0x3ac] ss:$16 sps:$4 sm:$0xff]   ;;  %v8080_v10 = vld [vmem:[%s8898_s13 + $0x3a0] ss:$16 sps:$4 sm:$0xff]  }
  0xc9   : > { %3307 = vmatprep.mubr.bf16.mxu0 %v7948_v11  ;;  %4439 = vmatprep.mubr.bf16.mxu1 %v7948_v11  ;;  %v8083_v11 = vld [vmem:[%s8898_s13 + $0x3a8] ss:$16 sps:$4 sm:$0xff]  }
  0xca   : > { %3550 = vmatprep.subr.bf16.mxu0 %v7953_v12  ;;  %4682 = vmatprep.subr.bf16.mxu1 %v7956_v13  ;;  %v8093_v12 = vld [vmem:[%s8898_s13 + $0x3c4] ss:$16 sps:$4 sm:$0xff]   ;;  %v8096_v13 = vld [vmem:[%s8898_s13 + $0x3cc] ss:$16 sps:$4 sm:$0xff]  }
  0xcc   : > { %3551 = vmatpush1.bf16.msra.mxu0 %v7951_v14  ;;  %4683 = vmatpush1.bf16.msra.mxu1 %v7954_v15  ;;  %v7992_v14 = vld [vmem:[%s10332_s1 + $0x188] ss:$28 sps:$4 sm:$0xff]  }
  0xcd   : > { %3552 = vmatprep.subr.bf16.mxu0 %v7965_v16  ;;  %4684 = vmatprep.subr.bf16.mxu1 %v7968_v17  ;;  %v7993_v15 = vld [vmem:[%s10332_s1 + $0x1c4] ss:$28 sps:$4 sm:$0xff]   ;;  %v8094_v17 = vld [vmem:[%s8898_s13 + $0x3c8] ss:$16 sps:$4 sm:$0xff]  }
  0xce   : > { %v8091_v16 = vld [vmem:[%s8898_s13 + $0x3c0] ss:$16 sps:$4 sm:$0xff]  }
  0xcf   : > { %3308 = vmatmul.mubr.bf16.gmra.mrb[4].mxu0 %v7950_v18  ;;  %4440 = vmatmul.mubr.bf16.gmra.mrb[4].mxu1 %v7950_v18  ;;  %v8103_v18 = vld [vmem:[%s8898_s13 + $0x3e4] ss:$16 sps:$4 sm:$0xff]  }
  0xd0   : > { %3317 = vmatprep.mubr.bf16.mxu0 %v7957_v19  ;;  %4449 = vmatprep.mubr.bf16.mxu1 %v7957_v19  ;;  %v8101_v19 = vld [vmem:[%s8898_s13 + $0x3e0] ss:$16 sps:$4 sm:$0xff]  }
  0xd1   : > { %3553 = vmatpush1.bf16.msra.mxu0 %v7963_v20  ;;  %4685 = vmatpush1.bf16.msra.mxu1 %v7966_v21  ;;  %v8104_v20 = vld [vmem:[%s8898_s13 + $0x3e8] ss:$16 sps:$4 sm:$0xff]   ;;  %v8106_v21 = vld [vmem:[%s8898_s13 + $0x3ec] ss:$16 sps:$4 sm:$0xff]  }
  0xd2   : > { %3554 = vmatprep.subr.bf16.mxu0 %v7974_v22  ;;  %4686 = vmatprep.subr.bf16.mxu1 %v7977_v23  ;;  %v8001_v22 = vld [vmem:[%s10332_s1 + $0x1c0] ss:$28 sps:$4 sm:$0xff]  }
  0xd3   : > { %v8002_v23 = vld [vmem:[%s10332_s1 + $0x1fc] ss:$28 sps:$4 sm:$0xff]  }
  0xd5   : > { %3555 = vmatpush1.bf16.msra.mxu0 %v7972_v24  ;;  %4687 = vmatpush1.bf16.msra.mxu1 %v7975_v25  ;;  %v8004_v24 = vld [vmem:[%s10332_s1 + $0x1f8] ss:$28 sps:$4 sm:$0xff]  }
  0xd6   : > { %3556 = vmatprep.subr.bf16.mxu0 %v7986_v26  ;;  %4688 = vmatprep.subr.bf16.mxu1 %v7989_v27  ;;  %v8011_v25 = vld [vmem:[%s10332_s1 + $0x234] ss:$28 sps:$4 sm:$0xff]  }
  0xd7   : > { %3318 = vmatmul.mubr.bf16.gmra.mrb[8].mxu0 %v7959_v28  ;;  %4450 = vmatmul.mubr.bf16.gmra.mrb[8].mxu1 %v7959_v28  ;;  %v8115_v26 = vld [vmem:[%s8898_s13 + $0x404] ss:$16 sps:$4 sm:$0xff]   ;;  %v8118_v27 = vld [vmem:[%s8898_s13 + $0x40c] ss:$16 sps:$4 sm:$0xff]  }
  0xd8   : > { %3327 = vmatprep.mubr.bf16.mxu0 %v7960_v29  ;;  %4459 = vmatprep.mubr.bf16.mxu1 %v7960_v29  ;;  %v8013_v28 = vld [vmem:[%s10332_s1 + $0x230] ss:$28 sps:$4 sm:$0xff]  }
  0xd9   : > { %3557 = vmatpush1.bf16.msra.mxu0 %v7984_v30  ;;  %4689 = vmatpush1.bf16.msra.mxu1 %v7987_v31  ;;  %v8014_v29 = vld [vmem:[%s10332_s1 + $0x26c] ss:$28 sps:$4 sm:$0xff]   ;;  %v8023_v31 = vld [vmem:[%s10332_s1 + $0x2a4] ss:$28 sps:$4 sm:$0xff]  }
  0xda   : > { %3558 = vmatprep.subr.bf16.mxu0 %v7997_v32  ;;  %4690 = vmatprep.subr.bf16.mxu1 %v8000_v33  ;;  %v8016_v30 = vld [vmem:[%s10332_s1 + $0x268] ss:$28 sps:$4 sm:$0xff]   ;;  %v8025_v32 = vld [vmem:[%s10332_s1 + $0x2a0] ss:$28 sps:$4 sm:$0xff]  }
  0xdb   : > { %v8032_v33 = vld [vmem:[%s10332_s1 + $0x2dc] ss:$28 sps:$4 sm:$0xff]  }
  0xdd   : > { %3559 = vmatpush1.bf16.msra.mxu0 %v7995_v34  ;;  %4691 = vmatpush1.bf16.msra.mxu1 %v7998_v35  ;;  %v8034_v34 = vld [vmem:[%s10332_s1 + $0x2d8] ss:$28 sps:$4 sm:$0xff]  }
  0xde   : > { %3560 = vmatprep.subr.bf16.mxu0 %v8007_v36  ;;  %4692 = vmatprep.subr.bf16.mxu1 %v8010_v37  ;;  %v8035_v35 = vld [vmem:[%s10332_s1 + $0x314] ss:$28 sps:$4 sm:$0xff]   ;;  %v8044_v37 = vld [vmem:[%s10332_s1 + $0x34c] ss:$28 sps:$4 sm:$0xff]  }
  0xdf   : > { %3328 = vmatmul.mubr.bf16.gmra.mrb[12].mxu0 %v7962_v38  ;;  %4460 = vmatmul.mubr.bf16.gmra.mrb[12].mxu1 %v7962_v38  ;;  %v8037_v36 = vld [vmem:[%s10332_s1 + $0x310] ss:$28 sps:$4 sm:$0xff]   ;;  %v8046_v38 = vld [vmem:[%s10332_s1 + $0x348] ss:$28 sps:$4 sm:$0xff]  }
  0xe0   : > { %3337 = vmatprep.mubr.bf16.mxu0 %v7969_v39  ;;  %4469 = vmatprep.mubr.bf16.mxu1 %v7969_v39  ;;  %v8053_v39 = vld [vmem:[%s10332_s1 + $0x384] ss:$28 sps:$4 sm:$0xff]  }
  0xe1   : > { %3561 = vmatpush1.bf16.msra.mxu0 %v8005_v40  ;;  %4693 = vmatpush1.bf16.msra.mxu1 %v8008_v41  ;;  %v8055_v40 = vld [vmem:[%s10332_s1 + $0x380] ss:$28 sps:$4 sm:$0xff]  }
  0xe2   : > { %3562 = vmatprep.subr.bf16.mxu0 %v8019_v42  ;;  %4694 = vmatprep.subr.bf16.mxu1 %v8022_v43  ;;  %v8056_v41 = vld [vmem:[%s10332_s1 + $0x3bc] ss:$28 sps:$4 sm:$0xff]   ;;  %v8065_v43 = vld [vmem:[%s10332_s1 + $0x3f4] ss:$28 sps:$4 sm:$0xff]  }
  0xe3   : > { %v8058_v42 = vld [vmem:[%s10332_s1 + $0x3b8] ss:$28 sps:$4 sm:$0xff]  }
  0xe5   : > { %3563 = vmatpush1.bf16.msra.mxu0 %v8017_v44  ;;  %4695 = vmatpush1.bf16.msra.mxu1 %v8020_v45  ;;  %v8067_v44 = vld [vmem:[%s10332_s1 + $0x3f0] ss:$28 sps:$4 sm:$0xff]  }
  0xe6   : > { %3564 = vmatprep.subr.bf16.mxu0 %v8028_v46  ;;  %4696 = vmatprep.subr.bf16.mxu1 %v8031_v47  ;;  %v8074_v45 = vld [vmem:[%s10332_s1 + $0x42c] ss:$28 sps:$4 sm:$0xff]   ;;  %v8077_v47 = vld [vmem:[%s10332_s1 + $0x464] ss:$28 sps:$4 sm:$0xff]  }
  0xe7   : > { %3338 = vmatmul.mubr.bf16.gmra.mrb[16].mxu0 %v7971_v48  ;;  %4470 = vmatmul.mubr.bf16.gmra.mrb[16].mxu1 %v7971_v48  ;;  %v8076_v46 = vld [vmem:[%s10332_s1 + $0x428] ss:$28 sps:$4 sm:$0xff]   ;;  %v8079_v48 = vld [vmem:[%s10332_s1 + $0x460] ss:$28 sps:$4 sm:$0xff]  }
  0xe8   : > { %3347 = vmatprep.mubr.bf16.mxu0 %v7978_v49  ;;  %4479 = vmatprep.mubr.bf16.mxu1 %v7978_v49  ;;  %v8086_v49 = vld [vmem:[%s10332_s1 + $0x49c] ss:$28 sps:$4 sm:$0xff]  }
  0xe9   : > { %3565 = vmatpush1.bf16.msra.mxu0 %v8026_v50  ;;  %4697 = vmatpush1.bf16.msra.mxu1 %v8029_v51  ;;  %v8088_v50 = vld [vmem:[%s10332_s1 + $0x498] ss:$28 sps:$4 sm:$0xff]  }
  0xea   : > { %3566 = vmatprep.subr.bf16.mxu0 %v8040_v52  ;;  %4698 = vmatprep.subr.bf16.mxu1 %v8043_v53  ;;  %v8089_v51 = vld [vmem:[%s10332_s1 + $0x4d4] ss:$28 sps:$4 sm:$0xff]   ;;  %v8098_v53 = vld [vmem:[%s10332_s1 + $0x50c] ss:$28 sps:$4 sm:$0xff]  }
  0xeb   : > { %v8097_v52 = vld [vmem:[%s10332_s1 + $0x4d0] ss:$28 sps:$4 sm:$0xff]  }
  0xed   : > { %3567 = vmatpush1.bf16.msra.mxu0 %v8038_v54  ;;  %4699 = vmatpush1.bf16.msra.mxu1 %v8041_v56  ;;  %v8100_v54 = vld [vmem:[%s10332_s1 + $0x508] ss:$28 sps:$4 sm:$0xff]   ;;  %v8109_v56 = vld [vmem:[%s10332_s1 + $0x540] ss:$28 sps:$4 sm:$0xff]  }
  0xee   : > { %3568 = vmatprep.subr.bf16.mxu0 %v8049_v58  ;;  %4700 = vmatprep.subr.bf16.mxu1 %v8052_v59  ;;  %v8110_v58 = vld [vmem:[%s10332_s1 + $0x8] ss:$28 sps:$4 sm:$0xff]  }
  0xef   : > { %3348 = vmatmul.mubr.bf16.gmra.mrb[20].mxu0 %v7980_v55  ;;  %4480 = vmatmul.mubr.bf16.gmra.mrb[20].mxu1 %v7980_v55  ;;  %v8107_v55 = vld [vmem:[%s10332_s1 + $0x544] ss:$28 sps:$4 sm:$0xff]  }
  0xf0   : > { %3357 = vmatprep.mubr.bf16.mxu0 %v7981_v57  ;;  %4489 = vmatprep.mubr.bf16.mxu1 %v7981_v57  ;;  %v8112_v57 = vld [vmem:[%s10332_s1 + $0xc] ss:$28 sps:$4 sm:$0xff]   ;;  %v8113_v59 = vld [vmem:[%s8898_s13 + $0x400] ss:$16 sps:$4 sm:$0xff]  }
  0xf1   : > { %3569 = vmatpush1.bf16.msra.mxu0 %v8047_v60  ;;  %4701 = vmatpush1.bf16.msra.mxu1 %v8050_v61  ;;  %v8116_v60 = vld [vmem:[%s8898_s13 + $0x408] ss:$16 sps:$4 sm:$0xff]   ;;  %v8119_v61 = vld [vmem:[%s10332_s1 + $0x44] ss:$28 sps:$4 sm:$0xff]  }
  0xf2   : > { %3570 = vmatprep.subr.bf16.mxu0 %v8061_v62  ;;  %4702 = vmatprep.subr.bf16.mxu1 %v8064_v63  ;;  %v8124_v62 = vld [vmem:[%s8898_s13 + $0x424] ss:$16 sps:$4 sm:$0xff]   ;;  %v8127_v63 = vld [vmem:[%s8898_s13 + $0x42c] ss:$16 sps:$4 sm:$0xff]  }
  0xf5   : > { %3571 = vmatpush1.bf16.msra.mxu0 %v8059_v0  ;;  %4703 = vmatpush1.bf16.msra.mxu1 %v8062_v1  ;;  %v8122_v0 = vld [vmem:[%s8898_s13 + $0x420] ss:$16 sps:$4 sm:$0xff]   ;;  %v8125_v1 = vld [vmem:[%s8898_s13 + $0x428] ss:$16 sps:$4 sm:$0xff]  }
  0xf6   : > { %3572 = vmatprep.subr.bf16.mxu0 %v8070_v3  ;;  %4704 = vmatprep.subr.bf16.mxu1 %v8073_v4  ;;  %v8139_v3 = vld [vmem:[%s8898_s13 + $0x44c] ss:$16 sps:$4 sm:$0xff]  }
  0xf7   : > { %3358 = vmatmul.mubr.bf16.gmra.mrb[24].mxu0 %v7983_v2  ;;  %4490 = vmatmul.mubr.bf16.gmra.mrb[24].mxu1 %v7983_v2  ;;  %v8136_v2 = vld [vmem:[%s8898_s13 + $0x444] ss:$16 sps:$4 sm:$0xff]   ;;  %v8121_v4 = vld [vmem:[%s10332_s1 + $0x40] ss:$28 sps:$4 sm:$0xff]  }
  0xf8   : > { %3367 = vmatprep.mubr.bf16.mxu0 %v7990_v5  ;;  %4499 = vmatprep.mubr.bf16.mxu1 %v7990_v5  ;;  %v8128_v5 = vld [vmem:[%s10332_s1 + $0x7c] ss:$28 sps:$4 sm:$0xff]  }
  0xf9   : > { %3573 = vmatpush1.bf16.msra.mxu0 %v8068_v6  ;;  %4705 = vmatpush1.bf16.msra.mxu1 %v8071_v7  ;;  %v8134_v6 = vld [vmem:[%s8898_s13 + $0x440] ss:$16 sps:$4 sm:$0xff]   ;;  %v8137_v7 = vld [vmem:[%s8898_s13 + $0x448] ss:$16 sps:$4 sm:$0xff]  }
  0xfa   : > { %3574 = vmatprep.subr.bf16.mxu0 %v8082_v8  ;;  %4706 = vmatprep.subr.bf16.mxu1 %v8085_v9  ;;  %v8145_v8 = vld [vmem:[%s8898_s13 + $0x464] ss:$16 sps:$4 sm:$0xff]   ;;  %v8148_v9 = vld [vmem:[%s8898_s13 + $0x46c] ss:$16 sps:$4 sm:$0xff]  }
  0xfd   : > { %3575 = vmatpush1.bf16.msra.mxu0 %v8080_v10  ;;  %4707 = vmatpush1.bf16.msra.mxu1 %v8083_v11  ;;  %v8143_v10 = vld [vmem:[%s8898_s13 + $0x460] ss:$16 sps:$4 sm:$0xff]   ;;  %v8146_v11 = vld [vmem:[%s8898_s13 + $0x468] ss:$16 sps:$4 sm:$0xff]  }
  0xfe   : > { %3576 = vmatprep.subr.bf16.mxu0 %v8093_v12  ;;  %4708 = vmatprep.subr.bf16.mxu1 %v8096_v13  ;;  %v8157_v12 = vld [vmem:[%s8898_s13 + $0x484] ss:$16 sps:$4 sm:$0xff]   ;;  %v8160_v13 = vld [vmem:[%s8898_s13 + $0x48c] ss:$16 sps:$4 sm:$0xff]  }
  0xff   : > { %3368 = vmatmul.mubr.bf16.gmra.mrb[28].mxu0 %v7992_v14  ;;  %4500 = vmatmul.mubr.bf16.gmra.mrb[28].mxu1 %v7992_v14  ;;  %v8130_v14 = vld [vmem:[%s10332_s1 + $0x78] ss:$28 sps:$4 sm:$0xff]  }
 0x100   : > { %3377 = vmatprep.mubr.bf16.mxu0 %v7993_v15  ;;  %4509 = vmatprep.mubr.bf16.mxu1 %v7993_v15  ;;  %v8131_v15 = vld [vmem:[%s10332_s1 + $0xb4] ss:$28 sps:$4 sm:$0xff]  }
 0x101   : > { %3577 = vmatpush1.bf16.msra.mxu0 %v8091_v16  ;;  %4709 = vmatpush1.bf16.msra.mxu1 %v8094_v17  ;;  %v8155_v16 = vld [vmem:[%s8898_s13 + $0x480] ss:$16 sps:$4 sm:$0xff]   ;;  %v8158_v17 = vld [vmem:[%s8898_s13 + $0x488] ss:$16 sps:$4 sm:$0xff]  }
 0x102   : > { %3578 = vmatprep.subr.bf16.mxu0 %v8103_v18  ;;  %4710 = vmatprep.subr.bf16.mxu1 %v8106_v21  ;;  %v8168_v18 = vld [vmem:[%s8898_s13 + $0x4a4] ss:$16 sps:$4 sm:$0xff]   ;;  %v8169_v21 = vld [vmem:[%s8898_s13 + $0x4a8] ss:$16 sps:$4 sm:$0xff]  }
 0x105   : > { %3579 = vmatpush1.bf16.msra.mxu0 %v8101_v19  ;;  %4711 = vmatpush1.bf16.msra.mxu1 %v8104_v20  ;;  %v8171_v19 = vld [vmem:[%s8898_s13 + $0x4ac] ss:$16 sps:$4 sm:$0xff]   ;;  %v8166_v20 = vld [vmem:[%s8898_s13 + $0x4a0] ss:$16 sps:$4 sm:$0xff]  }
 0x106   : > { %3831 = vmatprep.subr.bf16.mxu0 %v8115_v26  ;;  %4963 = vmatprep.subr.bf16.mxu1 %v8118_v27  ;;  %v8176_v26 = vld [vmem:[%s8898_s13 + $0x4c0] ss:$16 sps:$4 sm:$0xff]   ;;  %v8179_v27 = vld [vmem:[%s8898_s13 + $0x4c8] ss:$16 sps:$4 sm:$0xff]  }
 0x107   : > { %3378 = vmatmul.mubr.bf16.gmra.mrb[32].mxu0 %v8001_v22  ;;  %4510 = vmatmul.mubr.bf16.gmra.mrb[32].mxu1 %v8001_v22  ;;  %v8178_v22 = vld [vmem:[%s8898_s13 + $0x4c4] ss:$16 sps:$4 sm:$0xff]  }
 0x108   : > { %3387 = vmatprep.mubr.bf16.mxu0 %v8002_v23  ;;  %4519 = vmatprep.mubr.bf16.mxu1 %v8002_v23  ;;  %v8181_v23 = vld [vmem:[%s8898_s13 + $0x4cc] ss:$16 sps:$4 sm:$0xff]  }
 0x10f   : > { %3388 = vmatmul.mubr.bf16.gmra.mrb[36].mxu0 %v8004_v24  ;;  %4520 = vmatmul.mubr.bf16.gmra.mrb[36].mxu1 %v8004_v24  ;;  %v8133_v24 = vld [vmem:[%s10332_s1 + $0xb0] ss:$28 sps:$4 sm:$0xff]  }
 0x110   : > { %3397 = vmatprep.mubr.bf16.mxu0 %v8011_v25  ;;  %4529 = vmatprep.mubr.bf16.mxu1 %v8011_v25  ;;  %v8140_v25 = vld [vmem:[%s10332_s1 + $0xec] ss:$28 sps:$4 sm:$0xff]  }
 0x117   : > { %3398 = vmatmul.mubr.bf16.gmra.mrb[40].mxu0 %v8013_v28  ;;  %4530 = vmatmul.mubr.bf16.gmra.mrb[40].mxu1 %v8013_v28  ;;  %v8190_v28 = vld [vmem:[%s8898_s13 + $0x4e4] ss:$16 sps:$4 sm:$0xff]  }
 0x118   : > { %3407 = vmatprep.mubr.bf16.mxu0 %v8014_v29  ;;  %4539 = vmatprep.mubr.bf16.mxu1 %v8014_v29  ;;  %v8193_v29 = vld [vmem:[%s8898_s13 + $0x4ec] ss:$16 sps:$4 sm:$0xff]  }
 0x11f   : > { %3408 = vmatmul.mubr.bf16.gmra.mrb[44].mxu0 %v8016_v30  ;;  %4540 = vmatmul.mubr.bf16.gmra.mrb[44].mxu1 %v8016_v30  ;;  %v8188_v30 = vld [vmem:[%s8898_s13 + $0x4e0] ss:$16 sps:$4 sm:$0xff]  }
 0x120   : > { %3417 = vmatprep.mubr.bf16.mxu0 %v8023_v31  ;;  %4549 = vmatprep.mubr.bf16.mxu1 %v8023_v31  ;;  %v8191_v31 = vld [vmem:[%s8898_s13 + $0x4e8] ss:$16 sps:$4 sm:$0xff]  }
 0x127   : > { %3418 = vmatmul.mubr.bf16.gmra.mrb[48].mxu0 %v8025_v32  ;;  %4550 = vmatmul.mubr.bf16.gmra.mrb[48].mxu1 %v8025_v32  ;;  %v8199_v32 = vld [vmem:[%s8898_s13 + $0x504] ss:$16 sps:$4 sm:$0xff]  }
 0x128   : > { %3427 = vmatprep.mubr.bf16.mxu0 %v8032_v33  ;;  %4559 = vmatprep.mubr.bf16.mxu1 %v8032_v33  ;;  %v8202_v33 = vld [vmem:[%s8898_s13 + $0x50c] ss:$16 sps:$4 sm:$0xff]  }
 0x12f   : > { %3428 = vmatmul.mubr.bf16.gmra.mrb[52].mxu0 %v8034_v34  ;;  %4560 = vmatmul.mubr.bf16.gmra.mrb[52].mxu1 %v8034_v34  ;;  %v8142_v34 = vld [vmem:[%s10332_s1 + $0xe8] ss:$28 sps:$4 sm:$0xff]  }
 0x130   : > { %3437 = vmatprep.mubr.bf16.mxu0 %v8035_v35  ;;  %4569 = vmatprep.mubr.bf16.mxu1 %v8035_v35  ;;  %v8149_v35 = vld [vmem:[%s10332_s1 + $0x124] ss:$28 sps:$4 sm:$0xff]  }
 0x137   : > { %3438 = vmatmul.mubr.bf16.gmra.mrb[56].mxu0 %v8037_v36  ;;  %4570 = vmatmul.mubr.bf16.gmra.mrb[56].mxu1 %v8037_v36  ;;  %v8197_v36 = vld [vmem:[%s8898_s13 + $0x500] ss:$16 sps:$4 sm:$0xff]  }
 0x138   : > { %3447 = vmatprep.mubr.bf16.mxu0 %v8044_v37  ;;  %4579 = vmatprep.mubr.bf16.mxu1 %v8044_v37  ;;  %v8200_v37 = vld [vmem:[%s8898_s13 + $0x508] ss:$16 sps:$4 sm:$0xff]  }
 0x13f   : > { %3448 = vmatmul.mubr.bf16.gmra.mrb[60].mxu0 %v8046_v38  ;;  %4580 = vmatmul.mubr.bf16.gmra.mrb[60].mxu1 %v8046_v38  ;;  %v8211_v38 = vld [vmem:[%s8898_s13 + $0x524] ss:$16 sps:$4 sm:$0xff]  }
 0x140   : > { %3457 = vmatprep.mubr.bf16.mxu0 %v8053_v39  ;;  %4589 = vmatprep.mubr.bf16.mxu1 %v8053_v39  ;;  %v8214_v39 = vld [vmem:[%s8898_s13 + $0x52c] ss:$16 sps:$4 sm:$0xff]  }
 0x147   : > { %3458 = vmatmul.mubr.bf16.gmra.mrb[64].mxu0 %v8055_v40  ;;  %4590 = vmatmul.mubr.bf16.gmra.mrb[64].mxu1 %v8055_v40  ;;  %v8209_v40 = vld [vmem:[%s8898_s13 + $0x520] ss:$16 sps:$4 sm:$0xff]  }
 0x148   : > { %3467 = vmatprep.mubr.bf16.mxu0 %v8056_v41  ;;  %4599 = vmatprep.mubr.bf16.mxu1 %v8056_v41  ;;  %v8212_v41 = vld [vmem:[%s8898_s13 + $0x528] ss:$16 sps:$4 sm:$0xff]  }
 0x14f   : > { %3468 = vmatmul.mubr.bf16.gmra.mrb[68].mxu0 %v8058_v42  ;;  %4600 = vmatmul.mubr.bf16.gmra.mrb[68].mxu1 %v8058_v42  ;;  %v8220_v42 = vld [vmem:[%s8898_s13 + $0x544] ss:$16 sps:$4 sm:$0xff]  }
 0x150   : > { %3477 = vmatprep.mubr.bf16.mxu0 %v8065_v43  ;;  %4609 = vmatprep.mubr.bf16.mxu1 %v8065_v43  ;;  %v8223_v43 = vld [vmem:[%s8898_s13 + $0x54c] ss:$16 sps:$4 sm:$0xff]  }
 0x157   : > { %3478 = vmatmul.mubr.bf16.gmra.mrb[72].mxu0 %v8067_v44  ;;  %4610 = vmatmul.mubr.bf16.gmra.mrb[72].mxu1 %v8067_v44  ;;  %v8151_v44 = vld [vmem:[%s10332_s1 + $0x120] ss:$28 sps:$4 sm:$0xff]  }
 0x158   : > { %3487 = vmatprep.mubr.bf16.mxu0 %v8074_v45  ;;  %4619 = vmatprep.mubr.bf16.mxu1 %v8074_v45  ;;  %v8152_v45 = vld [vmem:[%s10332_s1 + $0x15c] ss:$28 sps:$4 sm:$0xff]  }
 0x15f   : > { %3488 = vmatmul.mubr.bf16.gmra.mrb[76].mxu0 %v8076_v46  ;;  %4620 = vmatmul.mubr.bf16.gmra.mrb[76].mxu1 %v8076_v46  ;;  %v8218_v46 = vld [vmem:[%s8898_s13 + $0x540] ss:$16 sps:$4 sm:$0xff]  }
 0x160   : > { %3497 = vmatprep.mubr.bf16.mxu0 %v8077_v47  ;;  %4629 = vmatprep.mubr.bf16.mxu1 %v8077_v47  ;;  %v8221_v47 = vld [vmem:[%s8898_s13 + $0x548] ss:$16 sps:$4 sm:$0xff]  }
 0x167   : > { %3498 = vmatmul.mubr.bf16.gmra.mrb[80].mxu0 %v8079_v48  ;;  %4630 = vmatmul.mubr.bf16.gmra.mrb[80].mxu1 %v8079_v48  ;;  %v8232_v48 = vld [vmem:[%s8898_s13 + $0x564] ss:$16 sps:$4 sm:$0xff]  }
 0x168   : > { %3507 = vmatprep.mubr.bf16.mxu0 %v8086_v49  ;;  %4639 = vmatprep.mubr.bf16.mxu1 %v8086_v49  ;;  %v8235_v49 = vld [vmem:[%s8898_s13 + $0x56c] ss:$16 sps:$4 sm:$0xff]  }
 0x16f   : > { %3508 = vmatmul.mubr.bf16.gmra.mrb[84].mxu0 %v8088_v50  ;;  %4640 = vmatmul.mubr.bf16.gmra.mrb[84].mxu1 %v8088_v50  ;;  %v8230_v50 = vld [vmem:[%s8898_s13 + $0x560] ss:$16 sps:$4 sm:$0xff]  }
 0x170   : > { %3517 = vmatprep.mubr.bf16.mxu0 %v8089_v51  ;;  %4649 = vmatprep.mubr.bf16.mxu1 %v8089_v51  ;;  %v8233_v51 = vld [vmem:[%s8898_s13 + $0x568] ss:$16 sps:$4 sm:$0xff]  }
 0x177   : > { %3518 = vmatmul.mubr.bf16.gmra.mrb[88].mxu0 %v8097_v52  ;;  %4650 = vmatmul.mubr.bf16.gmra.mrb[88].mxu1 %v8097_v52  ;;  %v8241_v52 = vld [vmem:[%s8898_s13 + $0x584] ss:$16 sps:$4 sm:$0xff]  }
 0x178   : > { %3527 = vmatprep.mubr.bf16.mxu0 %v8098_v53  ;;  %4659 = vmatprep.mubr.bf16.mxu1 %v8098_v53  ;;  %v8244_v53 = vld [vmem:[%s8898_s13 + $0x58c] ss:$16 sps:$4 sm:$0xff]  }
 0x17f   : > { %3528 = vmatmul.mubr.bf16.gmra.mrb[92].mxu0 %v8100_v54  ;;  %4660 = vmatmul.mubr.bf16.gmra.mrb[92].mxu1 %v8100_v54  ;;  %v8154_v54 = vld [vmem:[%s10332_s1 + $0x158] ss:$28 sps:$4 sm:$0xff]  }
 0x180   : > { %3537 = vmatprep.mubr.bf16.mxu0 %v8107_v55  ;;  %4669 = vmatprep.mubr.bf16.mxu1 %v8107_v55  ;;  %v8161_v55 = vld [vmem:[%s10332_s1 + $0x194] ss:$28 sps:$4 sm:$0xff]  }
 0x187   : > { %3538 = vmatmul.mubr.bf16.gmra.mrb[96].mxu0 %v8109_v56  ;;  %4670 = vmatmul.mubr.bf16.gmra.mrb[96].mxu1 %v8109_v56  ;;  %v8239_v56 = vld [vmem:[%s8898_s13 + $0x580] ss:$16 sps:$4 sm:$0xff]  }
 0x188   : > { %3580 = vmatprep.mubr.bf16.mxu0 %v8112_v57  ;;  %4712 = vmatprep.mubr.bf16.mxu1 %v8112_v57  ;;  %v8242_v57 = vld [vmem:[%s8898_s13 + $0x588] ss:$16 sps:$4 sm:$0xff]  }
 0x18f   : > { %3581 = vmatmul.mubr.bf16.vlgmr.msra.gmra.mrb[0].mxu0 %v8110_v58  ;;  %4713 = vmatmul.mubr.bf16.vlgmr.msra.gmra.mrb[0].mxu1 %v8110_v58  ;;  %v8253_v58 = vld [vmem:[%s8898_s13 + $0x5a4] ss:$16 sps:$4 sm:$0xff]  }
 0x190   : > { %3832 = vmatpush1.bf16.msra.mxu0 %v8113_v59  ;;  %4964 = vmatpush1.bf16.msra.mxu1 %v8116_v60  ;;  %v8256_v59 = vld [vmem:[%s8898_s13 + $0x5ac] ss:$16 sps:$4 sm:$0xff]   ;;  %v8251_v60 = vld [vmem:[%s8898_s13 + $0x5a0] ss:$16 sps:$4 sm:$0xff]  }
 0x191   : > { %3590 = vmatprep.mubr.bf16.mxu0 %v8119_v61  ;;  %4722 = vmatprep.mubr.bf16.mxu1 %v8119_v61  ;;  %v8254_v61 = vld [vmem:[%s8898_s13 + $0x5a8] ss:$16 sps:$4 sm:$0xff]  }
 0x192   : > { %3833 = vmatprep.subr.bf16.mxu0 %v8124_v62  ;;  %4965 = vmatprep.subr.bf16.mxu1 %v8127_v63  ;;  %v8264_v62 = vld [vmem:[%s8898_s13 + $0x5c4] ss:$16 sps:$4 sm:$0xff]   ;;  %v8267_v63 = vld [vmem:[%s8898_s13 + $0x5cc] ss:$16 sps:$4 sm:$0xff]  }
 0x194   : > { %3834 = vmatpush1.bf16.msra.mxu0 %v8122_v0  ;;  %4966 = vmatpush1.bf16.msra.mxu1 %v8125_v1  ;;  %v8163_v0 = vld [vmem:[%s10332_s1 + $0x190] ss:$28 sps:$4 sm:$0xff]  }
 0x195   : > { %3835 = vmatprep.subr.bf16.mxu0 %v8136_v2  ;;  %4967 = vmatprep.subr.bf16.mxu1 %v8139_v3  ;;  %v8164_v1 = vld [vmem:[%s10332_s1 + $0x1cc] ss:$28 sps:$4 sm:$0xff]   ;;  %v8262_v2 = vld [vmem:[%s8898_s13 + $0x5c0] ss:$16 sps:$4 sm:$0xff]  }
 0x196   : > { %v8265_v3 = vld [vmem:[%s8898_s13 + $0x5c8] ss:$16 sps:$4 sm:$0xff]  }
 0x197   : > { %3591 = vmatmul.mubr.bf16.gmra.mrb[4].mxu0 %v8121_v4  ;;  %4723 = vmatmul.mubr.bf16.gmra.mrb[4].mxu1 %v8121_v4  ;;  %v8274_v4 = vld [vmem:[%s8898_s13 + $0x5e4] ss:$16 sps:$4 sm:$0xff]  }
 0x198   : > { %3600 = vmatprep.mubr.bf16.mxu0 %v8128_v5  ;;  %4732 = vmatprep.mubr.bf16.mxu1 %v8128_v5  ;;  %v8277_v5 = vld [vmem:[%s8898_s13 + $0x5ec] ss:$16 sps:$4 sm:$0xff]  }
 0x199   : > { %3836 = vmatpush1.bf16.msra.mxu0 %v8134_v6  ;;  %4968 = vmatpush1.bf16.msra.mxu1 %v8137_v7  ;;  %v8272_v6 = vld [vmem:[%s8898_s13 + $0x5e0] ss:$16 sps:$4 sm:$0xff]   ;;  %v8275_v7 = vld [vmem:[%s8898_s13 + $0x5e8] ss:$16 sps:$4 sm:$0xff]  }
 0x19a   : > { %3837 = vmatprep.subr.bf16.mxu0 %v8145_v8  ;;  %4969 = vmatprep.subr.bf16.mxu1 %v8148_v9  ;;  %v8172_v8 = vld [vmem:[%s10332_s1 + $0x1c8] ss:$28 sps:$4 sm:$0xff]  }
 0x19b   : > { %v8173_v9 = vld [vmem:[%s10332_s1 + $0x204] ss:$28 sps:$4 sm:$0xff]  }
 0x19d   : > { %3838 = vmatpush1.bf16.msra.mxu0 %v8143_v10  ;;  %4970 = vmatpush1.bf16.msra.mxu1 %v8146_v11  ;;  %v8175_v10 = vld [vmem:[%s10332_s1 + $0x200] ss:$28 sps:$4 sm:$0xff]  }
 0x19e   : > { %3839 = vmatprep.subr.bf16.mxu0 %v8157_v12  ;;  %4971 = vmatprep.subr.bf16.mxu1 %v8160_v13  ;;  %v8182_v11 = vld [vmem:[%s10332_s1 + $0x23c] ss:$28 sps:$4 sm:$0xff]  }
 0x19f   : > { %3601 = vmatmul.mubr.bf16.gmra.mrb[8].mxu0 %v8130_v14  ;;  %4733 = vmatmul.mubr.bf16.gmra.mrb[8].mxu1 %v8130_v14  ;;  %v8286_v12 = vld [vmem:[%s8898_s13 + $0x604] ss:$16 sps:$4 sm:$0xff]   ;;  %v8289_v13 = vld [vmem:[%s8898_s13 + $0x60c] ss:$16 sps:$4 sm:$0xff]  }
 0x1a0   : > { %3610 = vmatprep.mubr.bf16.mxu0 %v8131_v15  ;;  %4742 = vmatprep.mubr.bf16.mxu1 %v8131_v15  ;;  %v8184_v14 = vld [vmem:[%s10332_s1 + $0x238] ss:$28 sps:$4 sm:$0xff]  }
 0x1a1   : > { %3840 = vmatpush1.bf16.msra.mxu0 %v8155_v16  ;;  %4972 = vmatpush1.bf16.msra.mxu1 %v8158_v17  ;;  %v8185_v15 = vld [vmem:[%s10332_s1 + $0x274] ss:$28 sps:$4 sm:$0xff]   ;;  %v8194_v17 = vld [vmem:[%s10332_s1 + $0x2ac] ss:$28 sps:$4 sm:$0xff]  }
 0x1a2   : > { %3841 = vmatprep.subr.bf16.mxu0 %v8168_v18  ;;  %4973 = vmatprep.subr.bf16.mxu1 %v8171_v19  ;;  %v8187_v16 = vld [vmem:[%s10332_s1 + $0x270] ss:$28 sps:$4 sm:$0xff]   ;;  %v8196_v18 = vld [vmem:[%s10332_s1 + $0x2a8] ss:$28 sps:$4 sm:$0xff]  }
 0x1a3   : > { %v8203_v19 = vld [vmem:[%s10332_s1 + $0x2e4] ss:$28 sps:$4 sm:$0xff]  }
 0x1a5   : > { %3842 = vmatpush1.bf16.msra.mxu0 %v8166_v20  ;;  %4974 = vmatpush1.bf16.msra.mxu1 %v8169_v21  ;;  %v8205_v20 = vld [vmem:[%s10332_s1 + $0x2e0] ss:$28 sps:$4 sm:$0xff]  }
 0x1a6   : > { %3843 = vmatprep.subr.bf16.mxu0 %v8178_v22  ;;  %4975 = vmatprep.subr.bf16.mxu1 %v8181_v23  ;;  %v8206_v21 = vld [vmem:[%s10332_s1 + $0x31c] ss:$28 sps:$4 sm:$0xff]   ;;  %v8215_v23 = vld [vmem:[%s10332_s1 + $0x354] ss:$28 sps:$4 sm:$0xff]  }
 0x1a7   : > { %3611 = vmatmul.mubr.bf16.gmra.mrb[12].mxu0 %v8133_v24  ;;  %4743 = vmatmul.mubr.bf16.gmra.mrb[12].mxu1 %v8133_v24  ;;  %v8208_v22 = vld [vmem:[%s10332_s1 + $0x318] ss:$28 sps:$4 sm:$0xff]   ;;  %v8217_v24 = vld [vmem:[%s10332_s1 + $0x350] ss:$28 sps:$4 sm:$0xff]  }
 0x1a8   : > { %3620 = vmatprep.mubr.bf16.mxu0 %v8140_v25  ;;  %4752 = vmatprep.mubr.bf16.mxu1 %v8140_v25  ;;  %v8224_v25 = vld [vmem:[%s10332_s1 + $0x38c] ss:$28 sps:$4 sm:$0xff]  }
 0x1a9   : > { %3844 = vmatpush1.bf16.msra.mxu0 %v8176_v26  ;;  %4976 = vmatpush1.bf16.msra.mxu1 %v8179_v27  ;;  %v8226_v26 = vld [vmem:[%s10332_s1 + $0x388] ss:$28 sps:$4 sm:$0xff]  }
 0x1aa   : > { %3845 = vmatprep.subr.bf16.mxu0 %v8190_v28  ;;  %4977 = vmatprep.subr.bf16.mxu1 %v8193_v29  ;;  %v8227_v27 = vld [vmem:[%s10332_s1 + $0x3c4] ss:$28 sps:$4 sm:$0xff]   ;;  %v8236_v29 = vld [vmem:[%s10332_s1 + $0x3fc] ss:$28 sps:$4 sm:$0xff]  }
 0x1ab   : > { %v8229_v28 = vld [vmem:[%s10332_s1 + $0x3c0] ss:$28 sps:$4 sm:$0xff]  }
 0x1ad   : > { %3846 = vmatpush1.bf16.msra.mxu0 %v8188_v30  ;;  %4978 = vmatpush1.bf16.msra.mxu1 %v8191_v31  ;;  %v8238_v30 = vld [vmem:[%s10332_s1 + $0x3f8] ss:$28 sps:$4 sm:$0xff]  }
 0x1ae   : > { %3847 = vmatprep.subr.bf16.mxu0 %v8199_v32  ;;  %4979 = vmatprep.subr.bf16.mxu1 %v8202_v33  ;;  %v8245_v31 = vld [vmem:[%s10332_s1 + $0x434] ss:$28 sps:$4 sm:$0xff]   ;;  %v8248_v33 = vld [vmem:[%s10332_s1 + $0x46c] ss:$28 sps:$4 sm:$0xff]  }
 0x1af   : > { %3621 = vmatmul.mubr.bf16.gmra.mrb[16].mxu0 %v8142_v34  ;;  %4753 = vmatmul.mubr.bf16.gmra.mrb[16].mxu1 %v8142_v34  ;;  %v8247_v32 = vld [vmem:[%s10332_s1 + $0x430] ss:$28 sps:$4 sm:$0xff]   ;;  %v1034_v34 = vld [vmem:[%s10333_s2] sm:$0xff] }
 0x1b0   : > { %3630 = vmatprep.mubr.bf16.mxu0 %v8149_v35  ;;  %4762 = vmatprep.mubr.bf16.mxu1 %v8149_v35  ;;  %v8427_v35 = vmov 0  }
 0x1b1   : > { %3848 = vmatpush1.bf16.msra.mxu0 %v8197_v36  ;;  %4980 = vmatpush1.bf16.msra.mxu1 %v8200_v37  ;;  %v8250_v36 = vld [vmem:[%s10332_s1 + $0x468] ss:$28 sps:$4 sm:$0xff]  }
 0x1b2   : > { %3849 = vmatprep.subr.bf16.mxu0 %v8211_v38  ;;  %4981 = vmatprep.subr.bf16.mxu1 %v8214_v39  ;;  %v8257_v37 = vld [vmem:[%s10332_s1 + $0x4a4] ss:$28 sps:$4 sm:$0xff]   ;;  %v1035_v38 = vld [vmem:[%s10333_s2 + $0x8] sm:$0xff]  ;;  %v1036_v39 = vld [vmem:[%s10333_s2 + $0x10] sm:$0xff] }
 0x1b3   : > { %7841 = vset.pattern.permute.xlu0 %v8427_v35  ;;  %7842 = vset.pattern.permute.xlu1 %v8427_v35 }
 0x1b4   : > { %1086 = vperm.xlu0 %7841, %v1034_v34   ;;  %1096 = vperm.xlu1 %7842, %v1036_v39   ;;  %v1073_v34 = vld [vmem:[%s10333_s2 + $0x138] sm:$0xff] }
 0x1b5   : > { %3850 = vmatpush1.bf16.msra.mxu0 %v8209_v40  ;;  %4982 = vmatpush1.bf16.msra.mxu1 %v8212_v41  ;;  %v1038_v40 = vld [vmem:[%s10333_s2 + $0x20] sm:$0xff]  ;;  %v1037_v41 = vld [vmem:[%s10333_s2 + $0x18] sm:$0xff] }
 0x1b6   : > { %3851 = vmatprep.subr.bf16.mxu0 %v8220_v42  ;;  %4983 = vmatprep.subr.bf16.mxu1 %v8223_v43  ;;  %v8259_v42 = vld [vmem:[%s10332_s1 + $0x4a0] ss:$28 sps:$4 sm:$0xff]  }
 0x1b7   : > { %3631 = vmatmul.mubr.bf16.gmra.mrb[20].mxu0 %v8151_v44  ;;  %4763 = vmatmul.mubr.bf16.gmra.mrb[20].mxu1 %v8151_v44  ;;  %v8260_v43 = vld [vmem:[%s10332_s1 + $0x4dc] ss:$28 sps:$4 sm:$0xff]   ;;  %v1040_v44 = vld [vmem:[%s10333_s2 + $0x30] sm:$0xff] }
 0x1b8   : > { %3640 = vmatprep.mubr.bf16.mxu0 %v8152_v45  ;;  %4772 = vmatprep.mubr.bf16.mxu1 %v8152_v45  ;;  %v1039_v45 = vld [vmem:[%s10333_s2 + $0x28] sm:$0xff]  ;;  %v8307_v39 = vld [vmem:[%s10332_s1 + $0x160] ss:$28 sps:$4 sm:$0xff]  }
 0x1b9   : > { %3852 = vmatpush1.bf16.msra.mxu0 %v8218_v46  ;;  %4984 = vmatpush1.bf16.msra.mxu1 %v8221_v47  ;;  %v1042_v46 = vld [vmem:[%s10333_s2 + $0x40] sm:$0xff]  ;;  %v1041_v47 = vld [vmem:[%s10333_s2 + $0x38] sm:$0xff] }
 0x1ba   : > { %3853 = vmatprep.subr.bf16.mxu0 %v8232_v48  ;;  %4985 = vmatprep.subr.bf16.mxu1 %v8235_v49  ;;  %v8268_v48 = vld [vmem:[%s10332_s1 + $0x4d8] ss:$28 sps:$4 sm:$0xff]  }
 0x1bb   : > { %1091 = vperm.xlu0 %7841, %v1035_v38   ;;  %1101 = vperm.xlu1 %7842, %v1037_v41   ;;  %v8269_v49 = vld [vmem:[%s10332_s1 + $0x514] ss:$28 sps:$4 sm:$0xff]   ;;  %v1075_v38 = vld [vmem:[%s10333_s2 + $0x148] sm:$0xff]  ;;  %v1077_v41 = vld [vmem:[%s10333_s2 + $0x158] sm:$0xff] }
 0x1bd   : > { %3854 = vmatpush1.bf16.msra.mxu0 %v8230_v50  ;;  %4986 = vmatpush1.bf16.msra.mxu1 %v8233_v51  ;;  %v1044_v50 = vld [vmem:[%s10333_s2 + $0x50] sm:$0xff]  ;;  %v1043_v51 = vld [vmem:[%s10333_s2 + $0x48] sm:$0xff] }
 0x1be   : > { %3855 = vmatprep.subr.bf16.mxu0 %v8241_v52  ;;  %4987 = vmatprep.subr.bf16.mxu1 %v8244_v53  ;;  %v1046_v52 = vld [vmem:[%s10333_s2 + $0x60] sm:$0xff]  ;;  %v1045_v53 = vld [vmem:[%s10333_s2 + $0x58] sm:$0xff] }
 0x1bf   : > { %3641 = vmatmul.mubr.bf16.gmra.mrb[24].mxu0 %v8154_v54  ;;  %4773 = vmatmul.mubr.bf16.gmra.mrb[24].mxu1 %v8154_v54  ;;  %v8271_v54 = vld [vmem:[%s10332_s1 + $0x510] ss:$28 sps:$4 sm:$0xff]  }
 0x1c0   : > { %3650 = vmatprep.mubr.bf16.mxu0 %v8161_v55  ;;  %4782 = vmatprep.mubr.bf16.mxu1 %v8161_v55  ;;  %v8278_v55 = vld [vmem:[%s10332_s1 + $0x54c] ss:$28 sps:$4 sm:$0xff]  }
 0x1c1   : > { %3856 = vmatpush1.bf16.msra.mxu0 %v8239_v56  ;;  %4988 = vmatpush1.bf16.msra.mxu1 %v8242_v57  ;;  %v1048_v56 = vld [vmem:[%s10333_s2 + $0x70] sm:$0xff]  ;;  %v1047_v57 = vld [vmem:[%s10333_s2 + $0x68] sm:$0xff] }
 0x1c2   : > { %3857 = vmatprep.subr.bf16.mxu0 %v8253_v58  ;;  %4989 = vmatprep.subr.bf16.mxu1 %v8256_v59  ;;  %v1050_v58 = vld [vmem:[%s10333_s2 + $0x80] sm:$0xff]  ;;  %v1049_v59 = vld [vmem:[%s10333_s2 + $0x78] sm:$0xff] }
 0x1c3   : > { %1106 = vperm.xlu0 %7841, %v1038_v40   ;;  %1111 = vperm.xlu1 %7842, %v1039_v45   ;;  %v1078_v40 = vld [vmem:[%s10333_s2 + $0x160] sm:$0xff]  ;;  %v8310_v45 = vld [vmem:[%s10332_s1 + $0x198] ss:$28 sps:$4 sm:$0xff]  }
 0x1c5   : > { %3858 = vmatpush1.bf16.msra.mxu0 %v8251_v60  ;;  %4990 = vmatpush1.bf16.msra.mxu1 %v8254_v61  ;;  %v8280_v60 = vld [vmem:[%s10332_s1 + $0x548] ss:$28 sps:$4 sm:$0xff]   ;;  %v8283_v61 = vld [vmem:[%s10332_s1 + $0x14] ss:$28 sps:$4 sm:$0xff]  }
 0x1c6   : > { %3859 = vmatprep.subr.bf16.mxu0 %v8264_v62  ;;  %4991 = vmatprep.subr.bf16.mxu1 %v8267_v63  ;;  %v1052_v62 = vld [vmem:[%s10333_s2 + $0x90] sm:$0xff]  ;;  %v1051_v63 = vld [vmem:[%s10333_s2 + $0x88] sm:$0xff] }
 0x1c7   : > { %3651 = vmatmul.mubr.bf16.gmra.mrb[28].mxu0 %v8163_v0  ;;  %4783 = vmatmul.mubr.bf16.gmra.mrb[28].mxu1 %v8163_v0  ;;  %v1054_v0 = vld [vmem:[%s10333_s2 + $0xa0] sm:$0xff] }
 0x1c8   : > { %3660 = vmatprep.mubr.bf16.mxu0 %v8164_v1  ;;  %4792 = vmatprep.mubr.bf16.mxu1 %v8164_v1  ;;  %v1053_v1 = vld [vmem:[%s10333_s2 + $0x98] sm:$0xff] }
 0x1c9   : > { %3860 = vmatpush1.bf16.msra.mxu0 %v8262_v2  ;;  %4992 = vmatpush1.bf16.msra.mxu1 %v8265_v3  ;;  %v8281_v2 = vld [vmem:[%s10332_s1 + $0x10] ss:$28 sps:$4 sm:$0xff]  }
 0x1ca   : > { %3861 = vmatprep.subr.bf16.mxu0 %v8274_v4  ;;  %4993 = vmatprep.subr.bf16.mxu1 %v8277_v5  ;;  %v8284_v3 = vld [vmem:[%s8898_s13 + $0x600] ss:$16 sps:$4 sm:$0xff]   ;;  %v8287_v4 = vld [vmem:[%s8898_s13 + $0x608] ss:$16 sps:$4 sm:$0xff]  }
 0x1cb   : > { %1116 = vperm.xlu0 %7841, %v1040_v44   ;;  %1121 = vperm.xlu1 %7842, %v1041_v47   ;;  %v8290_v5 = vld [vmem:[%s10332_s1 + $0x4c] ss:$28 sps:$4 sm:$0xff]   ;;  %v1081_v47 = vld [vmem:[%s10333_s2 + $0x178] sm:$0xff] }
 0x1cc   : > { %v1079_v44 = vld [vmem:[%s10333_s2 + $0x168] sm:$0xff] }
 0x1cd   : > { %3862 = vmatpush1.bf16.msra.mxu0 %v8272_v6  ;;  %4994 = vmatpush1.bf16.msra.mxu1 %v8275_v7  ;;  %v1056_v6 = vld [vmem:[%s10333_s2 + $0xb0] sm:$0xff]  ;;  %v1055_v7 = vld [vmem:[%s10333_s2 + $0xa8] sm:$0xff] }
 0x1ce   : > { %4114 = vmatprep.subr.bf16.mxu0 %v8286_v12  ;;  %5246 = vmatprep.subr.bf16.mxu1 %v8289_v13  ;;  %v1060_v12 = vld [vmem:[%s10333_s2 + $0xd0] sm:$0xff]  ;;  %v1059_v13 = vld [vmem:[%s10333_s2 + $0xc8] sm:$0xff] }
 0x1cf   : > { %3661 = vmatmul.mubr.bf16.gmra.mrb[32].mxu0 %v8172_v8  ;;  %4793 = vmatmul.mubr.bf16.gmra.mrb[32].mxu1 %v8172_v8  ;;  %v8292_v8 = vld [vmem:[%s10332_s1 + $0x48] ss:$28 sps:$4 sm:$0xff]  }
 0x1d0   : > { %3670 = vmatprep.mubr.bf16.mxu0 %v8173_v9  ;;  %4802 = vmatprep.mubr.bf16.mxu1 %v8173_v9  ;;  %v1058_v9 = vld [vmem:[%s10333_s2 + $0xc0] sm:$0xff] }
 0x1d1   : > { %1126 = vperm.xlu0 %7841, %v1042_v46   ;;  %1131 = vperm.xlu1 %7842, %v1043_v51   ;;  %v5729_v46 = vld [vmem:[%s10334_s3] sm:$0xff]  ;;  %v8313_v51 = vld [vmem:[%s10332_s1 + $0x1d0] ss:$28 sps:$4 sm:$0xff]  }
 0x1d5   : > { %1136 = vperm.xlu0 %7841, %v1044_v50   ;;  %1141 = vperm.xlu1 %7842, %v1045_v53   ;;  %v5730_v50 = vld [vmem:[%s10334_s3 + $0x8] sm:$0xff]  ;;  %v5732_v53 = vld [vmem:[%s10334_s3 + $0x18] sm:$0xff] }
 0x1d7   : > { %3671 = vmatmul.mubr.bf16.gmra.mrb[36].mxu0 %v8175_v10  ;;  %4803 = vmatmul.mubr.bf16.gmra.mrb[36].mxu1 %v8175_v10  ;;  %v1057_v10 = vld [vmem:[%s10333_s2 + $0xb8] sm:$0xff] }
 0x1d8   : > { %3680 = vmatprep.mubr.bf16.mxu0 %v8182_v11  ;;  %4812 = vmatprep.mubr.bf16.mxu1 %v8182_v11  ;;  %v8293_v11 = vld [vmem:[%s10332_s1 + $0x84] ss:$28 sps:$4 sm:$0xff]  }
 0x1d9   : > { %1146 = vperm.xlu0 %7841, %v1046_v52   ;;  %1151 = vperm.xlu1 %7842, %v1047_v57   ;;  %v5733_v52 = vld [vmem:[%s10334_s3 + $0x20] sm:$0xff] }
 0x1da   : > { %v8316_v57 = vld [vmem:[%s10332_s1 + $0x208] ss:$28 sps:$4 sm:$0xff]  }
 0x1dd   : > { %1156 = vperm.xlu0 %7841, %v1048_v56   ;;  %1161 = vperm.xlu1 %7842, %v1049_v59   ;;  %v5734_v56 = vld [vmem:[%s10334_s3 + $0x28] sm:$0xff]  ;;  %v5736_v59 = vld [vmem:[%s10334_s3 + $0x38] sm:$0xff] }
 0x1df   : > { %3681 = vmatmul.mubr.bf16.gmra.mrb[40].mxu0 %v8184_v14  ;;  %4813 = vmatmul.mubr.bf16.gmra.mrb[40].mxu1 %v8184_v14  ;;  %v8295_v14 = vld [vmem:[%s10332_s1 + $0x80] ss:$28 sps:$4 sm:$0xff]  }
 0x1e0   : > { %3690 = vmatprep.mubr.bf16.mxu0 %v8185_v15  ;;  %4822 = vmatprep.mubr.bf16.mxu1 %v8185_v15  ;;  %v1062_v15 = vld [vmem:[%s10333_s2 + $0xe0] sm:$0xff] }
 0x1e1   : > { %1166 = vperm.xlu0 %7841, %v1050_v58   ;;  %1171 = vperm.xlu1 %7842, %v1051_v63   ;;  %v5737_v58 = vld [vmem:[%s10334_s3 + $0x40] sm:$0xff] }
 0x1e2   : > { %v8319_v63 = vld [vmem:[%s10332_s1 + $0x240] ss:$28 sps:$4 sm:$0xff]  }
 0x1e5   : > { %1176 = vperm.xlu0 %7841, %v1052_v62   ;;  %1181 = vperm.xlu1 %7842, %v1053_v1   ;;  %v5738_v62 = vld [vmem:[%s10334_s3 + $0x48] sm:$0xff]  ;;  %v5740_v1 = vld [vmem:[%s10334_s3 + $0x58] sm:$0xff] }
 0x1e7   : > { %3691 = vmatmul.mubr.bf16.gmra.mrb[44].mxu0 %v8187_v16  ;;  %4823 = vmatmul.mubr.bf16.gmra.mrb[44].mxu1 %v8187_v16  ;;  %v1061_v16 = vld [vmem:[%s10333_s2 + $0xd8] sm:$0xff] }
 0x1e8   : > { %3700 = vmatprep.mubr.bf16.mxu0 %v8194_v17  ;;  %4832 = vmatprep.mubr.bf16.mxu1 %v8194_v17  ;;  %v8296_v17 = vld [vmem:[%s10332_s1 + $0xbc] ss:$28 sps:$4 sm:$0xff]  }
 0x1e9   : > { %1186 = vperm.xlu0 %7841, %v1054_v0   ;;  %1191 = vperm.xlu1 %7842, %v1055_v7   ;;  %v5741_v0 = vld [vmem:[%s10334_s3 + $0x60] sm:$0xff]  ;;  %v5744_v7 = vld [vmem:[%s10334_s3 + $0x78] sm:$0xff] }
 0x1ed   : > { %1196 = vperm.xlu0 %7841, %v1056_v6   ;;  %1201 = vperm.xlu1 %7842, %v1057_v10   ;;  %v5745_v6 = vld [vmem:[%s10334_s3 + $0x80] sm:$0xff]  ;;  %v5746_v10 = vld [vmem:[%s10334_s3 + $0x88] sm:$0xff] }
 0x1ef   : > { %3701 = vmatmul.mubr.bf16.gmra.mrb[48].mxu0 %v8196_v18  ;;  %4833 = vmatmul.mubr.bf16.gmra.mrb[48].mxu1 %v8196_v18  ;;  %v1064_v18 = vld [vmem:[%s10333_s2 + $0xf0] sm:$0xff] }
 0x1f0   : > { %3710 = vmatprep.mubr.bf16.mxu0 %v8203_v19  ;;  %4842 = vmatprep.mubr.bf16.mxu1 %v8203_v19  ;;  %v1063_v19 = vld [vmem:[%s10333_s2 + $0xe8] sm:$0xff] }
 0x1f1   : > { %1206 = vperm.xlu0 %7841, %v1058_v9   ;;  %1211 = vperm.xlu1 %7842, %v1059_v13   ;;  %v5747_v9 = vld [vmem:[%s10334_s3 + $0x90] sm:$0xff]  ;;  %v5748_v13 = vld [vmem:[%s10334_s3 + $0x98] sm:$0xff] }
 0x1f5   : > { %1216 = vperm.xlu0 %7841, %v1060_v12   ;;  %1221 = vperm.xlu1 %7842, %v1061_v16   ;;  %v5749_v12 = vld [vmem:[%s10334_s3 + $0xa0] sm:$0xff]  ;;  %v5750_v16 = vld [vmem:[%s10334_s3 + $0xa8] sm:$0xff] }
 0x1f7   : > { %3711 = vmatmul.mubr.bf16.gmra.mrb[52].mxu0 %v8205_v20  ;;  %4843 = vmatmul.mubr.bf16.gmra.mrb[52].mxu1 %v8205_v20  ;;  %v8298_v20 = vld [vmem:[%s10332_s1 + $0xb8] ss:$28 sps:$4 sm:$0xff]  }
 0x1f8   : > { %3720 = vmatprep.mubr.bf16.mxu0 %v8206_v21  ;;  %4852 = vmatprep.mubr.bf16.mxu1 %v8206_v21  ;;  %v1066_v21 = vld [vmem:[%s10333_s2 + $0x100] sm:$0xff] }
 0x1f9   : > { %1226 = vperm.xlu0 %7841, %v1062_v15   ;;  %1231 = vperm.xlu1 %7842, %v1063_v19   ;;  %v5751_v15 = vld [vmem:[%s10334_s3 + $0xb0] sm:$0xff]  ;;  %v5752_v19 = vld [vmem:[%s10334_s3 + $0xb8] sm:$0xff] }
 0x1fd   : > { %1236 = vperm.xlu0 %7841, %v1064_v18   ;;  %v5753_v18 = vld [vmem:[%s10334_s3 + $0xc0] sm:$0xff] }
 0x1ff   : > { %3721 = vmatmul.mubr.bf16.gmra.mrb[56].mxu0 %v8208_v22  ;;  %4853 = vmatmul.mubr.bf16.gmra.mrb[56].mxu1 %v8208_v22  ;;  %v1065_v22 = vld [vmem:[%s10333_s2 + $0xf8] sm:$0xff] }
 0x200   : > { %3730 = vmatprep.mubr.bf16.mxu0 %v8215_v23  ;;  %4862 = vmatprep.mubr.bf16.mxu1 %v8215_v23  ;;  %v8299_v23 = vld [vmem:[%s10332_s1 + $0xf4] ss:$28 sps:$4 sm:$0xff]  }
 0x201   : > { %1246 = vperm.xlu0 %7841, %v1066_v21   ;;  %1241 = vperm.xlu1 %7842, %v1065_v22   ;;  %v5755_v21 = vld [vmem:[%s10334_s3 + $0xd0] sm:$0xff]  ;;  %v5754_v22 = vld [vmem:[%s10334_s3 + $0xc8] sm:$0xff] }
 0x207   : > { %3731 = vmatmul.mubr.bf16.gmra.mrb[60].mxu0 %v8217_v24  ;;  %4863 = vmatmul.mubr.bf16.gmra.mrb[60].mxu1 %v8217_v24  ;;  %v1068_v24 = vld [vmem:[%s10333_s2 + $0x110] sm:$0xff] }
 0x208   : > { %3740 = vmatprep.mubr.bf16.mxu0 %v8224_v25  ;;  %4872 = vmatprep.mubr.bf16.mxu1 %v8224_v25  ;;  %v1067_v25 = vld [vmem:[%s10333_s2 + $0x108] sm:$0xff] }
 0x209   : > { %1256 = vperm.xlu0 %7841, %v1068_v24   ;;  %1251 = vperm.xlu1 %7842, %v1067_v25   ;;  %v5757_v24 = vld [vmem:[%s10334_s3 + $0xe0] sm:$0xff]  ;;  %v5756_v25 = vld [vmem:[%s10334_s3 + $0xd8] sm:$0xff] }
 0x20f   : > { %3741 = vmatmul.mubr.bf16.gmra.mrb[64].mxu0 %v8226_v26  ;;  %4873 = vmatmul.mubr.bf16.gmra.mrb[64].mxu1 %v8226_v26  ;;  %v8301_v26 = vld [vmem:[%s10332_s1 + $0xf0] ss:$28 sps:$4 sm:$0xff]  }
 0x210   : > { %3750 = vmatprep.mubr.bf16.mxu0 %v8227_v27  ;;  %4882 = vmatprep.mubr.bf16.mxu1 %v8227_v27  ;;  %v1070_v27 = vld [vmem:[%s10333_s2 + $0x120] sm:$0xff] }
 0x211   : > { %1266 = vperm.xlu0 %7841, %v1070_v27   ;;  %v5759_v27 = vld [vmem:[%s10334_s3 + $0xf0] sm:$0xff] }
 0x217   : > { %3751 = vmatmul.mubr.bf16.gmra.mrb[68].mxu0 %v8229_v28  ;;  %4883 = vmatmul.mubr.bf16.gmra.mrb[68].mxu1 %v8229_v28  ;;  %v1069_v28 = vld [vmem:[%s10333_s2 + $0x118] sm:$0xff] }
 0x218   : > { %3760 = vmatprep.mubr.bf16.mxu0 %v8236_v29  ;;  %4892 = vmatprep.mubr.bf16.mxu1 %v8236_v29  ;;  %v8302_v29 = vld [vmem:[%s10332_s1 + $0x12c] ss:$28 sps:$4 sm:$0xff]  }
 0x219   : > { %1261 = vperm.xlu1 %7842, %v1069_v28   ;;  %v5758_v28 = vld [vmem:[%s10334_s3 + $0xe8] sm:$0xff] }
 0x21f   : > { %3761 = vmatmul.mubr.bf16.gmra.mrb[72].mxu0 %v8238_v30  ;;  %4893 = vmatmul.mubr.bf16.gmra.mrb[72].mxu1 %v8238_v30  ;;  %v1072_v30 = vld [vmem:[%s10333_s2 + $0x130] sm:$0xff] }
 0x220   : > { %3770 = vmatprep.mubr.bf16.mxu0 %v8245_v31  ;;  %4902 = vmatprep.mubr.bf16.mxu1 %v8245_v31  ;;  %v1071_v31 = vld [vmem:[%s10333_s2 + $0x128] sm:$0xff] }
 0x221   : > { %1276 = vperm.xlu0 %7841, %v1072_v30   ;;  %1271 = vperm.xlu1 %7842, %v1071_v31   ;;  %v5761_v30 = vld [vmem:[%s10334_s3 + $0x100] sm:$0xff]  ;;  %v5760_v31 = vld [vmem:[%s10334_s3 + $0xf8] sm:$0xff] }
 0x225   : > { %1281 = vperm.xlu1 %7842, %v1073_v34   ;;  %v5762_v34 = vld [vmem:[%s10334_s3 + $0x108] sm:$0xff] }
 0x227   : > { %3771 = vmatmul.mubr.bf16.gmra.mrb[76].mxu0 %v8247_v32  ;;  %4903 = vmatmul.mubr.bf16.gmra.mrb[76].mxu1 %v8247_v32  ;;  %v8304_v32 = vld [vmem:[%s10332_s1 + $0x128] ss:$28 sps:$4 sm:$0xff]  }
 0x228   : > { %3780 = vmatprep.mubr.bf16.mxu0 %v8248_v33  ;;  %4912 = vmatprep.mubr.bf16.mxu1 %v8248_v33  ;;  %v1074_v33 = vld [vmem:[%s10333_s2 + $0x140] sm:$0xff] }
 0x229   : > { %1286 = vperm.xlu0 %7841, %v1074_v33   ;;  %1291 = vperm.xlu1 %7842, %v1075_v38   ;;  %v5763_v33 = vld [vmem:[%s10334_s3 + $0x110] sm:$0xff]  ;;  %v5764_v38 = vld [vmem:[%s10334_s3 + $0x118] sm:$0xff] }
 0x22d   : > { %1301 = vperm.xlu1 %7842, %v1077_v41   ;;  %v5766_v41 = vld [vmem:[%s10334_s3 + $0x128] sm:$0xff] }
 0x22f   : > { %3781 = vmatmul.mubr.bf16.gmra.mrb[80].mxu0 %v8250_v36  ;;  %4913 = vmatmul.mubr.bf16.gmra.mrb[80].mxu1 %v8250_v36  ;;  %v8305_v36 = vld [vmem:[%s10332_s1 + $0x164] ss:$28 sps:$4 sm:$0xff]  }
 0x230   : > { %3790 = vmatprep.mubr.bf16.mxu0 %v8257_v37  ;;  %4922 = vmatprep.mubr.bf16.mxu1 %v8257_v37  ;;  %v1076_v37 = vld [vmem:[%s10333_s2 + $0x150] sm:$0xff] }
 0x231   : > { %1296 = vperm.xlu0 %7841, %v1076_v37   ;;  %1311 = vperm.xlu1 %7842, %v1079_v44   ;;  %v5765_v37 = vld [vmem:[%s10334_s3 + $0x120] sm:$0xff]  ;;  %v5768_v44 = vld [vmem:[%s10334_s3 + $0x138] sm:$0xff] }
 0x235   : > { %1306 = vperm.xlu0 %7841, %v1078_v40   ;;  %1321 = vperm.xlu1 %7842, %v1081_v47   ;;  %v5767_v40 = vld [vmem:[%s10334_s3 + $0x130] sm:$0xff]  ;;  %v5770_v47 = vld [vmem:[%s10334_s3 + $0x148] sm:$0xff] }
 0x237   : > { %3791 = vmatmul.mubr.bf16.gmra.mrb[84].mxu0 %v8259_v42  ;;  %4923 = vmatmul.mubr.bf16.gmra.mrb[84].mxu1 %v8259_v42  ;;  %v8308_v42 = vld [vmem:[%s10332_s1 + $0x19c] ss:$28 sps:$4 sm:$0xff]  }
 0x238   : > { %3800 = vmatprep.mubr.bf16.mxu0 %v8260_v43  ;;  %4932 = vmatprep.mubr.bf16.mxu1 %v8260_v43  ;;  %v1080_v43 = vld [vmem:[%s10333_s2 + $0x170] sm:$0xff] }
 0x239   : > { %1316 = vperm.xlu0 %7841, %v1080_v43   ;;  %5786 = vperm.xlu1 %7842, %v5730_v50   ;;  %v5769_v43 = vld [vmem:[%s10334_s3 + $0x140] sm:$0xff]  ;;  %v5772_v50 = vld [vmem:[%s10334_s3 + $0x158] sm:$0xff] }
 0x23d   : > { %5781 = vperm.xlu0 %7841, %v5729_v46   ;;  %5796 = vperm.xlu1 %7842, %v5732_v53   ;;  %v5771_v46 = vld [vmem:[%s10334_s3 + $0x150] sm:$0xff]  ;;  %v5774_v53 = vld [vmem:[%s10334_s3 + $0x168] sm:$0xff] }
 0x23f   : > { %3801 = vmatmul.mubr.bf16.gmra.mrb[88].mxu0 %v8268_v48  ;;  %4933 = vmatmul.mubr.bf16.gmra.mrb[88].mxu1 %v8268_v48  ;;  %v8311_v48 = vld [vmem:[%s10332_s1 + $0x1d4] ss:$28 sps:$4 sm:$0xff]  }
 0x240   : > { %3810 = vmatprep.mubr.bf16.mxu0 %v8269_v49  ;;  %4942 = vmatprep.mubr.bf16.mxu1 %v8269_v49  ;;  %v5731_v49 = vld [vmem:[%s10334_s3 + $0x10] sm:$0xff] }
 0x241   : > { %5791 = vperm.xlu0 %7841, %v5731_v49   ;;  %5806 = vperm.xlu1 %7842, %v5734_v56   ;;  %v5773_v49 = vld [vmem:[%s10334_s3 + $0x160] sm:$0xff]  ;;  %v5775_v56 = vld [vmem:[%s10334_s3 + $0x170] sm:$0xff] }
 0x245   : > { %5801 = vperm.xlu0 %7841, %v5733_v52   ;;  %5816 = vperm.xlu1 %7842, %v5736_v59   ;;  %v1082_v52 = vld [vmem:[%s10333_s2 + $0x180] sm:$0xff]  ;;  %v5776_v59 = vld [vmem:[%s10334_s3 + $0x178] sm:$0xff] }
 0x247   : > { %3811 = vmatmul.mubr.bf16.gmra.mrb[92].mxu0 %v8271_v54  ;;  %4943 = vmatmul.mubr.bf16.gmra.mrb[92].mxu1 %v8271_v54  ;;  %v8314_v54 = vld [vmem:[%s10332_s1 + $0x20c] ss:$28 sps:$4 sm:$0xff]  }
 0x248   : > { %3820 = vmatprep.mubr.bf16.mxu0 %v8278_v55  ;;  %4952 = vmatprep.mubr.bf16.mxu1 %v8278_v55  ;;  %v5735_v55 = vld [vmem:[%s10334_s3 + $0x30] sm:$0xff] }
 0x249   : > { %5811 = vperm.xlu0 %7841, %v5735_v55   ;;  %5826 = vperm.xlu1 %7842, %v5738_v62   ;;  %v1083_v55 = vld [vmem:[%s10333_s2 + $0x188] sm:$0xff]  ;;  %v6449_v62 = vld [vmem:[#allocation2] sm:$0x1] }
 0x24d   : > { %5821 = vperm.xlu0 %7841, %v5737_v58   ;;  %5836 = vperm.xlu1 %7842, %v5740_v1   ;;  %v5777_v58 = vld [vmem:[%s10334_s3 + $0x180] sm:$0xff] }
 0x24f   : > { %3821 = vmatmul.mubr.bf16.gmra.mrb[96].mxu0 %v8280_v60  ;;  %4953 = vmatmul.mubr.bf16.gmra.mrb[96].mxu1 %v8280_v60  ;;  %v8317_v60 = vld [vmem:[%s10332_s1 + $0x244] ss:$28 sps:$4 sm:$0xff]  }
 0x250   : > { %3863 = vmatprep.mubr.bf16.mxu0 %v8283_v61  ;;  %4995 = vmatprep.mubr.bf16.mxu1 %v8283_v61  ;;  %v5739_v61 = vld [vmem:[%s10334_s3 + $0x50] sm:$0xff] }
 0x251   : > { %5831 = vperm.xlu0 %7841, %v5739_v61   ;;  %v8349_v61 = vld [vmem:[%s10332_s1 + $0x470] ss:$28 sps:$4 sm:$0xff]  }
 0x255   : > { %5841 = vperm.xlu0 %7841, %v5741_v0   ;;  %v8350_v0 = vld [vmem:[%s10332_s1 + $0x4ac] ss:$28 sps:$4 sm:$0xff]  }
 0x257   : > { %3864 = vmatmul.mubr.bf16.vlgmr.msra.gmra.mrb[0].mxu0 %v8281_v2  ;;  %4996 = vmatmul.mubr.bf16.vlgmr.msra.gmra.mrb[0].mxu1 %v8281_v2  ;;  %v8320_v2 = vld [vmem:[%s10332_s1 + $0x27c] ss:$28 sps:$4 sm:$0xff]  }
 0x258   : > { %4115 = vmatpush1.bf16.msra.mxu0 %v8284_v3  ;;  %5247 = vmatpush1.bf16.msra.mxu1 %v8287_v4  ;;  %v5743_v3 = vld [vmem:[%s10334_s3 + $0x70] sm:$0xff]  ;;  %v5742_v4 = vld [vmem:[%s10334_s3 + $0x68] sm:$0xff] }
 0x259   : > { %3873 = vmatprep.mubr.bf16.mxu0 %v8290_v5  ;;  %5005 = vmatprep.mubr.bf16.mxu1 %v8290_v5  ;;  %v8322_v5 = vld [vmem:[%s10332_s1 + $0x278] ss:$28 sps:$4 sm:$0xff]  }
 0x25a   : > { %5851 = vperm.xlu0 %7841, %v5743_v3   ;;  %5846 = vperm.xlu1 %7842, %v5742_v4   ;;  %v8352_v3 = vld [vmem:[%s10332_s1 + $0x4a8] ss:$28 sps:$4 sm:$0xff]  }
 0x25b   : > { %v8353_v4 = vld [vmem:[%s10332_s1 + $0x4e4] ss:$28 sps:$4 sm:$0xff]  }
 0x25e   : > { %5861 = vperm.xlu0 %7841, %v5745_v6   ;;  %5856 = vperm.xlu1 %7842, %v5744_v7   ;;  %v8356_v6 = vld [vmem:[%s10332_s1 + $0x51c] ss:$28 sps:$4 sm:$0xff]  }
 0x25f   : > { %3874 = vmatmul.mubr.bf16.gmra.mrb[4].mxu0 %v8292_v8  ;;  %5006 = vmatmul.mubr.bf16.gmra.mrb[4].mxu1 %v8292_v8  ;;  %v8323_v8 = vld [vmem:[%s10332_s1 + $0x2b4] ss:$28 sps:$4 sm:$0xff]  }
 0x260   : > { %3883 = vmatprep.mubr.bf16.mxu0 %v8293_v11  ;;  %5015 = vmatprep.mubr.bf16.mxu1 %v8293_v11  ;;  %v8325_v11 = vld [vmem:[%s10332_s1 + $0x2b0] ss:$28 sps:$4 sm:$0xff]   ;;  %v8358_v7 = vld [vmem:[%s10332_s1 + $0x518] ss:$28 sps:$4 sm:$0xff]  }
 0x262   : > { %5871 = vperm.xlu0 %7841, %v5747_v9   ;;  %5866 = vperm.xlu1 %7842, %v5746_v10   ;;  %v8361_v9 = vld [vmem:[%s10332_s1 + $0x550] ss:$28 sps:$4 sm:$0xff]   ;;  %v8362_v10 = vld [vmem:[%s10332_s1 + $0x18] ss:$28 sps:$4 sm:$0xff]  }
 0x266   : > { %5881 = vperm.xlu0 %7841, %v5749_v12   ;;  %5876 = vperm.xlu1 %7842, %v5748_v13   ;;  %v8364_v12 = vld [vmem:[%s10332_s1 + $0x88] ss:$28 sps:$4 sm:$0xff]   ;;  %v8365_v13 = vld [vmem:[%s10332_s1 + $0xc0] ss:$28 sps:$4 sm:$0xff]  }
 0x267   : > { %3884 = vmatmul.mubr.bf16.gmra.mrb[8].mxu0 %v8295_v14  ;;  %5016 = vmatmul.mubr.bf16.gmra.mrb[8].mxu1 %v8295_v14  ;;  %v8326_v14 = vld [vmem:[%s10332_s1 + $0x2ec] ss:$28 sps:$4 sm:$0xff]  }
 0x268   : > { %3893 = vmatprep.mubr.bf16.mxu0 %v8296_v17  ;;  %5025 = vmatprep.mubr.bf16.mxu1 %v8296_v17  ;;  %v8328_v17 = vld [vmem:[%s10332_s1 + $0x2e8] ss:$28 sps:$4 sm:$0xff]  }
 0x26a   : > { %5891 = vperm.xlu0 %7841, %v5751_v15   ;;  %5886 = vperm.xlu1 %7842, %v5750_v16   ;;  %v8367_v15 = vld [vmem:[%s10332_s1 + $0x130] ss:$28 sps:$4 sm:$0xff]   ;;  %v8368_v16 = vld [vmem:[%s10332_s1 + $0x168] ss:$28 sps:$4 sm:$0xff]  }
 0x26e   : > { %5901 = vperm.xlu0 %7841, %v5753_v18   ;;  %5896 = vperm.xlu1 %7842, %v5752_v19   ;;  %v8370_v18 = vld [vmem:[%s10332_s1 + $0x1d8] ss:$28 sps:$4 sm:$0xff]   ;;  %v8371_v19 = vld [vmem:[%s10332_s1 + $0x210] ss:$28 sps:$4 sm:$0xff]  }
 0x26f   : > { %3894 = vmatmul.mubr.bf16.gmra.mrb[12].mxu0 %v8298_v20  ;;  %5026 = vmatmul.mubr.bf16.gmra.mrb[12].mxu1 %v8298_v20  ;;  %v8329_v20 = vld [vmem:[%s10332_s1 + $0x324] ss:$28 sps:$4 sm:$0xff]  }
 0x270   : > { %3903 = vmatprep.mubr.bf16.mxu0 %v8299_v23  ;;  %5035 = vmatprep.mubr.bf16.mxu1 %v8299_v23  ;;  %v8331_v23 = vld [vmem:[%s10332_s1 + $0x320] ss:$28 sps:$4 sm:$0xff]  }
 0x272   : > { %5911 = vperm.xlu0 %7841, %v5755_v21   ;;  %5906 = vperm.xlu1 %7842, %v5754_v22   ;;  %v8372_v21 = vld [vmem:[%s10332_s1 + $0x248] ss:$28 sps:$4 sm:$0xff]  }
 0x276   : > { %5921 = vperm.xlu0 %7841, %v5757_v24   ;;  %5916 = vperm.xlu1 %7842, %v5756_v25  }
 0x277   : > { %3904 = vmatmul.mubr.bf16.gmra.mrb[16].mxu0 %v8301_v26  ;;  %5036 = vmatmul.mubr.bf16.gmra.mrb[16].mxu1 %v8301_v26  ;;  %v8332_v26 = vld [vmem:[%s10332_s1 + $0x35c] ss:$28 sps:$4 sm:$0xff]  }
 0x278   : > { %3913 = vmatprep.mubr.bf16.mxu0 %v8302_v29  ;;  %5045 = vmatprep.mubr.bf16.mxu1 %v8302_v29  ;;  %v8334_v29 = vld [vmem:[%s10332_s1 + $0x358] ss:$28 sps:$4 sm:$0xff]  }
 0x27a   : > { %5931 = vperm.xlu0 %7841, %v5759_v27   ;;  %5926 = vperm.xlu1 %7842, %v5758_v28  }
 0x27e   : > { %5941 = vperm.xlu0 %7841, %v5761_v30   ;;  %5936 = vperm.xlu1 %7842, %v5760_v31  }
 0x27f   : > { %3914 = vmatmul.mubr.bf16.gmra.mrb[20].mxu0 %v8304_v32  ;;  %5046 = vmatmul.mubr.bf16.gmra.mrb[20].mxu1 %v8304_v32  ;;  %v8335_v32 = vld [vmem:[%s10332_s1 + $0x394] ss:$28 sps:$4 sm:$0xff]  }
 0x280   : > { %3923 = vmatprep.mubr.bf16.mxu0 %v8305_v36  ;;  %5055 = vmatprep.mubr.bf16.mxu1 %v8305_v36  ;;  %v8337_v36 = vld [vmem:[%s10332_s1 + $0x390] ss:$28 sps:$4 sm:$0xff]  }
 0x282   : > { %5951 = vperm.xlu0 %7841, %v5763_v33   ;;  %5946 = vperm.xlu1 %7842, %v5762_v34  }
 0x286   : > { %5961 = vperm.xlu0 %7841, %v5765_v37   ;;  %5956 = vperm.xlu1 %7842, %v5764_v38   ;;  %v8376_v38 = vld [vmem:[%s10332_s1 + $0x328] ss:$28 sps:$4 sm:$0xff]  }
 0x287   : > { %3924 = vmatmul.mubr.bf16.gmra.mrb[24].mxu0 %v8307_v39  ;;  %5056 = vmatmul.mubr.bf16.gmra.mrb[24].mxu1 %v8307_v39  ;;  %v8338_v39 = vld [vmem:[%s10332_s1 + $0x3cc] ss:$28 sps:$4 sm:$0xff]  }
 0x288   : > { %3933 = vmatprep.mubr.bf16.mxu0 %v8308_v42  ;;  %5065 = vmatprep.mubr.bf16.mxu1 %v8308_v42  ;;  %v8340_v42 = vld [vmem:[%s10332_s1 + $0x3c8] ss:$28 sps:$4 sm:$0xff]  }
 0x28a   : > { %5971 = vperm.xlu0 %7841, %v5767_v40   ;;  %5966 = vperm.xlu1 %7842, %v5766_v41   ;;  %v8377_v41 = vld [vmem:[%s10332_s1 + $0x360] ss:$28 sps:$4 sm:$0xff]  }
 0x28e   : > { %5981 = vperm.xlu0 %7841, %v5769_v43   ;;  %5976 = vperm.xlu1 %7842, %v5768_v44   ;;  %v8378_v44 = vld [vmem:[%s10332_s1 + $0x398] ss:$28 sps:$4 sm:$0xff]  }
 0x28f   : > { %3934 = vmatmul.mubr.bf16.gmra.mrb[28].mxu0 %v8310_v45  ;;  %5066 = vmatmul.mubr.bf16.gmra.mrb[28].mxu1 %v8310_v45  ;;  %v8341_v45 = vld [vmem:[%s10332_s1 + $0x404] ss:$28 sps:$4 sm:$0xff]  }
 0x290   : > { %3943 = vmatprep.mubr.bf16.mxu0 %v8311_v48  ;;  %5075 = vmatprep.mubr.bf16.mxu1 %v8311_v48  ;;  %v8343_v48 = vld [vmem:[%s10332_s1 + $0x400] ss:$28 sps:$4 sm:$0xff]  }
 0x292   : > { %5991 = vperm.xlu0 %7841, %v5771_v46   ;;  %5986 = vperm.xlu1 %7842, %v5770_v47  }
 0x296   : > { %6001 = vperm.xlu0 %7841, %v5773_v49   ;;  %5996 = vperm.xlu1 %7842, %v5772_v50   ;;  %v8379_v49 = vld [vmem:[%s10332_s1 + $0x3d0] ss:$28 sps:$4 sm:$0xff]  }
 0x297   : > { %3944 = vmatmul.mubr.bf16.gmra.mrb[32].mxu0 %v8313_v51  ;;  %5076 = vmatmul.mubr.bf16.gmra.mrb[32].mxu1 %v8313_v51  ;;  %v8344_v51 = vld [vmem:[%s10332_s1 + $0x43c] ss:$28 sps:$4 sm:$0xff]  }
 0x298   : > { %3953 = vmatprep.mubr.bf16.mxu0 %v8314_v54  ;;  %5085 = vmatprep.mubr.bf16.mxu1 %v8314_v54  ;;  %v8346_v54 = vld [vmem:[%s10332_s1 + $0x438] ss:$28 sps:$4 sm:$0xff]  }
 0x29a   : > { %1326 = vperm.xlu0 %7841, %v1082_v52   ;;  %6006 = vperm.xlu1 %7842, %v5774_v53   ;;  %v8380_v52 = vld [vmem:[%s10332_s1 + $0x408] ss:$28 sps:$4 sm:$0xff]  }
 0x29e   : > { %1331 = vperm.xlu0 %7841, %v1083_v55   ;;  %6011 = vperm.xlu1 %7842, %v5775_v56   ;;  %v8381_v55 = vld [vmem:[%s10332_s1 + $0x440] ss:$28 sps:$4 sm:$0xff]  }
 0x29f   : > { %3954 = vmatmul.mubr.bf16.gmra.mrb[36].mxu0 %v8316_v57  ;;  %5086 = vmatmul.mubr.bf16.gmra.mrb[36].mxu1 %v8316_v57  ;;  %v8347_v57 = vld [vmem:[%s10332_s1 + $0x474] ss:$28 sps:$4 sm:$0xff]  }
 0x2a0   : > { %3963 = vmatprep.mubr.bf16.mxu0 %v8317_v60  ;;  %5095 = vmatprep.mubr.bf16.mxu1 %v8317_v60  ;;  %v9815_v60 = vpop.permute.xlu0 %1086 }
 0x2a2   : > { %6021 = vperm.xlu0 %7841, %v5777_v58   ;;  %6016 = vperm.xlu1 %7842, %v5776_v59  }
 0x2a4   : > { %v9826_v1 = vpop.permute.xlu0 %1091 }
 0x2a6   : > { %6452 = vperm.xlu0 %7841, %v6449_v62  }
 0x2a7   : > { %3964 = vmatmul.mubr.bf16.gmra.mrb[40].mxu0 %v8319_v63  ;;  %5096 = vmatmul.mubr.bf16.gmra.mrb[40].mxu1 %v8319_v63  ;;  %v5778_v63 = vld [vmem:[%s10334_s3 + $0x188] sm:$0xff] }
 0x2a8   : > { %3973 = vmatprep.mubr.bf16.mxu0 %v8320_v2  ;;  %5105 = vmatprep.mubr.bf16.mxu1 %v8320_v2  ;;  %v9828_v2 = vpop.permute.xlu1 %1096  ;;  %v9928_v22 = vpop.permute.xlu0 %1106 }
 0x2a9   : > { %6026 = vperm.xlu1 %7842, %v5778_v63  }
 0x2ac   : > { %v9936_v24 = vpop.permute.xlu0 %1116 }
 0x2af   : > { %3974 = vmatmul.mubr.bf16.gmra.mrb[44].mxu0 %v8322_v5  ;;  %5106 = vmatmul.mubr.bf16.gmra.mrb[44].mxu1 %v8322_v5  ;;  %v8355_v5 = vld [vmem:[%s10332_s1 + $0x4e0] ss:$28 sps:$4 sm:$0xff]  }
 0x2b0   : > { %3983 = vmatprep.mubr.bf16.mxu0 %v8323_v8  ;;  %5115 = vmatprep.mubr.bf16.mxu1 %v8323_v8  ;;  %v8359_v8 = vld [vmem:[%s10332_s1 + $0x554] ss:$28 sps:$4 sm:$0xff]   ;;  %v9947_v27 = vpop.permute.xlu0 %1126 }
 0x2b4   : > { %v9954_v30 = vpop.permute.xlu0 %1136 }
 0x2b7   : > { %3984 = vmatmul.mubr.bf16.gmra.mrb[48].mxu0 %v8325_v11  ;;  %5116 = vmatmul.mubr.bf16.gmra.mrb[48].mxu1 %v8325_v11  ;;  %v8363_v11 = vld [vmem:[%s10332_s1 + $0x50] ss:$28 sps:$4 sm:$0xff]  }
 0x2b8   : > { %3993 = vmatprep.mubr.bf16.mxu0 %v8326_v14  ;;  %5125 = vmatprep.mubr.bf16.mxu1 %v8326_v14  ;;  %v8366_v14 = vld [vmem:[%s10332_s1 + $0xf8] ss:$28 sps:$4 sm:$0xff]   ;;  %v9965_v33 = vpop.permute.xlu0 %1146 }
 0x2bf   : > { %3994 = vmatmul.mubr.bf16.gmra.mrb[52].mxu0 %v8328_v17  ;;  %5126 = vmatmul.mubr.bf16.gmra.mrb[52].mxu1 %v8328_v17  ;;  %v8369_v17 = vld [vmem:[%s10332_s1 + $0x1a0] ss:$28 sps:$4 sm:$0xff]  }
 0x2c0   : > { %4003 = vmatprep.mubr.bf16.mxu0 %v8329_v20  ;;  %5135 = vmatprep.mubr.bf16.mxu1 %v8329_v20  ;;  %v9919_v20 = vpop.permute.xlu1 %1101 }
 0x2c7   : > { %4004 = vmatmul.mubr.bf16.gmra.mrb[56].mxu0 %v8331_v23  ;;  %5136 = vmatmul.mubr.bf16.gmra.mrb[56].mxu1 %v8331_v23  ;;  %v9930_v23 = vpop.permute.xlu1 %1111 }
 0x2c8   : > { %4013 = vmatprep.mubr.bf16.mxu0 %v8332_v26  ;;  %5145 = vmatprep.mubr.bf16.mxu1 %v8332_v26  ;;  %v8373_v26 = vld [vmem:[%s10332_s1 + $0x280] ss:$28 sps:$4 sm:$0xff]  }
 0x2cb   : > { %v9938_v25 = vpop.permute.xlu1 %1121 }
 0x2cf   : > { %4014 = vmatmul.mubr.bf16.gmra.mrb[60].mxu0 %v8334_v29  ;;  %5146 = vmatmul.mubr.bf16.gmra.mrb[60].mxu1 %v8334_v29  ;;  %v9949_v28 = vpop.permute.xlu1 %1131  ;;  %v8374_v29 = vld [vmem:[%s10332_s1 + $0x2b8] ss:$28 sps:$4 sm:$0xff]  }
 0x2d0   : > { %4023 = vmatprep.mubr.bf16.mxu0 %v8335_v32  ;;  %5155 = vmatprep.mubr.bf16.mxu1 %v8335_v32  ;;  %v8375_v32 = vld [vmem:[%s10332_s1 + $0x2f0] ss:$28 sps:$4 sm:$0xff]  }
 0x2d3   : > { %v9956_v31 = vpop.permute.xlu1 %1141 }
 0x2d7   : > { %4024 = vmatmul.mubr.bf16.gmra.mrb[64].mxu0 %v8337_v36  ;;  %5156 = vmatmul.mubr.bf16.gmra.mrb[64].mxu1 %v8337_v36  ;;  %v9967_v34 = vpop.permute.xlu1 %1151  ;;  %v9973_v36 = vpop.permute.xlu0 %1156 }
 0x2d8   : > { %4033 = vmatprep.mubr.bf16.mxu0 %v8338_v39  ;;  %5165 = vmatprep.mubr.bf16.mxu1 %v8338_v39 }
 0x2db   : > { %v9975_v37 = vpop.permute.xlu1 %1161  ;;  %v9984_v39 = vpop.permute.xlu0 %1166 }
 0x2df   : > { %4034 = vmatmul.mubr.bf16.gmra.mrb[68].mxu0 %v8340_v42  ;;  %5166 = vmatmul.mubr.bf16.gmra.mrb[68].mxu1 %v8340_v42  ;;  %v9986_v40 = vpop.permute.xlu1 %1171  ;;  %v9991_v42 = vpop.permute.xlu0 %1176 }
 0x2e0   : > { %4043 = vmatprep.mubr.bf16.mxu0 %v8341_v45  ;;  %5175 = vmatprep.mubr.bf16.mxu1 %v8341_v45 }
 0x2e3   : > { %v9993_v43 = vpop.permute.xlu1 %1181  ;;  %v10002_v45 = vpop.permute.xlu0 %1186 }
 0x2e7   : > { %4044 = vmatmul.mubr.bf16.gmra.mrb[72].mxu0 %v8343_v48  ;;  %5176 = vmatmul.mubr.bf16.gmra.mrb[72].mxu1 %v8343_v48  ;;  %v10004_v46 = vpop.permute.xlu1 %1191  ;;  %v10010_v47 = vpop.permute.xlu0 %1196 }
 0x2e8   : > { %4053 = vmatprep.mubr.bf16.mxu0 %v8344_v51  ;;  %5185 = vmatprep.mubr.bf16.mxu1 %v8344_v51 }
 0x2eb   : > { %v10012_v48 = vpop.permute.xlu1 %1201  ;;  %v10021_v50 = vpop.permute.xlu0 %1206 }
 0x2ef   : > { %4054 = vmatmul.mubr.bf16.gmra.mrb[76].mxu0 %v8346_v54  ;;  %5186 = vmatmul.mubr.bf16.gmra.mrb[76].mxu1 %v8346_v54  ;;  %v10023_v51 = vpop.permute.xlu1 %1211  ;;  %v10028_v53 = vpop.permute.xlu0 %1216 }
 0x2f0   : > { %4063 = vmatprep.mubr.bf16.mxu0 %v8347_v57  ;;  %5195 = vmatprep.mubr.bf16.mxu1 %v8347_v57 }
 0x2f3   : > { %v10030_v54 = vpop.permute.xlu1 %1221  ;;  %v10039_v56 = vpop.permute.xlu0 %1226 }
 0x2f7   : > { %4064 = vmatmul.mubr.bf16.gmra.mrb[80].mxu0 %v8349_v61  ;;  %5196 = vmatmul.mubr.bf16.gmra.mrb[80].mxu1 %v8349_v61  ;;  %v10041_v57 = vpop.permute.xlu1 %1231  ;;  %v10047_v58 = vpop.permute.xlu0 %1236  ;;  %v8382_v61 = vld [vmem:[%s10332_s1 + $0x478] ss:$28 sps:$4 sm:$0xff]  }
 0x2f8   : > { %4073 = vmatprep.mubr.bf16.mxu0 %v8350_v0  ;;  %5205 = vmatprep.mubr.bf16.mxu1 %v8350_v0  ;;  %v8383_v0 = vld [vmem:[%s10332_s1 + $0x4b0] ss:$28 sps:$4 sm:$0xff]  }
 0x2fb   : > { %v10049_v59 = vpop.permute.xlu1 %1241  ;;  %v10058_v62 = vpop.permute.xlu0 %1246 }
 0x2ff   : > { %4074 = vmatmul.mubr.bf16.gmra.mrb[84].mxu0 %v8352_v3  ;;  %5206 = vmatmul.mubr.bf16.gmra.mrb[84].mxu1 %v8352_v3  ;;  %v10060_v63 = vpop.permute.xlu1 %1251  ;;  %v10065_v3 = vpop.permute.xlu0 %1256 }
 0x300   : > { %4083 = vmatprep.mubr.bf16.mxu0 %v8353_v4  ;;  %5215 = vmatprep.mubr.bf16.mxu1 %v8353_v4  ;;  %10352 = vst [vmem:[#allocation4_spill] sm:$0xff] %v10060_v63  ;;  %10353 = vst [vmem:[#allocation5_spill] sm:$0xff] %v10065_v3 }
 0x303   : > { %v10067_v4 = vpop.permute.xlu1 %1261 }
 0x304   : > { %10354 = vst [vmem:[#allocation6_spill] sm:$0xff] %v10067_v4 }
 0x307   : > { %4084 = vmatmul.mubr.bf16.gmra.mrb[88].mxu0 %v8355_v5  ;;  %5216 = vmatmul.mubr.bf16.gmra.mrb[88].mxu1 %v8355_v5  ;;  %v8384_v5 = vld [vmem:[%s10332_s1 + $0x4e8] ss:$28 sps:$4 sm:$0xff]  }
 0x308   : > { %4093 = vmatprep.mubr.bf16.mxu0 %v8356_v6  ;;  %5225 = vmatprep.mubr.bf16.mxu1 %v8356_v6  ;;  %v10076_v6 = vpop.permute.xlu0 %1266 }
 0x309   : > { %10355 = vst [vmem:[#allocation7_spill] sm:$0xff] %v10076_v6 }
 0x30f   : > { %4094 = vmatmul.mubr.bf16.gmra.mrb[92].mxu0 %v8358_v7  ;;  %5226 = vmatmul.mubr.bf16.gmra.mrb[92].mxu1 %v8358_v7  ;;  %v10078_v7 = vpop.permute.xlu1 %1271 }
 0x310   : > { %4103 = vmatprep.mubr.bf16.mxu0 %v8359_v8  ;;  %5235 = vmatprep.mubr.bf16.mxu1 %v8359_v8  ;;  %10356 = vst [vmem:[#allocation8_spill] sm:$0xff] %v10078_v7  ;;  %v10084_v8 = vpop.permute.xlu0 %1276 }
 0x311   : > { %10357 = vst [vmem:[#allocation9_spill] sm:$0xff] %v10084_v8 }
 0x317   : > { %4104 = vmatmul.mubr.bf16.gmra.mrb[96].mxu0 %v8361_v9  ;;  %5236 = vmatmul.mubr.bf16.gmra.mrb[96].mxu1 %v8361_v9  ;;  %v10086_v9 = vpop.permute.xlu1 %1281 }
 0x318   : > { %4146 = vmatprep.mubr.bf16.mxu0 %v8427_v35  ;;  %5278 = vmatprep.mubr.bf16.mxu1 %v8427_v35  ;;  %10358 = vst [vmem:[#allocation10_spill] sm:$0xff] %v10086_v9 }
 0x31f   : > { %6956 = vmatmul.mubr.msk.bf16.vlgmr.msra.gmra.mrb[0].mxu0 %vm3189_vm0, %v8362_v10  ;;  %6981 = vmatmul.mubr.msk.bf16.vlgmr.msra.gmra.mrb[0].mxu1 %vm3189_vm0, %v8362_v10  ;;  %v8385_v10 = vld [vmem:[%s10332_s1 + $0x520] ss:$28 sps:$4 sm:$0xff]  }
 0x320   : > { %4156 = vmatprep.mubr.bf16.mxu0 %v8427_v35  ;;  %5288 = vmatprep.mubr.bf16.mxu1 %v8427_v35 }
 0x327   : > { %6957 = vmatmul.mubr.msk.bf16.gmra.mrb[4].mxu0 %vm3189_vm0, %v8363_v11  ;;  %6982 = vmatmul.mubr.msk.bf16.gmra.mrb[4].mxu1 %vm3189_vm0, %v8363_v11  ;;  %v10095_v11 = vpop.permute.xlu0 %1286 }
 0x328   : > { %4166 = vmatprep.mubr.bf16.mxu0 %v8427_v35  ;;  %5298 = vmatprep.mubr.bf16.mxu1 %v8427_v35  ;;  %10359 = vst [vmem:[#allocation11_spill] sm:$0xff] %v10095_v11 }
 0x32f   : > { %6958 = vmatmul.mubr.msk.bf16.gmra.mrb[8].mxu0 %vm3189_vm0, %v8364_v12  ;;  %6983 = vmatmul.mubr.msk.bf16.gmra.mrb[8].mxu1 %vm3189_vm0, %v8364_v12  ;;  %v10097_v12 = vpop.permute.xlu1 %1291 }
 0x330   : > { %4176 = vmatprep.mubr.bf16.mxu0 %v8427_v35  ;;  %5308 = vmatprep.mubr.bf16.mxu1 %v8427_v35  ;;  %10360 = vst [vmem:[#allocation12_spill] sm:$0xff] %v10097_v12 }
 0x337   : > { %6959 = vmatmul.mubr.msk.bf16.gmra.mrb[12].mxu0 %vm3189_vm0, %v8365_v13  ;;  %6984 = vmatmul.mubr.msk.bf16.gmra.mrb[12].mxu1 %vm3189_vm0, %v8365_v13  ;;  %v8386_v13 = vld [vmem:[%s10332_s1 + $0x558] ss:$28 sps:$4 sm:$0xff]  }
 0x338   : > { %4186 = vmatprep.mubr.bf16.mxu0 %v8427_v35  ;;  %5318 = vmatprep.mubr.bf16.mxu1 %v8427_v35 }
 0x33f   : > { %6960 = vmatmul.mubr.msk.bf16.gmra.mrb[16].mxu0 %vm3189_vm0, %v8366_v14  ;;  %6985 = vmatmul.mubr.msk.bf16.gmra.mrb[16].mxu1 %vm3189_vm0, %v8366_v14  ;;  %v10102_v14 = vpop.permute.xlu0 %1296 }
 0x340   : > { %4196 = vmatprep.mubr.bf16.mxu0 %v8427_v35  ;;  %5328 = vmatprep.mubr.bf16.mxu1 %v8427_v35  ;;  %10361 = vst [vmem:[#allocation13_spill] sm:$0xff] %v10102_v14 }
 0x347   : > { %6961 = vmatmul.mubr.msk.bf16.gmra.mrb[20].mxu0 %vm3189_vm0, %v8367_v15  ;;  %6986 = vmatmul.mubr.msk.bf16.gmra.mrb[20].mxu1 %vm3189_vm0, %v8367_v15  ;;  %v10104_v15 = vpop.permute.xlu1 %1301 }
 0x348   : > { %4206 = vmatprep.mubr.bf16.mxu0 %v8427_v35  ;;  %5338 = vmatprep.mubr.bf16.mxu1 %v8427_v35  ;;  %10362 = vst [vmem:[#allocation14_spill] sm:$0xff] %v10104_v15 }
 0x34f   : > { %6962 = vmatmul.mubr.msk.bf16.gmra.mrb[24].mxu0 %vm3189_vm0, %v8368_v16  ;;  %6987 = vmatmul.mubr.msk.bf16.gmra.mrb[24].mxu1 %vm3189_vm0, %v8368_v16  ;;  %v10108_v16 = vpop.permute.xlu0 %1306 }
 0x350   : > { %4216 = vmatprep.mubr.bf16.mxu0 %v8427_v35  ;;  %5348 = vmatprep.mubr.bf16.mxu1 %v8427_v35  ;;  %10363 = vst [vmem:[#allocation15_spill] sm:$0xff] %v10108_v16 }
 0x357   : > { %6963 = vmatmul.mubr.msk.bf16.gmra.mrb[28].mxu0 %vm3189_vm0, %v8369_v17  ;;  %6988 = vmatmul.mubr.msk.bf16.gmra.mrb[28].mxu1 %vm3189_vm0, %v8369_v17  ;;  %v10110_v17 = vpop.permute.xlu1 %1311 }
 0x358   : > { %4226 = vmatprep.mubr.bf16.mxu0 %v8427_v35  ;;  %5358 = vmatprep.mubr.bf16.mxu1 %v8427_v35  ;;  %10364 = vst [vmem:[#allocation16_spill] sm:$0xff] %v10110_v17 }
 0x35f   : > { %6964 = vmatmul.mubr.msk.bf16.gmra.mrb[32].mxu0 %vm3189_vm0, %v8370_v18  ;;  %6989 = vmatmul.mubr.msk.bf16.gmra.mrb[32].mxu1 %vm3189_vm0, %v8370_v18  ;;  %v10114_v18 = vpop.permute.xlu1 %1321 }
 0x360   : > { %4236 = vmatprep.mubr.bf16.mxu0 %v8427_v35  ;;  %5368 = vmatprep.mubr.bf16.mxu1 %v8427_v35  ;;  %10366 = vst [vmem:[#allocation18_spill] sm:$0xff] %v10114_v18 }
 0x367   : > { %6965 = vmatmul.mubr.msk.bf16.gmra.mrb[36].mxu0 %vm3189_vm0, %v8371_v19  ;;  %6990 = vmatmul.mubr.msk.bf16.gmra.mrb[36].mxu1 %vm3189_vm0, %v8371_v19 }
 0x368   : > { %4246 = vmatprep.mubr.bf16.mxu0 %v8427_v35  ;;  %5378 = vmatprep.mubr.bf16.mxu1 %v8427_v35 }
 0x36f   : > { %6966 = vmatmul.mubr.msk.bf16.gmra.mrb[40].mxu0 %vm3189_vm0, %v8372_v21  ;;  %6991 = vmatmul.mubr.msk.bf16.gmra.mrb[40].mxu1 %vm3189_vm0, %v8372_v21  ;;  %v5787_v21 = vpop.permute.xlu1 %5786 }
 0x370   : > { %4256 = vmatprep.mubr.bf16.mxu0 %v8427_v35  ;;  %5388 = vmatprep.mubr.bf16.mxu1 %v8427_v35 }
 0x373   : > { %v5797_v12 = vpop.permute.xlu1 %5796 }
 0x377   : > { %6967 = vmatmul.mubr.msk.bf16.gmra.mrb[44].mxu0 %vm3189_vm0, %v8373_v26  ;;  %6992 = vmatmul.mubr.msk.bf16.gmra.mrb[44].mxu1 %vm3189_vm0, %v8373_v26 }
 0x378   : > { %4266 = vmatprep.mubr.bf16.mxu0 %v8427_v35  ;;  %5398 = vmatprep.mubr.bf16.mxu1 %v8427_v35 }
 0x37f   : > { %6968 = vmatmul.mubr.msk.bf16.gmra.mrb[48].mxu0 %vm3189_vm0, %v8374_v29  ;;  %6993 = vmatmul.mubr.msk.bf16.gmra.mrb[48].mxu1 %vm3189_vm0, %v8374_v29 }
 0x380   : > { %4276 = vmatprep.mubr.bf16.mxu0 %v8427_v35  ;;  %5408 = vmatprep.mubr.bf16.mxu1 %v8427_v35 }
 0x387   : > { %6969 = vmatmul.mubr.msk.bf16.gmra.mrb[52].mxu0 %vm3189_vm0, %v8375_v32  ;;  %6994 = vmatmul.mubr.msk.bf16.gmra.mrb[52].mxu1 %vm3189_vm0, %v8375_v32 }
 0x388   : > { %4286 = vmatprep.mubr.bf16.mxu0 %v8427_v35  ;;  %5418 = vmatprep.mubr.bf16.mxu1 %v8427_v35 }
 0x38f   : > { %6970 = vmatmul.mubr.msk.bf16.gmra.mrb[56].mxu0 %vm3189_vm0, %v8376_v38  ;;  %6995 = vmatmul.mubr.msk.bf16.gmra.mrb[56].mxu1 %vm3189_vm0, %v8376_v38 }
 0x390   : > { %4296 = vmatprep.mubr.bf16.mxu0 %v8427_v35  ;;  %5428 = vmatprep.mubr.bf16.mxu1 %v8427_v35 }
 0x397   : > { %6971 = vmatmul.mubr.msk.bf16.gmra.mrb[60].mxu0 %vm3189_vm0, %v8377_v41  ;;  %6996 = vmatmul.mubr.msk.bf16.gmra.mrb[60].mxu1 %vm3189_vm0, %v8377_v41 }
 0x398   : > { %4306 = vmatprep.mubr.bf16.mxu0 %v8427_v35  ;;  %5438 = vmatprep.mubr.bf16.mxu1 %v8427_v35 }
 0x39f   : > { %6972 = vmatmul.mubr.msk.bf16.gmra.mrb[64].mxu0 %vm3189_vm0, %v8378_v44  ;;  %6997 = vmatmul.mubr.msk.bf16.gmra.mrb[64].mxu1 %vm3189_vm0, %v8378_v44 }
 0x3a0   : > { %4316 = vmatprep.mubr.bf16.mxu0 %v8427_v35  ;;  %5448 = vmatprep.mubr.bf16.mxu1 %v8427_v35 }
 0x3a7   : > { %6973 = vmatmul.mubr.msk.bf16.gmra.mrb[68].mxu0 %vm3189_vm0, %v8379_v49  ;;  %6998 = vmatmul.mubr.msk.bf16.gmra.mrb[68].mxu1 %vm3189_vm0, %v8379_v49 }
 0x3a8   : > { %4326 = vmatprep.mubr.bf16.mxu0 %v8427_v35  ;;  %5458 = vmatprep.mubr.bf16.mxu1 %v8427_v35 }
 0x3af   : > { %6974 = vmatmul.mubr.msk.bf16.gmra.mrb[72].mxu0 %vm3189_vm0, %v8380_v52  ;;  %6999 = vmatmul.mubr.msk.bf16.gmra.mrb[72].mxu1 %vm3189_vm0, %v8380_v52 }
 0x3b0   : > { %4336 = vmatprep.mubr.bf16.mxu0 %v8427_v35  ;;  %5468 = vmatprep.mubr.bf16.mxu1 %v8427_v35 }
 0x3b7   : > { %6975 = vmatmul.mubr.msk.bf16.gmra.mrb[76].mxu0 %vm3189_vm0, %v8381_v55  ;;  %7000 = vmatmul.mubr.msk.bf16.gmra.mrb[76].mxu1 %vm3189_vm0, %v8381_v55 }
 0x3b8   : > { %4346 = vmatprep.mubr.bf16.mxu0 %v8427_v35  ;;  %5478 = vmatprep.mubr.bf16.mxu1 %v8427_v35 }
 0x3bf   : > { %6976 = vmatmul.mubr.msk.bf16.gmra.mrb[80].mxu0 %vm3189_vm0, %v8382_v61  ;;  %7001 = vmatmul.mubr.msk.bf16.gmra.mrb[80].mxu1 %vm3189_vm0, %v8382_v61 }
 0x3c0   : > { %4356 = vmatprep.mubr.bf16.mxu0 %v8427_v35  ;;  %5488 = vmatprep.mubr.bf16.mxu1 %v8427_v35 }
 0x3c7   : > { %6977 = vmatmul.mubr.msk.bf16.gmra.mrb[84].mxu0 %vm3189_vm0, %v8383_v0  ;;  %7002 = vmatmul.mubr.msk.bf16.gmra.mrb[84].mxu1 %vm3189_vm0, %v8383_v0 }
 0x3c8   : > { %4366 = vmatprep.mubr.bf16.mxu0 %v8427_v35  ;;  %5498 = vmatprep.mubr.bf16.mxu1 %v8427_v35 }
 0x3cf   : > { %6978 = vmatmul.mubr.msk.bf16.gmra.mrb[88].mxu0 %vm3189_vm0, %v8384_v5  ;;  %7003 = vmatmul.mubr.msk.bf16.gmra.mrb[88].mxu1 %vm3189_vm0, %v8384_v5 }
 0x3d0   : > { %4376 = vmatprep.mubr.bf16.mxu0 %v8427_v35  ;;  %5508 = vmatprep.mubr.bf16.mxu1 %v8427_v35 }
 0x3d7   : > { %6979 = vmatmul.mubr.msk.bf16.gmra.mrb[92].mxu0 %vm3189_vm0, %v8385_v10  ;;  %7004 = vmatmul.mubr.msk.bf16.gmra.mrb[92].mxu1 %vm3189_vm0, %v8385_v10 }
 0x3d8   : > { %4386 = vmatprep.mubr.bf16.mxu0 %v8427_v35  ;;  %5518 = vmatprep.mubr.bf16.mxu1 %v8427_v35  ;;  %v10112_v35 = vpop.permute.xlu0 %1316 }
 0x3d9   : > { %10365 = vst [vmem:[#allocation17_spill] sm:$0xff] %v10112_v35 }
 0x3dc   : > { %v5782_v19 = vpop.permute.xlu0 %5781 }
 0x3df   : > { %6980 = vmatmul.mubr.msk.bf16.gmra.mrb[96].mxu0 %vm3189_vm0, %v8386_v13  ;;  %7005 = vmatmul.mubr.msk.bf16.gmra.mrb[96].mxu1 %vm3189_vm0, %v8386_v13 }
 0x3f2   : > { %v4148_v26 = vpop.f32.mrb[0].mxu0  ;;  %v5280_v29 = vpop.f32.mrb[0].mxu1 }
 0x3f3   : > { %v7013_v32 = vadd.f32 %v4148_v26, %v9815_v60  ;;  %v7113_v38 = vadd.f32 %v5280_v29, %v9815_v60  ;;  %v4150_v41 = vpop.f32.mrb[1].mxu0  ;;  %v5282_v44 = vpop.f32.mrb[1].mxu1 }
 0x3f4   : > { %v7014_v49 = vadd.f32 %v4150_v41, %v9815_v60  ;;  %v7114_v52 = vadd.f32 %v5282_v44, %v9815_v60  ;;  %v4152_v55 = vpop.f32.mrb[2].mxu0  ;;  %v5284_v61 = vpop.f32.mrb[2].mxu1 }
 0x3f5   : > { %v5529_v0 = vmax.f32 %v7013_v32, 0.0  ;;  %v5531_v5 = vmax.f32 %v7113_v38, 0.0  ;;  %v7015_v10 = vadd.f32 %v4152_v55, %v9826_v1  ;;  %v7115_v13 = vadd.f32 %v5284_v61, %v9826_v1  ;;  %v4154_v18 = vpop.f32.mrb[3].mxu0  ;;  %v5286_v35 = vpop.f32.mrb[3].mxu1 }
 0x3f6   : > { %v5530_v17 = vmax.f32 %v7014_v49, 0.0  ;;  %v5532_v26 = vmax.f32 %v7114_v52, 0.0  ;;  %v7016_v29 = vadd.f32 %v4154_v18, %v9826_v1  ;;  %v7116_v16 = vadd.f32 %v5286_v35, %v9826_v1  ;;  %v5792_v44 = vpop.permute.xlu0 %5791 }
 0x3f7   : > { %v5533_v15 = vmax.f32 %v7015_v10, 0.0  ;;  %v5535_v41 = vmax.f32 %v7115_v13, 0.0  ;;  %v6029_v32 = vmul.f32 %v5782_v19, %v5529_v0  ;;  %v6031_v38 = vmul.f32 %v5782_v19, %v5531_v5 }
 0x3f8   : > { %v5534_v14 = vmax.f32 %v7016_v29, 0.0  ;;  %v5536_v60 = vmax.f32 %v7116_v16, 0.0  ;;  %v6030_v9 = vmul.f32 %v5782_v19, %v5530_v17  ;;  %v6032_v61 = vmul.f32 %v5782_v19, %v5532_v26 }
 0x3f9   : > { %v6033_v11 = vmul.f32 %v5787_v21, %v5533_v15  ;;  %v6035_v55 = vmul.f32 %v5787_v21, %v5535_v41 }
 0x3fa   : > { %v6034_v8 = vmul.f32 %v5787_v21, %v5534_v14  ;;  %v6036_v7 = vmul.f32 %v5787_v21, %v5536_v60  ;;  %v4158_v49 = vpop.f32.mrb[4].mxu0  ;;  %v5290_v52 = vpop.f32.mrb[4].mxu1 }
 0x3fb   : > { %v6229_v6 = vadd.f32 %v6033_v11, %v6029_v32  ;;  %v6339_v18 = vadd.f32 %v6035_v55, %v6031_v38  ;;  %v7017_v1 = vadd.f32 %v4158_v49, %v9828_v2  ;;  %v7117_v35 = vadd.f32 %v5290_v52, %v9828_v2  ;;  %v4160_v10 = vpop.f32.mrb[5].mxu0  ;;  %v5292_v16 = vpop.f32.mrb[5].mxu1 }
 0x3fc   : > { %v6284_v13 = vadd.f32 %v6034_v8, %v6030_v9  ;;  %v6394_v29 = vadd.f32 %v6036_v7, %v6032_v61  ;;  %v7018_v0 = vadd.f32 %v4160_v10, %v9828_v2  ;;  %v7118_v15 = vadd.f32 %v5292_v16, %v9828_v2  ;;  %v4162_v17 = vpop.f32.mrb[6].mxu0  ;;  %v5294_v19 = vpop.f32.mrb[6].mxu1 }
 0x3fd   : > { %v5537_v14 = vmax.f32 %v7017_v1, 0.0  ;;  %v5539_v21 = vmax.f32 %v7117_v35, 0.0  ;;  %v7019_v5 = vadd.f32 %v4162_v17, %v9919_v20  ;;  %v7119_v11 = vadd.f32 %v5294_v19, %v9919_v20  ;;  %v4164_v26 = vpop.f32.mrb[7].mxu0  ;;  %v5296_v41 = vpop.f32.mrb[7].mxu1 }
 0x3fe   : > { %v5538_v60 = vmax.f32 %v7018_v0, 0.0  ;;  %v5540_v32 = vmax.f32 %v7118_v15, 0.0  ;;  %v7020_v38 = vadd.f32 %v4164_v26, %v9919_v20  ;;  %v7120_v7 = vadd.f32 %v5296_v41, %v9919_v20  ;;  %v5802_v35 = vpop.permute.xlu0 %5801  ;;  %v5807_v10 = vpop.permute.xlu1 %5806 }
 0x3ff   : > { %v6037_v8 = vmul.f32 %v5792_v44, %v5537_v14  ;;  %v6039_v9 = vmul.f32 %v5792_v44, %v5539_v21  ;;  %v5541_v55 = vmax.f32 %v7019_v5, 0.0  ;;  %v5543_v2 = vmax.f32 %v7119_v11, 0.0 }
 0x400   : > { %v6038_v61 = vmul.f32 %v5792_v44, %v5538_v60  ;;  %v6040_v49 = vmul.f32 %v5792_v44, %v5540_v32  ;;  %v5542_v52 = vmax.f32 %v7020_v38, 0.0  ;;  %v5544_v1 = vmax.f32 %v7120_v7, 0.0 }
 0x401   : > { %v6230_v16 = vadd.f32 %v6229_v6, %v6037_v8  ;;  %v6340_v17 = vadd.f32 %v6339_v18, %v6039_v9  ;;  %v6041_v19 = vmul.f32 %v5797_v12, %v5541_v55  ;;  %v6043_v4 = vmul.f32 %v5797_v12, %v5543_v2 }
 0x402   : > { %v6285_v0 = vadd.f32 %v6284_v13, %v6038_v61  ;;  %v6395_v15 = vadd.f32 %v6394_v29, %v6040_v49  ;;  %v6042_v3 = vmul.f32 %v5797_v12, %v5542_v52  ;;  %v6044_v26 = vmul.f32 %v5797_v12, %v5544_v1  ;;  %v4168_v63 = vpop.f32.mrb[8].mxu0  ;;  %v5300_v20 = vpop.f32.mrb[8].mxu1 }
 0x403   : > { %v6231_v14 = vadd.f32 %v6230_v16, %v6041_v19  ;;  %v6341_v21 = vadd.f32 %v6340_v17, %v6043_v4  ;;  %v7021_v5 = vadd.f32 %v4168_v63, %v9928_v22  ;;  %v7121_v44 = vadd.f32 %v5300_v20, %v9928_v22  ;;  %v4170_v11 = vpop.f32.mrb[9].mxu0  ;;  %v5302_v41 = vpop.f32.mrb[9].mxu1 }
 0x404   : > { %v6286_v60 = vadd.f32 %v6285_v0, %v6042_v3  ;;  %v6396_v32 = vadd.f32 %v6395_v15, %v6044_v26  ;;  %v7022_v6 = vadd.f32 %v4170_v11, %v9928_v22  ;;  %v7122_v18 = vadd.f32 %v5302_v41, %v9928_v22  ;;  %v4172_v13 = vpop.f32.mrb[10].mxu0  ;;  %v5304_v29 = vpop.f32.mrb[10].mxu1 }
 0x405   : > { %v5545_v38 = vmax.f32 %v7021_v5, 0.0  ;;  %v5547_v12 = vmax.f32 %v7121_v44, 0.0  ;;  %v7023_v7 = vadd.f32 %v4172_v13, %v9930_v23  ;;  %v7123_v4 = vadd.f32 %v5304_v29, %v9930_v23  ;;  %v4174_v8 = vpop.f32.mrb[11].mxu0  ;;  %v5306_v63 = vpop.f32.mrb[11].mxu1 }
 0x406   : > { %v5546_v9 = vmax.f32 %v7022_v6, 0.0  ;;  %v5548_v55 = vmax.f32 %v7122_v18, 0.0  ;;  %v7024_v2 = vadd.f32 %v4174_v8, %v9930_v23  ;;  %v7124_v3 = vadd.f32 %v5306_v63, %v9930_v23  ;;  %v5812_v0 = vpop.permute.xlu0 %5811  ;;  %v5817_v15 = vpop.permute.xlu1 %5816 }
 0x407   : > { %v6045_v61 = vmul.f32 %v5802_v35, %v5545_v38  ;;  %v6047_v49 = vmul.f32 %v5802_v35, %v5547_v12  ;;  %v5549_v52 = vmax.f32 %v7023_v7, 0.0  ;;  %v5551_v22 = vmax.f32 %v7123_v4, 0.0 }
 0x408   : > { %v6046_v1 = vmul.f32 %v5802_v35, %v5546_v9  ;;  %v6048_v16 = vmul.f32 %v5802_v35, %v5548_v55  ;;  %v5550_v17 = vmax.f32 %v7024_v2, 0.0  ;;  %v5552_v19 = vmax.f32 %v7124_v3, 0.0 }
 0x409   : > { %v6232_v26 = vadd.f32 %v6231_v14, %v6045_v61  ;;  %v6342_v20 = vadd.f32 %v6341_v21, %v6047_v49  ;;  %v6049_v5 = vmul.f32 %v5807_v10, %v5549_v52  ;;  %v6051_v44 = vmul.f32 %v5807_v10, %v5551_v22 }
 0x40a   : > { %v6287_v11 = vadd.f32 %v6286_v60, %v6046_v1  ;;  %v6397_v41 = vadd.f32 %v6396_v32, %v6048_v16  ;;  %v6050_v6 = vmul.f32 %v5807_v10, %v5550_v17  ;;  %v6052_v18 = vmul.f32 %v5807_v10, %v5552_v19  ;;  %v4178_v13 = vpop.f32.mrb[12].mxu0  ;;  %v5310_v23 = vpop.f32.mrb[12].mxu1 }
 0x40b   : > { %v6233_v29 = vadd.f32 %v6232_v26, %v6049_v5  ;;  %v6343_v38 = vadd.f32 %v6342_v20, %v6051_v44  ;;  %v7025_v12 = vadd.f32 %v4178_v13, %v9936_v24  ;;  %v7125_v35 = vadd.f32 %v5310_v23, %v9936_v24  ;;  %v4180_v7 = vpop.f32.mrb[13].mxu0  ;;  %v5312_v4 = vpop.f32.mrb[13].mxu1 }
 0x40c   : > { %v6288_v8 = vadd.f32 %v6287_v11, %v6050_v6  ;;  %v6398_v63 = vadd.f32 %v6397_v41, %v6052_v18  ;;  %v7026_v14 = vadd.f32 %v4180_v7, %v9936_v24  ;;  %v7126_v21 = vadd.f32 %v5312_v4, %v9936_v24  ;;  %v4182_v60 = vpop.f32.mrb[14].mxu0  ;;  %v5314_v32 = vpop.f32.mrb[14].mxu1 }
 0x40d   : > { %v5553_v9 = vmax.f32 %v7025_v12, 0.0  ;;  %v5555_v10 = vmax.f32 %v7125_v35, 0.0  ;;  %v7027_v55 = vadd.f32 %v4182_v60, %v9938_v25  ;;  %v7127_v2 = vadd.f32 %v5314_v32, %v9938_v25  ;;  %v4184_v3 = vpop.f32.mrb[15].mxu0  ;;  %v5316_v61 = vpop.f32.mrb[15].mxu1 }
 0x40e   : > { %v5554_v49 = vmax.f32 %v7026_v14, 0.0  ;;  %v5556_v52 = vmax.f32 %v7126_v21, 0.0  ;;  %v7028_v22 = vadd.f32 %v4184_v3, %v9938_v25  ;;  %v7128_v1 = vadd.f32 %v5316_v61, %v9938_v25  ;;  %v5822_v11 = vpop.permute.xlu0 %5821  ;;  %v5827_v41 = vpop.permute.xlu1 %5826 }
 0x40f   : > { %v6053_v16 = vmul.f32 %v5812_v0, %v5553_v9  ;;  %v6055_v17 = vmul.f32 %v5812_v0, %v5555_v10  ;;  %v5557_v19 = vmax.f32 %v7027_v55, 0.0  ;;  %v5559_v24 = vmax.f32 %v7127_v2, 0.0 }
 0x410   : > { %v6054_v26 = vmul.f32 %v5812_v0, %v5554_v49  ;;  %v6056_v20 = vmul.f32 %v5812_v0, %v5556_v52  ;;  %v5558_v5 = vmax.f32 %v7028_v22, 0.0  ;;  %v5560_v44 = vmax.f32 %v7128_v1, 0.0 }
 0x411   : > { %v6234_v6 = vadd.f32 %v6233_v29, %v6053_v16  ;;  %v6344_v18 = vadd.f32 %v6343_v38, %v6055_v17  ;;  %v6057_v13 = vmul.f32 %v5817_v15, %v5557_v19  ;;  %v6059_v23 = vmul.f32 %v5817_v15, %v5559_v24 }
 0x412   : > { %v6289_v12 = vadd.f32 %v6288_v8, %v6054_v26  ;;  %v6399_v35 = vadd.f32 %v6398_v63, %v6056_v20  ;;  %v6058_v7 = vmul.f32 %v5817_v15, %v5558_v5  ;;  %v6060_v4 = vmul.f32 %v5817_v15, %v5560_v44  ;;  %v4188_v14 = vpop.f32.mrb[16].mxu0  ;;  %v5320_v25 = vpop.f32.mrb[16].mxu1 }
 0x413   : > { %v6235_v21 = vadd.f32 %v6234_v6, %v6057_v13  ;;  %v6345_v60 = vadd.f32 %v6344_v18, %v6059_v23  ;;  %v7029_v32 = vadd.f32 %v4188_v14, %v9947_v27  ;;  %v7129_v0 = vadd.f32 %v5320_v25, %v9947_v27  ;;  %v4190_v9 = vpop.f32.mrb[17].mxu0  ;;  %v5322_v10 = vpop.f32.mrb[17].mxu1 }
 0x414   : > { %v6290_v55 = vadd.f32 %v6289_v12, %v6058_v7  ;;  %v6400_v2 = vadd.f32 %v6399_v35, %v6060_v4  ;;  %v7030_v29 = vadd.f32 %v4190_v9, %v9947_v27  ;;  %v7130_v38 = vadd.f32 %v5322_v10, %v9947_v27  ;;  %v4192_v8 = vpop.f32.mrb[18].mxu0  ;;  %v5324_v63 = vpop.f32.mrb[18].mxu1 }
 0x415   : > { %v5561_v3 = vmax.f32 %v7029_v32, 0.0  ;;  %v5563_v15 = vmax.f32 %v7129_v0, 0.0  ;;  %v7031_v61 = vadd.f32 %v4192_v8, %v9949_v28  ;;  %v7131_v49 = vadd.f32 %v5324_v63, %v9949_v28  ;;  %v4194_v52 = vpop.f32.mrb[19].mxu0  ;;  %v5326_v22 = vpop.f32.mrb[19].mxu1 }
 0x416   : > { %v5562_v1 = vmax.f32 %v7030_v29, 0.0  ;;  %v5564_v16 = vmax.f32 %v7130_v38, 0.0  ;;  %v7032_v17 = vadd.f32 %v4194_v52, %v9949_v28  ;;  %v7132_v19 = vadd.f32 %v5326_v22, %v9949_v28  ;;  %v5832_v13 = vpop.permute.xlu0 %5831  ;;  %v5837_v23 = vpop.permute.xlu1 %5836 }
 0x417   : > { %v6061_v24 = vmul.f32 %v5822_v11, %v5561_v3  ;;  %v6063_v26 = vmul.f32 %v5822_v11, %v5563_v15  ;;  %v5565_v20 = vmax.f32 %v7031_v61, 0.0  ;;  %v5567_v27 = vmax.f32 %v7131_v49, 0.0 }
 0x418   : > { %v6062_v5 = vmul.f32 %v5822_v11, %v5562_v1  ;;  %v6064_v44 = vmul.f32 %v5822_v11, %v5564_v16  ;;  %v5566_v6 = vmax.f32 %v7032_v17, 0.0  ;;  %v5568_v18 = vmax.f32 %v7132_v19, 0.0 }
 0x419   : > { %v6236_v12 = vadd.f32 %v6235_v21, %v6061_v24  ;;  %v6346_v35 = vadd.f32 %v6345_v60, %v6063_v26  ;;  %v6065_v7 = vmul.f32 %v5827_v41, %v5565_v20  ;;  %v6067_v4 = vmul.f32 %v5827_v41, %v5567_v27 }
 0x41a   : > { %v6291_v14 = vadd.f32 %v6290_v55, %v6062_v5  ;;  %v6401_v25 = vadd.f32 %v6400_v2, %v6064_v44  ;;  %v6066_v32 = vmul.f32 %v5827_v41, %v5566_v6  ;;  %v6068_v0 = vmul.f32 %v5827_v41, %v5568_v18  ;;  %v4198_v9 = vpop.f32.mrb[20].mxu0  ;;  %v5330_v28 = vpop.f32.mrb[20].mxu1 }
 0x41b   : > { %v6237_v10 = vadd.f32 %v6236_v12, %v6065_v7  ;;  %v6347_v29 = vadd.f32 %v6346_v35, %v6067_v4  ;;  %v7033_v38 = vadd.f32 %v4198_v9, %v9954_v30  ;;  %v7133_v11 = vadd.f32 %v5330_v28, %v9954_v30  ;;  %v4200_v8 = vpop.f32.mrb[21].mxu0  ;;  %v5332_v63 = vpop.f32.mrb[21].mxu1 }
 0x41c   : > { %v6292_v3 = vadd.f32 %v6291_v14, %v6066_v32  ;;  %v6402_v15 = vadd.f32 %v6401_v25, %v6068_v0  ;;  %v7034_v21 = vadd.f32 %v4200_v8, %v9954_v30  ;;  %v7134_v60 = vadd.f32 %v5332_v63, %v9954_v30  ;;  %v4202_v55 = vpop.f32.mrb[22].mxu0  ;;  %v5334_v2 = vpop.f32.mrb[22].mxu1 }
 0x41d   : > { %v5569_v61 = vmax.f32 %v7033_v38, 0.0  ;;  %v5571_v41 = vmax.f32 %v7133_v11, 0.0  ;;  %v7035_v49 = vadd.f32 %v4202_v55, %v9956_v31  ;;  %v7135_v52 = vadd.f32 %v5334_v2, %v9956_v31  ;;  %v4204_v22 = vpop.f32.mrb[23].mxu0  ;;  %v5336_v1 = vpop.f32.mrb[23].mxu1 }
 0x41e   : > { %v5570_v16 = vmax.f32 %v7034_v21, 0.0  ;;  %v5572_v17 = vmax.f32 %v7134_v60, 0.0  ;;  %v7036_v19 = vadd.f32 %v4204_v22, %v9956_v31  ;;  %v7136_v24 = vadd.f32 %v5336_v1, %v9956_v31  ;;  %v5842_v12 = vpop.permute.xlu0 %5841  ;;  %v5847_v35 = vpop.permute.xlu1 %5846 }
 0x41f   : > { %v6069_v26 = vmul.f32 %v5832_v13, %v5569_v61  ;;  %v6071_v20 = vmul.f32 %v5832_v13, %v5571_v41  ;;  %v5573_v27 = vmax.f32 %v7035_v49, 0.0  ;;  %v5575_v30 = vmax.f32 %v7135_v52, 0.0 }
 0x420   : > { %v6070_v5 = vmul.f32 %v5832_v13, %v5570_v16  ;;  %v6072_v44 = vmul.f32 %v5832_v13, %v5572_v17  ;;  %v5574_v6 = vmax.f32 %v7036_v19, 0.0  ;;  %v5576_v18 = vmax.f32 %v7136_v24, 0.0 }
 0x421   : > { %v6238_v7 = vadd.f32 %v6237_v10, %v6069_v26  ;;  %v6348_v4 = vadd.f32 %v6347_v29, %v6071_v20  ;;  %v6073_v14 = vmul.f32 %v5837_v23, %v5573_v27  ;;  %v6075_v25 = vmul.f32 %v5837_v23, %v5575_v30 }
 0x422   : > { %v6293_v32 = vadd.f32 %v6292_v3, %v6070_v5  ;;  %v6403_v0 = vadd.f32 %v6402_v15, %v6072_v44  ;;  %v6074_v9 = vmul.f32 %v5837_v23, %v5574_v6  ;;  %v6076_v28 = vmul.f32 %v5837_v23, %v5576_v18  ;;  %v4208_v38 = vpop.f32.mrb[24].mxu0  ;;  %v5340_v31 = vpop.f32.mrb[24].mxu1 }
 0x423   : > { %v6239_v11 = vadd.f32 %v6238_v7, %v6073_v14  ;;  %v6349_v8 = vadd.f32 %v6348_v4, %v6075_v25  ;;  %v7037_v63 = vadd.f32 %v4208_v38, %v9965_v33  ;;  %v7137_v13 = vadd.f32 %v5340_v31, %v9965_v33  ;;  %v4210_v21 = vpop.f32.mrb[25].mxu0  ;;  %v5342_v60 = vpop.f32.mrb[25].mxu1 }
 0x424   : > { %v6294_v55 = vadd.f32 %v6293_v32, %v6074_v9  ;;  %v6404_v2 = vadd.f32 %v6403_v0, %v6076_v28  ;;  %v7038_v10 = vadd.f32 %v4210_v21, %v9965_v33  ;;  %v7138_v29 = vadd.f32 %v5342_v60, %v9965_v33  ;;  %v4212_v3 = vpop.f32.mrb[26].mxu0  ;;  %v5344_v15 = vpop.f32.mrb[26].mxu1 }
 0x425   : > { %v5577_v61 = vmax.f32 %v7037_v63, 0.0  ;;  %v5579_v23 = vmax.f32 %v7137_v13, 0.0  ;;  %v7039_v41 = vadd.f32 %v4212_v3, %v9967_v34  ;;  %v7139_v49 = vadd.f32 %v5344_v15, %v9967_v34  ;;  %v4214_v52 = vpop.f32.mrb[27].mxu0  ;;  %v5346_v22 = vpop.f32.mrb[27].mxu1 }
 0x426   : > { %v5578_v1 = vmax.f32 %v7038_v10, 0.0  ;;  %v5580_v16 = vmax.f32 %v7138_v29, 0.0  ;;  %v7040_v17 = vadd.f32 %v4214_v52, %v9967_v34  ;;  %v7140_v19 = vadd.f32 %v5346_v22, %v9967_v34  ;;  %v5852_v6 = vpop.permute.xlu0 %5851  ;;  %v5857_v18 = vpop.permute.xlu1 %5856 }
 0x427   : > { %v6077_v24 = vmul.f32 %v5842_v12, %v5577_v61  ;;  %v6079_v26 = vmul.f32 %v5842_v12, %v5579_v23  ;;  %v5581_v20 = vmax.f32 %v7039_v41, 0.0  ;;  %v5583_v33 = vmax.f32 %v7139_v49, 0.0 }
 0x428   : > { %v6078_v27 = vmul.f32 %v5842_v12, %v5578_v1  ;;  %v6080_v30 = vmul.f32 %v5842_v12, %v5580_v16  ;;  %v5582_v5 = vmax.f32 %v7040_v17, 0.0  ;;  %v5584_v44 = vmax.f32 %v7140_v19, 0.0 }
 0x429   : > { %v6240_v7 = vadd.f32 %v6239_v11, %v6077_v24  ;;  %v6350_v4 = vadd.f32 %v6349_v8, %v6079_v26  ;;  %v6081_v14 = vmul.f32 %v5847_v35, %v5581_v20  ;;  %v6083_v25 = vmul.f32 %v5847_v35, %v5583_v33 }
 0x42a   : > { %v6295_v32 = vadd.f32 %v6294_v55, %v6078_v27  ;;  %v6405_v0 = vadd.f32 %v6404_v2, %v6080_v30  ;;  %v6082_v9 = vmul.f32 %v5847_v35, %v5582_v5  ;;  %v6084_v28 = vmul.f32 %v5847_v35, %v5584_v44  ;;  %v4218_v38 = vpop.f32.mrb[28].mxu0  ;;  %v5350_v34 = vpop.f32.mrb[28].mxu1 }
 0x42b   : > { %v6241_v31 = vadd.f32 %v6240_v7, %v6081_v14  ;;  %v6351_v63 = vadd.f32 %v6350_v4, %v6083_v25  ;;  %v7041_v13 = vadd.f32 %v4218_v38, %v9973_v36  ;;  %v7141_v12 = vadd.f32 %v5350_v34, %v9973_v36  ;;  %v4220_v21 = vpop.f32.mrb[29].mxu0  ;;  %v5352_v60 = vpop.f32.mrb[29].mxu1 }
 0x42c   : > { %v6296_v10 = vadd.f32 %v6295_v32, %v6082_v9  ;;  %v6406_v29 = vadd.f32 %v6405_v0, %v6084_v28  ;;  %v7042_v11 = vadd.f32 %v4220_v21, %v9973_v36  ;;  %v7142_v8 = vadd.f32 %v5352_v60, %v9973_v36  ;;  %v4222_v55 = vpop.f32.mrb[30].mxu0  ;;  %v5354_v2 = vpop.f32.mrb[30].mxu1 }
 0x42d   : > { %v5585_v3 = vmax.f32 %v7041_v13, 0.0  ;;  %v5587_v35 = vmax.f32 %v7141_v12, 0.0  ;;  %v7043_v15 = vadd.f32 %v4222_v55, %v9975_v37  ;;  %v7143_v61 = vadd.f32 %v5354_v2, %v9975_v37  ;;  %v4224_v23 = vpop.f32.mrb[31].mxu0  ;;  %v5356_v41 = vpop.f32.mrb[31].mxu1 }
 0x42e   : > { %v5586_v49 = vmax.f32 %v7042_v11, 0.0  ;;  %v5588_v52 = vmax.f32 %v7142_v8, 0.0  ;;  %v7044_v22 = vadd.f32 %v4224_v23, %v9975_v37  ;;  %v7144_v1 = vadd.f32 %v5356_v41, %v9975_v37  ;;  %v5862_v27 = vpop.permute.xlu0 %5861  ;;  %v5867_v30 = vpop.permute.xlu1 %5866 }
 0x42f   : > { %v6085_v16 = vmul.f32 %v5852_v6, %v5585_v3  ;;  %v6087_v17 = vmul.f32 %v5852_v6, %v5587_v35  ;;  %v5589_v19 = vmax.f32 %v7043_v15, 0.0  ;;  %v5591_v36 = vmax.f32 %v7143_v61, 0.0 }
 0x430   : > { %v6086_v24 = vmul.f32 %v5852_v6, %v5586_v49  ;;  %v6088_v26 = vmul.f32 %v5852_v6, %v5588_v52  ;;  %v5590_v20 = vmax.f32 %v7044_v22, 0.0  ;;  %v5592_v33 = vmax.f32 %v7144_v1, 0.0 }
 0x431   : > { %v6242_v5 = vadd.f32 %v6241_v31, %v6085_v16  ;;  %v6352_v44 = vadd.f32 %v6351_v63, %v6087_v17  ;;  %v6089_v7 = vmul.f32 %v5857_v18, %v5589_v19  ;;  %v6091_v4 = vmul.f32 %v5857_v18, %v5591_v36 }
 0x432   : > { %v6297_v14 = vadd.f32 %v6296_v10, %v6086_v24  ;;  %v6407_v25 = vadd.f32 %v6406_v29, %v6088_v26  ;;  %v6090_v32 = vmul.f32 %v5857_v18, %v5590_v20  ;;  %v6092_v0 = vmul.f32 %v5857_v18, %v5592_v33  ;;  %v4228_v9 = vpop.f32.mrb[32].mxu0  ;;  %v5360_v37 = vpop.f32.mrb[32].mxu1 }
 0x433   : > { %v6243_v28 = vadd.f32 %v6242_v5, %v6089_v7  ;;  %v6353_v38 = vadd.f32 %v6352_v44, %v6091_v4  ;;  %v7045_v34 = vadd.f32 %v4228_v9, %v9984_v39  ;;  %v7145_v6 = vadd.f32 %v5360_v37, %v9984_v39  ;;  %v4230_v13 = vpop.f32.mrb[33].mxu0  ;;  %v5362_v12 = vpop.f32.mrb[33].mxu1 }
 0x434   : > { %v6298_v21 = vadd.f32 %v6297_v14, %v6090_v32  ;;  %v6408_v60 = vadd.f32 %v6407_v25, %v6092_v0  ;;  %v7046_v31 = vadd.f32 %v4230_v13, %v9984_v39  ;;  %v7146_v63 = vadd.f32 %v5362_v12, %v9984_v39  ;;  %v4232_v10 = vpop.f32.mrb[34].mxu0  ;;  %v5364_v29 = vpop.f32.mrb[34].mxu1 }
 0x435   : > { %v5593_v11 = vmax.f32 %v7045_v34, 0.0  ;;  %v5595_v18 = vmax.f32 %v7145_v6, 0.0  ;;  %v7047_v8 = vadd.f32 %v4232_v10, %v9986_v40  ;;  %v7147_v55 = vadd.f32 %v5364_v29, %v9986_v40  ;;  %v4234_v2 = vpop.f32.mrb[35].mxu0  ;;  %v5366_v3 = vpop.f32.mrb[35].mxu1 }
 0x436   : > { %v5594_v35 = vmax.f32 %v7046_v31, 0.0  ;;  %v5596_v15 = vmax.f32 %v7146_v63, 0.0  ;;  %v7048_v61 = vadd.f32 %v4234_v2, %v9986_v40  ;;  %v7148_v23 = vadd.f32 %v5366_v3, %v9986_v40  ;;  %v5872_v19 = vpop.permute.xlu0 %5871  ;;  %v5877_v36 = vpop.permute.xlu1 %5876 }
 0x437   : > { %v6093_v41 = vmul.f32 %v5862_v27, %v5593_v11  ;;  %v6095_v49 = vmul.f32 %v5862_v27, %v5595_v18  ;;  %v5597_v52 = vmax.f32 %v7047_v8, 0.0  ;;  %v5599_v39 = vmax.f32 %v7147_v55, 0.0 }
 0x438   : > { %v6094_v22 = vmul.f32 %v5862_v27, %v5594_v35  ;;  %v6096_v1 = vmul.f32 %v5862_v27, %v5596_v15  ;;  %v5598_v16 = vmax.f32 %v7048_v61, 0.0  ;;  %v5600_v17 = vmax.f32 %v7148_v23, 0.0 }
 0x439   : > { %v6244_v24 = vadd.f32 %v6243_v28, %v6093_v41  ;;  %v6354_v26 = vadd.f32 %v6353_v38, %v6095_v49  ;;  %v6097_v20 = vmul.f32 %v5867_v30, %v5597_v52  ;;  %v6099_v33 = vmul.f32 %v5867_v30, %v5599_v39 }
 0x43a   : > { %v6299_v5 = vadd.f32 %v6298_v21, %v6094_v22  ;;  %v6409_v44 = vadd.f32 %v6408_v60, %v6096_v1  ;;  %v6098_v7 = vmul.f32 %v5867_v30, %v5598_v16  ;;  %v6100_v4 = vmul.f32 %v5867_v30, %v5600_v17  ;;  %v4238_v14 = vpop.f32.mrb[36].mxu0  ;;  %v5370_v40 = vpop.f32.mrb[36].mxu1 }
 0x43b   : > { %v6245_v25 = vadd.f32 %v6244_v24, %v6097_v20  ;;  %v6355_v32 = vadd.f32 %v6354_v26, %v6099_v33  ;;  %v7049_v0 = vadd.f32 %v4238_v14, %v9991_v42  ;;  %v7149_v27 = vadd.f32 %v5370_v40, %v9991_v42  ;;  %v4240_v9 = vpop.f32.mrb[37].mxu0  ;;  %v5372_v37 = vpop.f32.mrb[37].mxu1 }
 0x43c   : > { %v6300_v34 = vadd.f32 %v6299_v5, %v6098_v7  ;;  %v6410_v6 = vadd.f32 %v6409_v44, %v6100_v4  ;;  %v7050_v28 = vadd.f32 %v4240_v9, %v9991_v42  ;;  %v7150_v38 = vadd.f32 %v5372_v37, %v9991_v42  ;;  %v4242_v13 = vpop.f32.mrb[38].mxu0  ;;  %v5374_v12 = vpop.f32.mrb[38].mxu1 }
 0x43d   : > { %v5601_v21 = vmax.f32 %v7049_v0, 0.0  ;;  %v5603_v30 = vmax.f32 %v7149_v27, 0.0  ;;  %v7051_v60 = vadd.f32 %v4242_v13, %v9993_v43  ;;  %v7151_v31 = vadd.f32 %v5374_v12, %v9993_v43  ;;  %v4244_v63 = vpop.f32.mrb[39].mxu0  ;;  %v5376_v10 = vpop.f32.mrb[39].mxu1 }
 0x43e   : > { %v5602_v29 = vmax.f32 %v7050_v28, 0.0  ;;  %v5604_v11 = vmax.f32 %v7150_v38, 0.0  ;;  %v7052_v18 = vadd.f32 %v4244_v63, %v9993_v43  ;;  %v7152_v8 = vadd.f32 %v5376_v10, %v9993_v43  ;;  %v5882_v41 = vpop.permute.xlu0 %5881  ;;  %v5887_v49 = vpop.permute.xlu1 %5886 }
 0x43f   : > { %v6101_v55 = vmul.f32 %v5872_v19, %v5601_v21  ;;  %v6103_v2 = vmul.f32 %v5872_v19, %v5603_v30  ;;  %v5605_v3 = vmax.f32 %v7051_v60, 0.0  ;;  %v5607_v42 = vmax.f32 %v7151_v31, 0.0 }
 0x440   : > { %v6102_v35 = vmul.f32 %v5872_v19, %v5602_v29  ;;  %v6104_v15 = vmul.f32 %v5872_v19, %v5604_v11  ;;  %v5606_v61 = vmax.f32 %v7052_v18, 0.0  ;;  %v5608_v23 = vmax.f32 %v7152_v8, 0.0 }
 0x441   : > { %v6246_v52 = vadd.f32 %v6245_v25, %v6101_v55  ;;  %v6356_v39 = vadd.f32 %v6355_v32, %v6103_v2  ;;  %v6105_v22 = vmul.f32 %v5877_v36, %v5605_v3  ;;  %v6107_v1 = vmul.f32 %v5877_v36, %v5607_v42 }
 0x442   : > { %v6301_v16 = vadd.f32 %v6300_v34, %v6102_v35  ;;  %v6411_v17 = vadd.f32 %v6410_v6, %v6104_v15  ;;  %v6106_v24 = vmul.f32 %v5877_v36, %v5606_v61  ;;  %v6108_v26 = vmul.f32 %v5877_v36, %v5608_v23  ;;  %v4248_v20 = vpop.f32.mrb[40].mxu0  ;;  %v5380_v43 = vpop.f32.mrb[40].mxu1 }
 0x443   : > { %v6247_v33 = vadd.f32 %v6246_v52, %v6105_v22  ;;  %v6357_v5 = vadd.f32 %v6356_v39, %v6107_v1  ;;  %v7053_v44 = vadd.f32 %v4248_v20, %v10002_v45  ;;  %v7153_v19 = vadd.f32 %v5380_v43, %v10002_v45  ;;  %v4250_v7 = vpop.f32.mrb[41].mxu0  ;;  %v5382_v4 = vpop.f32.mrb[41].mxu1 }
 0x444   : > { %v6302_v14 = vadd.f32 %v6301_v16, %v6106_v24  ;;  %v6412_v40 = vadd.f32 %v6411_v17, %v6108_v26  ;;  %v7054_v25 = vadd.f32 %v4250_v7, %v10002_v45  ;;  %v7154_v32 = vadd.f32 %v5382_v4, %v10002_v45  ;;  %v4252_v0 = vpop.f32.mrb[42].mxu0  ;;  %v5384_v27 = vpop.f32.mrb[42].mxu1 }
 0x445   : > { %v5609_v9 = vmax.f32 %v7053_v44, 0.0  ;;  %v5611_v36 = vmax.f32 %v7153_v19, 0.0  ;;  %v7055_v37 = vadd.f32 %v4252_v0, %v10004_v46  ;;  %v7155_v34 = vadd.f32 %v5384_v27, %v10004_v46  ;;  %v4254_v6 = vpop.f32.mrb[43].mxu0  ;;  %v5386_v28 = vpop.f32.mrb[43].mxu1 }
 0x446   : > { %v5610_v38 = vmax.f32 %v7054_v25, 0.0  ;;  %v5612_v13 = vmax.f32 %v7154_v32, 0.0  ;;  %v7056_v12 = vadd.f32 %v4254_v6, %v10004_v46  ;;  %v7156_v21 = vadd.f32 %v5386_v28, %v10004_v46  ;;  %v5892_v18 = vpop.permute.xlu0 %5891  ;;  %v5897_v8 = vpop.permute.xlu1 %5896 }
 0x447   : > { %v6109_v30 = vmul.f32 %v5882_v41, %v5609_v9  ;;  %v6111_v60 = vmul.f32 %v5882_v41, %v5611_v36  ;;  %v5613_v31 = vmax.f32 %v7055_v37, 0.0  ;;  %v5615_v45 = vmax.f32 %v7155_v34, 0.0 }
 0x448   : > { %v6110_v63 = vmul.f32 %v5882_v41, %v5610_v38  ;;  %v6112_v10 = vmul.f32 %v5882_v41, %v5612_v13  ;;  %v5614_v29 = vmax.f32 %v7056_v12, 0.0  ;;  %v5616_v11 = vmax.f32 %v7156_v21, 0.0 }
 0x449   : > { %v6248_v55 = vadd.f32 %v6247_v33, %v6109_v30  ;;  %v6358_v2 = vadd.f32 %v6357_v5, %v6111_v60  ;;  %v6113_v3 = vmul.f32 %v5887_v49, %v5613_v31  ;;  %v6115_v42 = vmul.f32 %v5887_v49, %v5615_v45 }
 0x44a   : > { %v6303_v35 = vadd.f32 %v6302_v14, %v6110_v63  ;;  %v6413_v15 = vadd.f32 %v6412_v40, %v6112_v10  ;;  %v6114_v61 = vmul.f32 %v5887_v49, %v5614_v29  ;;  %v6116_v23 = vmul.f32 %v5887_v49, %v5616_v11  ;;  %v4258_v52 = vpop.f32.mrb[44].mxu0  ;;  %v5390_v46 = vpop.f32.mrb[44].mxu1 }
 0x44b   : > { %v6249_v39 = vadd.f32 %v6248_v55, %v6113_v3  ;;  %v6359_v22 = vadd.f32 %v6358_v2, %v6115_v42  ;;  %v7057_v1 = vadd.f32 %v4258_v52, %v10010_v47  ;;  %v7157_v41 = vadd.f32 %v5390_v46, %v10010_v47  ;;  %v4260_v16 = vpop.f32.mrb[45].mxu0  ;;  %v5392_v17 = vpop.f32.mrb[45].mxu1 }
 0x44c   : > { %v6304_v24 = vadd.f32 %v6303_v35, %v6114_v61  ;;  %v6414_v26 = vadd.f32 %v6413_v15, %v6116_v23  ;;  %v7058_v20 = vadd.f32 %v4260_v16, %v10010_v47  ;;  %v7158_v43 = vadd.f32 %v5392_v17, %v10010_v47  ;;  %v4262_v33 = vpop.f32.mrb[46].mxu0  ;;  %v5394_v5 = vpop.f32.mrb[46].mxu1 }
 0x44d   : > { %v5617_v44 = vmax.f32 %v7057_v1, 0.0  ;;  %v5619_v49 = vmax.f32 %v7157_v41, 0.0  ;;  %v7059_v19 = vadd.f32 %v4262_v33, %v10012_v48  ;;  %v7159_v7 = vadd.f32 %v5394_v5, %v10012_v48  ;;  %v4264_v4 = vpop.f32.mrb[47].mxu0  ;;  %v5396_v14 = vpop.f32.mrb[47].mxu1 }
 0x44e   : > { %v5618_v40 = vmax.f32 %v7058_v20, 0.0  ;;  %v5620_v25 = vmax.f32 %v7158_v43, 0.0  ;;  %v7060_v32 = vadd.f32 %v4264_v4, %v10012_v48  ;;  %v7160_v0 = vadd.f32 %v5396_v14, %v10012_v48  ;;  %v5902_v38 = vpop.permute.xlu0 %5901  ;;  %v5907_v13 = vpop.permute.xlu1 %5906 }
 0x44f   : > { %v6117_v27 = vmul.f32 %v5892_v18, %v5617_v44  ;;  %v6119_v9 = vmul.f32 %v5892_v18, %v5619_v49  ;;  %v5621_v36 = vmax.f32 %v7059_v19, 0.0  ;;  %v5623_v47 = vmax.f32 %v7159_v7, 0.0 }
 0x450   : > { %v6118_v37 = vmul.f32 %v5892_v18, %v5618_v40  ;;  %v6120_v34 = vmul.f32 %v5892_v18, %v5620_v25  ;;  %v5622_v6 = vmax.f32 %v7060_v32, 0.0  ;;  %v5624_v28 = vmax.f32 %v7160_v0, 0.0 }
 0x451   : > { %v6250_v12 = vadd.f32 %v6249_v39, %v6117_v27  ;;  %v6360_v21 = vadd.f32 %v6359_v22, %v6119_v9  ;;  %v6121_v30 = vmul.f32 %v5897_v8, %v5621_v36  ;;  %v6123_v60 = vmul.f32 %v5897_v8, %v5623_v47 }
 0x452   : > { %v6305_v31 = vadd.f32 %v6304_v24, %v6118_v37  ;;  %v6415_v45 = vadd.f32 %v6414_v26, %v6120_v34  ;;  %v6122_v63 = vmul.f32 %v5897_v8, %v5622_v6  ;;  %v6124_v10 = vmul.f32 %v5897_v8, %v5624_v28  ;;  %v4268_v29 = vpop.f32.mrb[48].mxu0  ;;  %v5400_v48 = vpop.f32.mrb[48].mxu1 }
 0x453   : > { %v6251_v11 = vadd.f32 %v6250_v12, %v6121_v30  ;;  %v6361_v55 = vadd.f32 %v6360_v21, %v6123_v60  ;;  %v7061_v2 = vadd.f32 %v4268_v29, %v10021_v50  ;;  %v7161_v18 = vadd.f32 %v5400_v48, %v10021_v50  ;;  %v4270_v3 = vpop.f32.mrb[49].mxu0  ;;  %v5402_v42 = vpop.f32.mrb[49].mxu1 }
 0x454   : > { %v6306_v35 = vadd.f32 %v6305_v31, %v6122_v63  ;;  %v6416_v15 = vadd.f32 %v6415_v45, %v6124_v10  ;;  %v7062_v61 = vadd.f32 %v4270_v3, %v10021_v50  ;;  %v7162_v23 = vadd.f32 %v5402_v42, %v10021_v50  ;;  %v4272_v52 = vpop.f32.mrb[50].mxu0  ;;  %v5404_v46 = vpop.f32.mrb[50].mxu1 }
 0x455   : > { %v5625_v39 = vmax.f32 %v7061_v2, 0.0  ;;  %v5627_v8 = vmax.f32 %v7161_v18, 0.0  ;;  %v7063_v22 = vadd.f32 %v4272_v52, %v10023_v51  ;;  %v7163_v1 = vadd.f32 %v5404_v46, %v10023_v51  ;;  %v4274_v41 = vpop.f32.mrb[51].mxu0  ;;  %v5406_v16 = vpop.f32.mrb[51].mxu1 }
 0x456   : > { %v5626_v17 = vmax.f32 %v7062_v61, 0.0  ;;  %v5628_v24 = vmax.f32 %v7162_v23, 0.0  ;;  %v7064_v26 = vadd.f32 %v4274_v41, %v10023_v51  ;;  %v7164_v20 = vadd.f32 %v5406_v16, %v10023_v51  ;;  %v5912_v4 = vpop.permute.xlu0 %5911  ;;  %v5917_v14 = vpop.permute.xlu1 %5916 }
 0x457   : > { %v6125_v43 = vmul.f32 %v5902_v38, %v5625_v39  ;;  %v6127_v33 = vmul.f32 %v5902_v38, %v5627_v8  ;;  %v5629_v5 = vmax.f32 %v7063_v22, 0.0  ;;  %v5631_v50 = vmax.f32 %v7163_v1, 0.0 }
 0x458   : > { %v6126_v44 = vmul.f32 %v5902_v38, %v5626_v17  ;;  %v6128_v49 = vmul.f32 %v5902_v38, %v5628_v24  ;;  %v5630_v19 = vmax.f32 %v7064_v26, 0.0  ;;  %v5632_v7 = vmax.f32 %v7164_v20, 0.0 }
 0x459   : > { %v6252_v40 = vadd.f32 %v6251_v11, %v6125_v43  ;;  %v6362_v25 = vadd.f32 %v6361_v55, %v6127_v33  ;;  %v6129_v32 = vmul.f32 %v5907_v13, %v5629_v5  ;;  %v6131_v0 = vmul.f32 %v5907_v13, %v5631_v50 }
 0x45a   : > { %v6307_v27 = vadd.f32 %v6306_v35, %v6126_v44  ;;  %v6417_v9 = vadd.f32 %v6416_v15, %v6128_v49  ;;  %v6130_v36 = vmul.f32 %v5907_v13, %v5630_v19  ;;  %v6132_v47 = vmul.f32 %v5907_v13, %v5632_v7  ;;  %v4278_v37 = vpop.f32.mrb[52].mxu0  ;;  %v5410_v51 = vpop.f32.mrb[52].mxu1 }
 0x45b   : > { %v6253_v34 = vadd.f32 %v6252_v40, %v6129_v32  ;;  %v6363_v6 = vadd.f32 %v6362_v25, %v6131_v0  ;;  %v7065_v28 = vadd.f32 %v4278_v37, %v10028_v53  ;;  %v7165_v38 = vadd.f32 %v5410_v51, %v10028_v53  ;;  %v4280_v12 = vpop.f32.mrb[53].mxu0  ;;  %v5412_v21 = vpop.f32.mrb[53].mxu1 }
 0x45c   : > { %v6308_v30 = vadd.f32 %v6307_v27, %v6130_v36  ;;  %v6418_v60 = vadd.f32 %v6417_v9, %v6132_v47  ;;  %v7066_v31 = vadd.f32 %v4280_v12, %v10028_v53  ;;  %v7166_v45 = vadd.f32 %v5412_v21, %v10028_v53  ;;  %v4282_v63 = vpop.f32.mrb[54].mxu0  ;;  %v5414_v10 = vpop.f32.mrb[54].mxu1 }
 0x45d   : > { %v5633_v29 = vmax.f32 %v7065_v28, 0.0  ;;  %v5635_v13 = vmax.f32 %v7165_v38, 0.0  ;;  %v7067_v48 = vadd.f32 %v4282_v63, %v10030_v54  ;;  %v7167_v11 = vadd.f32 %v5414_v10, %v10030_v54  ;;  %v4284_v55 = vpop.f32.mrb[55].mxu0  ;;  %v5416_v2 = vpop.f32.mrb[55].mxu1 }
 0x45e   : > { %v5634_v18 = vmax.f32 %v7066_v31, 0.0  ;;  %v5636_v3 = vmax.f32 %v7166_v45, 0.0  ;;  %v7068_v42 = vadd.f32 %v4284_v55, %v10030_v54  ;;  %v7168_v35 = vadd.f32 %v5416_v2, %v10030_v54  ;;  %v5922_v22 = vpop.permute.xlu0 %5921  ;;  %v5927_v1 = vpop.permute.xlu1 %5926 }
 0x45f   : > { %v6133_v15 = vmul.f32 %v5912_v4, %v5633_v29  ;;  %v6135_v61 = vmul.f32 %v5912_v4, %v5635_v13  ;;  %v5637_v23 = vmax.f32 %v7067_v48, 0.0  ;;  %v5639_v53 = vmax.f32 %v7167_v11, 0.0 }
 0x460   : > { %v6134_v52 = vmul.f32 %v5912_v4, %v5634_v18  ;;  %v6136_v46 = vmul.f32 %v5912_v4, %v5636_v3  ;;  %v5638_v39 = vmax.f32 %v7068_v42, 0.0  ;;  %v5640_v8 = vmax.f32 %v7168_v35, 0.0 }
 0x461   : > { %v6254_v41 = vadd.f32 %v6253_v34, %v6133_v15  ;;  %v6364_v16 = vadd.f32 %v6363_v6, %v6135_v61  ;;  %v6137_v17 = vmul.f32 %v5917_v14, %v5637_v23  ;;  %v6139_v24 = vmul.f32 %v5917_v14, %v5639_v53 }
 0x462   : > { %v6309_v26 = vadd.f32 %v6308_v30, %v6134_v52  ;;  %v6419_v20 = vadd.f32 %v6418_v60, %v6136_v46  ;;  %v6138_v43 = vmul.f32 %v5917_v14, %v5638_v39  ;;  %v6140_v33 = vmul.f32 %v5917_v14, %v5640_v8  ;;  %v4288_v5 = vpop.f32.mrb[56].mxu0  ;;  %v5420_v54 = vpop.f32.mrb[56].mxu1 }
 0x463   : > { %v6255_v50 = vadd.f32 %v6254_v41, %v6137_v17  ;;  %v6365_v44 = vadd.f32 %v6364_v16, %v6139_v24  ;;  %v7069_v49 = vadd.f32 %v4288_v5, %v10039_v56  ;;  %v7169_v19 = vadd.f32 %v5420_v54, %v10039_v56  ;;  %v4290_v7 = vpop.f32.mrb[57].mxu0  ;;  %v5422_v4 = vpop.f32.mrb[57].mxu1 }
 0x464   : > { %v6310_v40 = vadd.f32 %v6309_v26, %v6138_v43  ;;  %v6420_v25 = vadd.f32 %v6419_v20, %v6140_v33  ;;  %v7070_v32 = vadd.f32 %v4290_v7, %v10039_v56  ;;  %v7170_v0 = vadd.f32 %v5422_v4, %v10039_v56  ;;  %v4292_v27 = vpop.f32.mrb[58].mxu0  ;;  %v5424_v9 = vpop.f32.mrb[58].mxu1 }
 0x465   : > { %v5641_v36 = vmax.f32 %v7069_v49, 0.0  ;;  %v5643_v14 = vmax.f32 %v7169_v19, 0.0  ;;  %v7071_v47 = vadd.f32 %v4292_v27, %v10041_v57  ;;  %v7171_v37 = vadd.f32 %v5424_v9, %v10041_v57  ;;  %v4294_v51 = vpop.f32.mrb[59].mxu0  ;;  %v5426_v34 = vpop.f32.mrb[59].mxu1 }
 0x466   : > { %v5642_v6 = vmax.f32 %v7070_v32, 0.0  ;;  %v5644_v28 = vmax.f32 %v7170_v0, 0.0  ;;  %v7072_v38 = vadd.f32 %v4294_v51, %v10041_v57  ;;  %v7172_v12 = vadd.f32 %v5426_v34, %v10041_v57  ;;  %v5932_v29 = vpop.permute.xlu0 %5931  ;;  %v5937_v13 = vpop.permute.xlu1 %5936 }
 0x467   : > { %v6141_v21 = vmul.f32 %v5922_v22, %v5641_v36  ;;  %v6143_v30 = vmul.f32 %v5922_v22, %v5643_v14  ;;  %v5645_v60 = vmax.f32 %v7071_v47, 0.0  ;;  %v5647_v56 = vmax.f32 %v7171_v37, 0.0 }
 0x468   : > { %v6142_v31 = vmul.f32 %v5922_v22, %v5642_v6  ;;  %v6144_v45 = vmul.f32 %v5922_v22, %v5644_v28  ;;  %v5646_v63 = vmax.f32 %v7072_v38, 0.0  ;;  %v5648_v10 = vmax.f32 %v7172_v12, 0.0 }
 0x469   : > { %v6256_v48 = vadd.f32 %v6255_v50, %v6141_v21  ;;  %v6366_v11 = vadd.f32 %v6365_v44, %v6143_v30  ;;  %v6145_v55 = vmul.f32 %v5927_v1, %v5645_v60  ;;  %v6147_v2 = vmul.f32 %v5927_v1, %v5647_v56 }
 0x46a   : > { %v6311_v18 = vadd.f32 %v6310_v40, %v6142_v31  ;;  %v6421_v3 = vadd.f32 %v6420_v25, %v6144_v45  ;;  %v6146_v42 = vmul.f32 %v5927_v1, %v5646_v63  ;;  %v6148_v35 = vmul.f32 %v5927_v1, %v5648_v10  ;;  %v4298_v15 = vpop.f32.mrb[60].mxu0  ;;  %v5430_v57 = vpop.f32.mrb[60].mxu1 }
 0x46b   : > { %v6257_v61 = vadd.f32 %v6256_v48, %v6145_v55  ;;  %v6367_v23 = vadd.f32 %v6366_v11, %v6147_v2  ;;  %v7073_v53 = vadd.f32 %v4298_v15, %v10047_v58  ;;  %v7173_v52 = vadd.f32 %v5430_v57, %v10047_v58  ;;  %v4300_v46 = vpop.f32.mrb[61].mxu0  ;;  %v5432_v39 = vpop.f32.mrb[61].mxu1  ;;  %v10367_v2 = vld [vmem:[#allocation4_spill] sm:$0xff] }
 0x46c   : > { %v6312_v8 = vadd.f32 %v6311_v18, %v6146_v42  ;;  %v6422_v22 = vadd.f32 %v6421_v3, %v6148_v35  ;;  %v7074_v41 = vadd.f32 %v4300_v46, %v10047_v58  ;;  %v7174_v16 = vadd.f32 %v5432_v39, %v10047_v58  ;;  %v4302_v17 = vpop.f32.mrb[62].mxu0  ;;  %v5434_v24 = vpop.f32.mrb[62].mxu1 }
 0x46d   : > { %v5649_v26 = vmax.f32 %v7073_v53, 0.0  ;;  %v5651_v1 = vmax.f32 %v7173_v52, 0.0  ;;  %v7075_v20 = vadd.f32 %v4302_v17, %v10049_v59  ;;  %v7175_v43 = vadd.f32 %v5434_v24, %v10049_v59  ;;  %v4304_v33 = vpop.f32.mrb[63].mxu0  ;;  %v5436_v5 = vpop.f32.mrb[63].mxu1 }
 0x46e   : > { %v5650_v54 = vmax.f32 %v7074_v41, 0.0  ;;  %v5652_v50 = vmax.f32 %v7174_v16, 0.0  ;;  %v7076_v44 = vadd.f32 %v4304_v33, %v10049_v59  ;;  %v7176_v49 = vadd.f32 %v5436_v5, %v10049_v59  ;;  %v5942_v27 = vpop.permute.xlu0 %5941  ;;  %v5947_v9 = vpop.permute.xlu1 %5946 }
 0x46f   : > { %v6149_v19 = vmul.f32 %v5932_v29, %v5649_v26  ;;  %v6151_v7 = vmul.f32 %v5932_v29, %v5651_v1  ;;  %v5653_v4 = vmax.f32 %v7075_v20, 0.0  ;;  %v5655_v58 = vmax.f32 %v7175_v43, 0.0 }
 0x470   : > { %v6150_v40 = vmul.f32 %v5932_v29, %v5650_v54  ;;  %v6152_v25 = vmul.f32 %v5932_v29, %v5652_v50  ;;  %v5654_v32 = vmax.f32 %v7076_v44, 0.0  ;;  %v5656_v0 = vmax.f32 %v7176_v49, 0.0 }
 0x471   : > { %v6258_v36 = vadd.f32 %v6257_v61, %v6149_v19  ;;  %v6368_v14 = vadd.f32 %v6367_v23, %v6151_v7  ;;  %v6153_v47 = vmul.f32 %v5937_v13, %v5653_v4  ;;  %v6155_v37 = vmul.f32 %v5937_v13, %v5655_v58  ;;  %v10368_v7 = vld [vmem:[#allocation5_spill] sm:$0xff] }
 0x472   : > { %v6313_v51 = vadd.f32 %v6312_v8, %v6150_v40  ;;  %v6423_v34 = vadd.f32 %v6422_v22, %v6152_v25  ;;  %v6154_v6 = vmul.f32 %v5937_v13, %v5654_v32  ;;  %v6156_v28 = vmul.f32 %v5937_v13, %v5656_v0  ;;  %v4308_v38 = vpop.f32.mrb[64].mxu0  ;;  %v5440_v59 = vpop.f32.mrb[64].mxu1 }
 0x473   : > { %v6259_v12 = vadd.f32 %v6258_v36, %v6153_v47  ;;  %v6369_v21 = vadd.f32 %v6368_v14, %v6155_v37  ;;  %v7077_v30 = vadd.f32 %v4308_v38, %v10058_v62  ;;  %v7177_v60 = vadd.f32 %v5440_v59, %v10058_v62  ;;  %v4310_v56 = vpop.f32.mrb[65].mxu0  ;;  %v5442_v31 = vpop.f32.mrb[65].mxu1 }
 0x474   : > { %v6314_v45 = vadd.f32 %v6313_v51, %v6154_v6  ;;  %v6424_v63 = vadd.f32 %v6423_v34, %v6156_v28  ;;  %v7078_v10 = vadd.f32 %v4310_v56, %v10058_v62  ;;  %v7178_v29 = vadd.f32 %v5442_v31, %v10058_v62  ;;  %v4312_v48 = vpop.f32.mrb[66].mxu0  ;;  %v5444_v11 = vpop.f32.mrb[66].mxu1  ;;  %v10369_v51 = vld [vmem:[#allocation6_spill] sm:$0xff] }
 0x475   : > { %v5657_v55 = vmax.f32 %v7077_v30, 0.0  ;;  %v5659_v13 = vmax.f32 %v7177_v60, 0.0  ;;  %v7079_v18 = vadd.f32 %v4312_v48, %v10367_v2  ;;  %v7179_v3 = vadd.f32 %v5444_v11, %v10367_v2  ;;  %v4314_v42 = vpop.f32.mrb[67].mxu0  ;;  %v5446_v35 = vpop.f32.mrb[67].mxu1 }
 0x476   : > { %v5658_v15 = vmax.f32 %v7078_v10, 0.0  ;;  %v5660_v57 = vmax.f32 %v7178_v29, 0.0  ;;  %v7080_v61 = vadd.f32 %v4314_v42, %v10367_v2  ;;  %v7180_v23 = vadd.f32 %v5446_v35, %v10367_v2  ;;  %v5952_v16 = vpop.permute.xlu0 %5951  ;;  %v5957_v17 = vpop.permute.xlu1 %5956 }
 0x477   : > { %v6157_v53 = vmul.f32 %v5942_v27, %v5657_v55  ;;  %v6159_v52 = vmul.f32 %v5942_v27, %v5659_v13  ;;  %v5661_v46 = vmax.f32 %v7079_v18, 0.0  ;;  %v5663_v62 = vmax.f32 %v7179_v3, 0.0 }
 0x478   : > { %v6158_v39 = vmul.f32 %v5942_v27, %v5658_v15  ;;  %v6160_v8 = vmul.f32 %v5942_v27, %v5660_v57  ;;  %v5662_v22 = vmax.f32 %v7080_v61, 0.0  ;;  %v5664_v41 = vmax.f32 %v7180_v23, 0.0 }
 0x479   : > { %v6260_v24 = vadd.f32 %v6259_v12, %v6157_v53  ;;  %v6370_v26 = vadd.f32 %v6369_v21, %v6159_v52  ;;  %v6161_v1 = vmul.f32 %v5947_v9, %v5661_v46  ;;  %v6163_v20 = vmul.f32 %v5947_v9, %v5663_v62  ;;  %v10370_v46 = vld [vmem:[#allocation7_spill] sm:$0xff] }
 0x47a   : > { %v6315_v43 = vadd.f32 %v6314_v45, %v6158_v39  ;;  %v6425_v33 = vadd.f32 %v6424_v63, %v6160_v8  ;;  %v6162_v5 = vmul.f32 %v5947_v9, %v5662_v22  ;;  %v6164_v54 = vmul.f32 %v5947_v9, %v5664_v41  ;;  %v4318_v50 = vpop.f32.mrb[68].mxu0  ;;  %v5450_v44 = vpop.f32.mrb[68].mxu1 }
 0x47b   : > { %v6261_v49 = vadd.f32 %v6260_v24, %v6161_v1  ;;  %v6371_v19 = vadd.f32 %v6370_v26, %v6163_v20  ;;  %v7081_v4 = vadd.f32 %v4318_v50, %v10368_v7  ;;  %v7181_v58 = vadd.f32 %v5450_v44, %v10368_v7  ;;  %v4320_v40 = vpop.f32.mrb[69].mxu0  ;;  %v5452_v25 = vpop.f32.mrb[69].mxu1 }
 0x47c   : > { %v6316_v32 = vadd.f32 %v6315_v43, %v6162_v5  ;;  %v6426_v0 = vadd.f32 %v6425_v33, %v6164_v54  ;;  %v7082_v27 = vadd.f32 %v4320_v40, %v10368_v7  ;;  %v7182_v36 = vadd.f32 %v5452_v25, %v10368_v7  ;;  %v4322_v14 = vpop.f32.mrb[70].mxu0  ;;  %v5454_v47 = vpop.f32.mrb[70].mxu1  ;;  %v10371_v33 = vld [vmem:[#allocation8_spill] sm:$0xff] }
 0x47d   : > { %v5665_v37 = vmax.f32 %v7081_v4, 0.0  ;;  %v5667_v9 = vmax.f32 %v7181_v58, 0.0  ;;  %v7083_v34 = vadd.f32 %v4322_v14, %v10369_v51  ;;  %v7183_v6 = vadd.f32 %v5454_v47, %v10369_v51  ;;  %v4324_v28 = vpop.f32.mrb[71].mxu0  ;;  %v5456_v38 = vpop.f32.mrb[71].mxu1 }
 0x47e   : > { %v5666_v59 = vmax.f32 %v7082_v27, 0.0  ;;  %v5668_v12 = vmax.f32 %v7182_v36, 0.0  ;;  %v7084_v21 = vadd.f32 %v4324_v28, %v10369_v51  ;;  %v7184_v30 = vadd.f32 %v5456_v38, %v10369_v51  ;;  %v5962_v11 = vpop.permute.xlu0 %5961  ;;  %v5967_v55 = vpop.permute.xlu1 %5966 }
 0x47f   : > { %v6165_v60 = vmul.f32 %v5952_v16, %v5665_v37  ;;  %v6167_v56 = vmul.f32 %v5952_v16, %v5667_v9  ;;  %v5669_v31 = vmax.f32 %v7083_v34, 0.0  ;;  %v5671_v45 = vmax.f32 %v7183_v6, 0.0 }
 0x480   : > { %v6166_v63 = vmul.f32 %v5952_v16, %v5666_v59  ;;  %v6168_v10 = vmul.f32 %v5952_v16, %v5668_v12  ;;  %v5670_v29 = vmax.f32 %v7084_v21, 0.0  ;;  %v5672_v48 = vmax.f32 %v7184_v30, 0.0 }
 0x481   : > { %v6262_v13 = vadd.f32 %v6261_v49, %v6165_v60  ;;  %v6372_v2 = vadd.f32 %v6371_v19, %v6167_v56  ;;  %v6169_v18 = vmul.f32 %v5957_v17, %v5669_v31  ;;  %v6171_v3 = vmul.f32 %v5957_v17, %v5671_v45  ;;  %v10372_v31 = vld [vmem:[#allocation9_spill] sm:$0xff] }
 0x482   : > { %v6317_v42 = vadd.f32 %v6316_v32, %v6166_v63  ;;  %v6427_v35 = vadd.f32 %v6426_v0, %v6168_v10  ;;  %v6170_v15 = vmul.f32 %v5957_v17, %v5670_v29  ;;  %v6172_v57 = vmul.f32 %v5957_v17, %v5672_v48  ;;  %v4328_v61 = vpop.f32.mrb[72].mxu0  ;;  %v5460_v23 = vpop.f32.mrb[72].mxu1 }
 0x483   : > { %v6263_v53 = vadd.f32 %v6262_v13, %v6169_v18  ;;  %v6373_v52 = vadd.f32 %v6372_v2, %v6171_v3  ;;  %v7085_v62 = vadd.f32 %v4328_v61, %v10370_v46  ;;  %v7185_v39 = vadd.f32 %v5460_v23, %v10370_v46  ;;  %v4330_v8 = vpop.f32.mrb[73].mxu0  ;;  %v5462_v22 = vpop.f32.mrb[73].mxu1 }
 0x484   : > { %v6318_v41 = vadd.f32 %v6317_v42, %v6170_v15  ;;  %v6428_v16 = vadd.f32 %v6427_v35, %v6172_v57  ;;  %v7086_v24 = vadd.f32 %v4330_v8, %v10370_v46  ;;  %v7186_v26 = vadd.f32 %v5462_v22, %v10370_v46  ;;  %v4332_v1 = vpop.f32.mrb[74].mxu0  ;;  %v5464_v20 = vpop.f32.mrb[74].mxu1  ;;  %v10373_v35 = vld [vmem:[#allocation10_spill] sm:$0xff] }
 0x485   : > { %v5673_v43 = vmax.f32 %v7085_v62, 0.0  ;;  %v5675_v17 = vmax.f32 %v7185_v39, 0.0  ;;  %v7087_v5 = vadd.f32 %v4332_v1, %v10371_v33  ;;  %v7187_v54 = vadd.f32 %v5464_v20, %v10371_v33  ;;  %v4334_v50 = vpop.f32.mrb[75].mxu0  ;;  %v5466_v44 = vpop.f32.mrb[75].mxu1 }
 0x486   : > { %v5674_v49 = vmax.f32 %v7086_v24, 0.0  ;;  %v5676_v19 = vmax.f32 %v7186_v26, 0.0  ;;  %v7088_v7 = vadd.f32 %v4334_v50, %v10371_v33  ;;  %v7188_v4 = vadd.f32 %v5466_v44, %v10371_v33  ;;  %v5972_v47 = vpop.permute.xlu0 %5971  ;;  %v5977_v37 = vpop.permute.xlu1 %5976 }
 0x487   : > { %v6173_v58 = vmul.f32 %v5962_v11, %v5673_v43  ;;  %v6175_v40 = vmul.f32 %v5962_v11, %v5675_v17  ;;  %v5677_v25 = vmax.f32 %v7087_v5, 0.0  ;;  %v5679_v32 = vmax.f32 %v7187_v54, 0.0 }
 0x488   : > { %v6174_v0 = vmul.f32 %v5962_v11, %v5674_v49  ;;  %v6176_v27 = vmul.f32 %v5962_v11, %v5676_v19  ;;  %v5678_v36 = vmax.f32 %v7088_v7, 0.0  ;;  %v5680_v14 = vmax.f32 %v7188_v4, 0.0 }
 0x489   : > { %v6264_v9 = vadd.f32 %v6263_v53, %v6173_v58  ;;  %v6374_v51 = vadd.f32 %v6373_v52, %v6175_v40  ;;  %v6177_v34 = vmul.f32 %v5967_v55, %v5677_v25  ;;  %v6179_v6 = vmul.f32 %v5967_v55, %v5679_v32  ;;  %v10374_v25 = vld [vmem:[#allocation11_spill] sm:$0xff] }
 0x48a   : > { %v6319_v28 = vadd.f32 %v6318_v41, %v6174_v0  ;;  %v6429_v38 = vadd.f32 %v6428_v16, %v6176_v27  ;;  %v6178_v59 = vmul.f32 %v5967_v55, %v5678_v36  ;;  %v6180_v12 = vmul.f32 %v5967_v55, %v5680_v14  ;;  %v4338_v21 = vpop.f32.mrb[76].mxu0  ;;  %v5470_v30 = vpop.f32.mrb[76].mxu1 }
 0x48b   : > { %v6265_v60 = vadd.f32 %v6264_v9, %v6177_v34  ;;  %v6375_v56 = vadd.f32 %v6374_v51, %v6179_v6  ;;  %v7089_v45 = vadd.f32 %v4338_v21, %v10372_v31  ;;  %v7189_v63 = vadd.f32 %v5470_v30, %v10372_v31  ;;  %v4340_v10 = vpop.f32.mrb[77].mxu0  ;;  %v5472_v29 = vpop.f32.mrb[77].mxu1 }
 0x48c   : > { %v6320_v48 = vadd.f32 %v6319_v28, %v6178_v59  ;;  %v6430_v11 = vadd.f32 %v6429_v38, %v6180_v12  ;;  %v7090_v13 = vadd.f32 %v4340_v10, %v10372_v31  ;;  %v7190_v2 = vadd.f32 %v5472_v29, %v10372_v31  ;;  %v4342_v18 = vpop.f32.mrb[78].mxu0  ;;  %v5474_v3 = vpop.f32.mrb[78].mxu1  ;;  %v10375_v38 = vld [vmem:[#allocation12_spill] sm:$0xff] }
 0x48d   : > { %v5681_v42 = vmax.f32 %v7089_v45, 0.0  ;;  %v5683_v55 = vmax.f32 %v7189_v63, 0.0  ;;  %v7091_v15 = vadd.f32 %v4342_v18, %v10373_v35  ;;  %v7191_v57 = vadd.f32 %v5474_v3, %v10373_v35  ;;  %v4344_v61 = vpop.f32.mrb[79].mxu0  ;;  %v5476_v23 = vpop.f32.mrb[79].mxu1 }
 0x48e   : > { %v5682_v53 = vmax.f32 %v7090_v13, 0.0  ;;  %v5684_v52 = vmax.f32 %v7190_v2, 0.0  ;;  %v7092_v46 = vadd.f32 %v4344_v61, %v10373_v35  ;;  %v7192_v62 = vadd.f32 %v5476_v23, %v10373_v35  ;;  %v5982_v20 = vpop.permute.xlu0 %5981  ;;  %v5987_v43 = vpop.permute.xlu1 %5986 }
 0x48f   : > { %v6181_v39 = vmul.f32 %v5972_v47, %v5681_v42  ;;  %v6183_v8 = vmul.f32 %v5972_v47, %v5683_v55  ;;  %v5685_v22 = vmax.f32 %v7091_v15, 0.0  ;;  %v5687_v41 = vmax.f32 %v7191_v57, 0.0 }
 0x490   : > { %v6182_v16 = vmul.f32 %v5972_v47, %v5682_v53  ;;  %v6184_v24 = vmul.f32 %v5972_v47, %v5684_v52  ;;  %v5686_v26 = vmax.f32 %v7092_v46, 0.0  ;;  %v5688_v1 = vmax.f32 %v7192_v62, 0.0 }
 0x491   : > { %v6266_v17 = vadd.f32 %v6265_v60, %v6181_v39  ;;  %v6376_v33 = vadd.f32 %v6375_v56, %v6183_v8  ;;  %v6185_v5 = vmul.f32 %v5977_v37, %v5685_v22  ;;  %v6187_v54 = vmul.f32 %v5977_v37, %v5687_v41  ;;  %v10376_v22 = vld [vmem:[#allocation13_spill] sm:$0xff] }
 0x492   : > { %v6321_v50 = vadd.f32 %v6320_v48, %v6182_v16  ;;  %v6431_v44 = vadd.f32 %v6430_v11, %v6184_v24  ;;  %v6186_v49 = vmul.f32 %v5977_v37, %v5686_v26  ;;  %v6188_v19 = vmul.f32 %v5977_v37, %v5688_v1  ;;  %v4348_v7 = vpop.f32.mrb[80].mxu0  ;;  %v5480_v4 = vpop.f32.mrb[80].mxu1 }
 0x493   : > { %v6267_v58 = vadd.f32 %v6266_v17, %v6185_v5  ;;  %v6377_v40 = vadd.f32 %v6376_v33, %v6187_v54  ;;  %v7093_v32 = vadd.f32 %v4348_v7, %v10374_v25  ;;  %v7193_v0 = vadd.f32 %v5480_v4, %v10374_v25  ;;  %v4350_v27 = vpop.f32.mrb[81].mxu0  ;;  %v5482_v36 = vpop.f32.mrb[81].mxu1 }
 0x494   : > { %v6322_v14 = vadd.f32 %v6321_v50, %v6186_v49  ;;  %v6432_v47 = vadd.f32 %v6431_v44, %v6188_v19  ;;  %v7094_v9 = vadd.f32 %v4350_v27, %v10374_v25  ;;  %v7194_v51 = vadd.f32 %v5482_v36, %v10374_v25  ;;  %v4352_v34 = vpop.f32.mrb[82].mxu0  ;;  %v5484_v6 = vpop.f32.mrb[82].mxu1  ;;  %v10377_v44 = vld [vmem:[#allocation14_spill] sm:$0xff] }
 0x495   : > { %v5689_v28 = vmax.f32 %v7093_v32, 0.0  ;;  %v5691_v37 = vmax.f32 %v7193_v0, 0.0  ;;  %v7095_v59 = vadd.f32 %v4352_v34, %v10375_v38  ;;  %v7195_v12 = vadd.f32 %v5484_v6, %v10375_v38  ;;  %v4354_v21 = vpop.f32.mrb[83].mxu0  ;;  %v5486_v30 = vpop.f32.mrb[83].mxu1 }
 0x496   : > { %v5690_v60 = vmax.f32 %v7094_v9, 0.0  ;;  %v5692_v56 = vmax.f32 %v7194_v51, 0.0  ;;  %v7096_v31 = vadd.f32 %v4354_v21, %v10375_v38  ;;  %v7196_v45 = vadd.f32 %v5486_v30, %v10375_v38  ;;  %v5992_v3 = vpop.permute.xlu0 %5991  ;;  %v5997_v42 = vpop.permute.xlu1 %5996 }
 0x497   : > { %v6189_v63 = vmul.f32 %v5982_v20, %v5689_v28  ;;  %v6191_v10 = vmul.f32 %v5982_v20, %v5691_v37  ;;  %v5693_v29 = vmax.f32 %v7095_v59, 0.0  ;;  %v5695_v48 = vmax.f32 %v7195_v12, 0.0 }
 0x498   : > { %v6190_v11 = vmul.f32 %v5982_v20, %v5690_v60  ;;  %v6192_v13 = vmul.f32 %v5982_v20, %v5692_v56  ;;  %v5694_v2 = vmax.f32 %v7096_v31, 0.0  ;;  %v5696_v18 = vmax.f32 %v7196_v45, 0.0 }
 0x499   : > { %v6268_v55 = vadd.f32 %v6267_v58, %v6189_v63  ;;  %v6378_v35 = vadd.f32 %v6377_v40, %v6191_v10  ;;  %v6193_v15 = vmul.f32 %v5987_v43, %v5693_v29  ;;  %v6195_v57 = vmul.f32 %v5987_v43, %v5695_v48  ;;  %v10378_v29 = vld [vmem:[#allocation15_spill] sm:$0xff] }
 0x49a   : > { %v6323_v61 = vadd.f32 %v6322_v14, %v6190_v11  ;;  %v6433_v23 = vadd.f32 %v6432_v47, %v6192_v13  ;;  %v6194_v53 = vmul.f32 %v5987_v43, %v5694_v2  ;;  %v6196_v52 = vmul.f32 %v5987_v43, %v5696_v18  ;;  %v4358_v46 = vpop.f32.mrb[84].mxu0  ;;  %v5490_v62 = vpop.f32.mrb[84].mxu1 }
 0x49b   : > { %v6269_v39 = vadd.f32 %v6268_v55, %v6193_v15  ;;  %v6379_v8 = vadd.f32 %v6378_v35, %v6195_v57  ;;  %v7097_v41 = vadd.f32 %v4358_v46, %v10376_v22  ;;  %v7197_v16 = vadd.f32 %v5490_v62, %v10376_v22  ;;  %v4360_v24 = vpop.f32.mrb[85].mxu0  ;;  %v5492_v26 = vpop.f32.mrb[85].mxu1 }
 0x49c   : > { %v6324_v1 = vadd.f32 %v6323_v61, %v6194_v53  ;;  %v6434_v20 = vadd.f32 %v6433_v23, %v6196_v52  ;;  %v7098_v17 = vadd.f32 %v4360_v24, %v10376_v22  ;;  %v7198_v33 = vadd.f32 %v5492_v26, %v10376_v22  ;;  %v4362_v5 = vpop.f32.mrb[86].mxu0  ;;  %v5494_v54 = vpop.f32.mrb[86].mxu1  ;;  %v10379_v23 = vld [vmem:[#allocation16_spill] sm:$0xff] }
 0x49d   : > { %v5697_v50 = vmax.f32 %v7097_v41, 0.0  ;;  %v5699_v43 = vmax.f32 %v7197_v16, 0.0  ;;  %v7099_v49 = vadd.f32 %v4362_v5, %v10377_v44  ;;  %v7199_v19 = vadd.f32 %v5494_v54, %v10377_v44  ;;  %v4364_v7 = vpop.f32.mrb[87].mxu0  ;;  %v5496_v4 = vpop.f32.mrb[87].mxu1 }
 0x49e   : > { %v5698_v58 = vmax.f32 %v7098_v17, 0.0  ;;  %v5700_v40 = vmax.f32 %v7198_v33, 0.0  ;;  %v7100_v25 = vadd.f32 %v4364_v7, %v10377_v44  ;;  %v7200_v32 = vadd.f32 %v5496_v4, %v10377_v44  ;;  %v6002_v6 = vpop.permute.xlu0 %6001  ;;  %v6007_v28 = vpop.permute.xlu1 %6006 }
 0x49f   : > { %v6197_v0 = vmul.f32 %v5992_v3, %v5697_v50  ;;  %v6199_v27 = vmul.f32 %v5992_v3, %v5699_v43  ;;  %v5701_v36 = vmax.f32 %v7099_v49, 0.0  ;;  %v5703_v14 = vmax.f32 %v7199_v19, 0.0 }
 0x4a0   : > { %v6198_v47 = vmul.f32 %v5992_v3, %v5698_v58  ;;  %v6200_v9 = vmul.f32 %v5992_v3, %v5700_v40  ;;  %v5702_v51 = vmax.f32 %v7100_v25, 0.0  ;;  %v5704_v34 = vmax.f32 %v7200_v32, 0.0 }
 0x4a1   : > { %v6270_v37 = vadd.f32 %v6269_v39, %v6197_v0  ;;  %v6380_v38 = vadd.f32 %v6379_v8, %v6199_v27  ;;  %v6201_v59 = vmul.f32 %v5997_v42, %v5701_v36  ;;  %v6203_v12 = vmul.f32 %v5997_v42, %v5703_v14  ;;  %v10380_v36 = vld [vmem:[#allocation17_spill] sm:$0xff] }
 0x4a2   : > { %v6325_v21 = vadd.f32 %v6324_v1, %v6198_v47  ;;  %v6435_v30 = vadd.f32 %v6434_v20, %v6200_v9  ;;  %v6202_v60 = vmul.f32 %v5997_v42, %v5702_v51  ;;  %v6204_v56 = vmul.f32 %v5997_v42, %v5704_v34  ;;  %v4368_v31 = vpop.f32.mrb[88].mxu0  ;;  %v5500_v45 = vpop.f32.mrb[88].mxu1 }
 0x4a3   : > { %v6271_v63 = vadd.f32 %v6270_v37, %v6201_v59  ;;  %v6381_v10 = vadd.f32 %v6380_v38, %v6203_v12  ;;  %v7101_v48 = vadd.f32 %v4368_v31, %v10378_v29  ;;  %v7201_v11 = vadd.f32 %v5500_v45, %v10378_v29  ;;  %v4370_v13 = vpop.f32.mrb[89].mxu0  ;;  %v5502_v2 = vpop.f32.mrb[89].mxu1 }
 0x4a4   : > { %v6326_v18 = vadd.f32 %v6325_v21, %v6202_v60  ;;  %v6436_v3 = vadd.f32 %v6435_v30, %v6204_v56  ;;  %v7102_v55 = vadd.f32 %v4370_v13, %v10378_v29  ;;  %v7202_v35 = vadd.f32 %v5502_v2, %v10378_v29  ;;  %v4372_v15 = vpop.f32.mrb[90].mxu0  ;;  %v5504_v57 = vpop.f32.mrb[90].mxu1  ;;  %v10381_v30 = vld [vmem:[#allocation18_spill] sm:$0xff] }
 0x4a5   : > { %v5705_v61 = vmax.f32 %v7101_v48, 0.0  ;;  %v5707_v42 = vmax.f32 %v7201_v11, 0.0  ;;  %v7103_v53 = vadd.f32 %v4372_v15, %v10379_v23  ;;  %v7203_v52 = vadd.f32 %v5504_v57, %v10379_v23  ;;  %v4374_v46 = vpop.f32.mrb[91].mxu0  ;;  %v5506_v62 = vpop.f32.mrb[91].mxu1 }
 0x4a6   : > { %v5706_v39 = vmax.f32 %v7102_v55, 0.0  ;;  %v5708_v8 = vmax.f32 %v7202_v35, 0.0  ;;  %v7104_v22 = vadd.f32 %v4374_v46, %v10379_v23  ;;  %v7204_v41 = vadd.f32 %v5506_v62, %v10379_v23  ;;  %v10300_v54 = vpop.permute.xlu0 %1326  ;;  %v6012_v50 = vpop.permute.xlu1 %6011 }
 0x4a7   : > { %v6205_v16 = vmul.f32 %v6002_v6, %v5705_v61  ;;  %v6207_v24 = vmul.f32 %v6002_v6, %v5707_v42  ;;  %v5709_v26 = vmax.f32 %v7103_v53, 0.0  ;;  %v5711_v1 = vmax.f32 %v7203_v52, 0.0 }
 0x4a8   : > { %v6206_v20 = vmul.f32 %v6002_v6, %v5706_v39  ;;  %v6208_v17 = vmul.f32 %v6002_v6, %v5708_v8  ;;  %v5710_v33 = vmax.f32 %v7104_v22, 0.0  ;;  %v5712_v5 = vmax.f32 %v7204_v41, 0.0 }
 0x4a9   : > { %v6272_v43 = vadd.f32 %v6271_v63, %v6205_v16  ;;  %v6382_v44 = vadd.f32 %v6381_v10, %v6207_v24  ;;  %v6209_v49 = vmul.f32 %v6007_v28, %v5709_v26  ;;  %v6211_v19 = vmul.f32 %v6007_v28, %v5711_v1 }
 0x4aa   : > { %v6327_v7 = vadd.f32 %v6326_v18, %v6206_v20  ;;  %v6437_v4 = vadd.f32 %v6436_v3, %v6208_v17  ;;  %v6210_v58 = vmul.f32 %v6007_v28, %v5710_v33  ;;  %v6212_v40 = vmul.f32 %v6007_v28, %v5712_v5  ;;  %v4378_v25 = vpop.f32.mrb[92].mxu0  ;;  %v5510_v32 = vpop.f32.mrb[92].mxu1 }
 0x4ab   : > { %v6273_v0 = vadd.f32 %v6272_v43, %v6209_v49  ;;  %v6383_v27 = vadd.f32 %v6382_v44, %v6211_v19  ;;  %v7105_v14 = vadd.f32 %v4378_v25, %v10380_v36  ;;  %v7205_v47 = vadd.f32 %v5510_v32, %v10380_v36  ;;  %v4380_v9 = vpop.f32.mrb[93].mxu0  ;;  %v5512_v51 = vpop.f32.mrb[93].mxu1 }
 0x4ac   : > { %v6328_v34 = vadd.f32 %v6327_v7, %v6210_v58  ;;  %v6438_v6 = vadd.f32 %v6437_v4, %v6212_v40  ;;  %v7106_v37 = vadd.f32 %v4380_v9, %v10380_v36  ;;  %v7206_v38 = vadd.f32 %v5512_v51, %v10380_v36  ;;  %v4382_v59 = vpop.f32.mrb[94].mxu0  ;;  %v5514_v12 = vpop.f32.mrb[94].mxu1 }
 0x4ad   : > { %v5713_v21 = vmax.f32 %v7105_v14, 0.0  ;;  %v5715_v28 = vmax.f32 %v7205_v47, 0.0  ;;  %v7107_v60 = vadd.f32 %v4382_v59, %v10381_v30  ;;  %v7207_v56 = vadd.f32 %v5514_v12, %v10381_v30  ;;  %v4384_v31 = vpop.f32.mrb[95].mxu0  ;;  %v5516_v45 = vpop.f32.mrb[95].mxu1 }
 0x4ae   : > { %v5714_v63 = vmax.f32 %v7106_v37, 0.0  ;;  %v5716_v10 = vmax.f32 %v7206_v38, 0.0  ;;  %v7108_v29 = vadd.f32 %v4384_v31, %v10381_v30  ;;  %v7208_v48 = vadd.f32 %v5516_v45, %v10381_v30  ;;  %v1332_v3 = vpop.permute.xlu0 %1331  ;;  %v6017_v55 = vpop.permute.xlu1 %6016 }
 0x4af   : > { %v6213_v11 = vmul.f32 %v6012_v50, %v5713_v21  ;;  %v6215_v13 = vmul.f32 %v6012_v50, %v5715_v28  ;;  %v5717_v2 = vmax.f32 %v7107_v60, 0.0  ;;  %v5719_v18 = vmax.f32 %v7207_v56, 0.0 }
 0x4b0   : > { %v6214_v35 = vmul.f32 %v6012_v50, %v5714_v63  ;;  %v6216_v15 = vmul.f32 %v6012_v50, %v5716_v10  ;;  %v5718_v57 = vmax.f32 %v7108_v29, 0.0  ;;  %v5720_v61 = vmax.f32 %v7208_v48, 0.0 }
 0x4b1   : > { %v6274_v42 = vadd.f32 %v6273_v0, %v6213_v11  ;;  %v6384_v23 = vadd.f32 %v6383_v27, %v6215_v13  ;;  %v6217_v53 = vmul.f32 %v6017_v55, %v5717_v2  ;;  %v6219_v52 = vmul.f32 %v6017_v55, %v5719_v18 }
 0x4b2   : > { %v6329_v46 = vadd.f32 %v6328_v34, %v6214_v35  ;;  %v6439_v62 = vadd.f32 %v6438_v6, %v6216_v15  ;;  %v6218_v39 = vmul.f32 %v6017_v55, %v5718_v57  ;;  %v6220_v8 = vmul.f32 %v6017_v55, %v5720_v61  ;;  %v4388_v22 = vpop.f32.mrb[96].mxu0  ;;  %v5520_v41 = vpop.f32.mrb[96].mxu1 }
 0x4b3   : > { %v6275_v16 = vadd.f32 %v6274_v42, %v6217_v53  ;;  %v6385_v24 = vadd.f32 %v6384_v23, %v6219_v52  ;;  %v7109_v26 = vadd.f32 %v4388_v22, %v10300_v54  ;;  %v7209_v1 = vadd.f32 %v5520_v41, %v10300_v54  ;;  %v4390_v20 = vpop.f32.mrb[97].mxu0  ;;  %v5522_v17 = vpop.f32.mrb[97].mxu1 }
 0x4b4   : > { %v6330_v33 = vadd.f32 %v6329_v46, %v6218_v39  ;;  %v6440_v5 = vadd.f32 %v6439_v62, %v6220_v8  ;;  %v7110_v50 = vadd.f32 %v4390_v20, %v10300_v54  ;;  %v7210_v43 = vadd.f32 %v5522_v17, %v10300_v54  ;;  %v4392_v44 = vpop.f32.mrb[98].mxu0  ;;  %v5524_v49 = vpop.f32.mrb[98].mxu1 }
 0x4b5   : > { %v5721_v19 = vmax.f32 %v7109_v26, 0.0  ;;  %v5723_v7 = vmax.f32 %v7209_v1, 0.0  ;;  %v7111_v4 = vadd.f32 %v4392_v44, %v1332_v3  ;;  %v7211_v58 = vadd.f32 %v5524_v49, %v1332_v3  ;;  %v4394_v40 = vpop.f32.mrb[99].mxu0  ;;  %v5526_v25 = vpop.f32.mrb[99].mxu1 }
 0x4b6   : > { %v6022_v32 = vpop.permute.xlu0 %6021  ;;  %v5722_v0 = vmax.f32 %v7110_v50, 0.0  ;;  %v5724_v27 = vmax.f32 %v7210_v43, 0.0  ;;  %v7112_v36 = vadd.f32 %v4394_v40, %v1332_v3  ;;  %v7212_v14 = vadd.f32 %v5526_v25, %v1332_v3  ;;  %v6027_v6 = vpop.permute.xlu1 %6026 }
 0x4b7   : > { %v6221_v47 = vmul.f32 %v6022_v32, %v5721_v19  ;;  %v6223_v9 = vmul.f32 %v6022_v32, %v5723_v7  ;;  %v5725_v51 = vmax.f32 %v7111_v4, 0.0  ;;  %v5727_v34 = vmax.f32 %v7211_v58, 0.0 }
 0x4b8   : > { %v6222_v37 = vmul.f32 %v6022_v32, %v5722_v0  ;;  %v6224_v54 = vmul.f32 %v6022_v32, %v5724_v27  ;;  %v5726_v38 = vmax.f32 %v7112_v36, 0.0  ;;  %v5728_v59 = vmax.f32 %v7212_v14, 0.0 }
 0x4b9   : > { %v6276_v12 = vadd.f32 %v6275_v16, %v6221_v47  ;;  %v6386_v21 = vadd.f32 %v6385_v24, %v6223_v9  ;;  %v6225_v28 = vmul.f32 %v6027_v6, %v5725_v51  ;;  %v6227_v30 = vmul.f32 %v6027_v6, %v5727_v34 }
 0x4ba   : > { %v6331_v60 = vadd.f32 %v6330_v33, %v6222_v37  ;;  %v6441_v56 = vadd.f32 %v6440_v5, %v6224_v54  ;;  %v6226_v31 = vmul.f32 %v6027_v6, %v5726_v38  ;;  %v6228_v45 = vmul.f32 %v6027_v6, %v5728_v59  ;;  %v6453_v8 = vpop.permute.xlu0 %6452 }
 0x4bb   : > { %v6455_v63 = vlaneseq  ;;  %v6277_v10 = vadd.f32 %v6276_v12, %v6225_v28  ;;  %v6387_v29 = vadd.f32 %v6386_v21, %v6227_v30  ;;  %v8428_v51 = vmov 1966171168  }
 0x4bc   : > { %v6332_v48 = vadd.f32 %v6331_v60, %v6226_v31  ;;  %v6442_v11 = vadd.f32 %v6441_v56, %v6228_v45  ;;  %v6494_v34 = vunpack.c.l.s4 %v8428_v51 }
 0x4bd   : > { %v6278_v13 = vrot.slane %v6277_v10, 4  ;;  %v6388_v2 = vrot.slane %v6387_v29, 4  ;;  %v6456_v55 = vshrl.u32 %v6455_v63, 7  ;;  %vm6518_vm1 = vcmp.lt.s32.totalorder %v6455_v63, 512 }
 0x4be   : > { %v6333_v18 = vrot.slane %v6332_v48, 4  ;;  %v6443_v3 = vrot.slane %v6442_v11, 4  ;;  %v6495_v6 = vunpack.c.0.s8 %v6494_v34 }
 0x4bf   : > { %v6279_v35 = vadd.f32 %v6278_v13, %v6277_v10  ;;  %v6389_v15 = vadd.f32 %v6388_v2, %v6387_v29  ;;  %v6457_v46 = vsub.s32 0, %v6456_v55 }
 0x4c0   : > { %v6334_v57 = vadd.f32 %v6333_v18, %v6332_v48  ;;  %v6444_v61 = vadd.f32 %v6443_v3, %v6442_v11  ;;  %v6498_v38 = vsub.s32 %v6495_v6, %v6456_v55 }
 0x4c1   : > { %v6280_v42 = vrot.slane %v6279_v35, 2  ;;  %v6390_v23 = vrot.slane %v6389_v15, 2  ;;  %v6458_v20 = vrot.slane %v6453_v8, %v6457_v46 }
 0x4c2   : > { %v6335_v53 = vrot.slane %v6334_v57, 2  ;;  %v6445_v52 = vrot.slane %v6444_v61, 2 }
 0x4c3   : > { %v6281_v62 = vadd.f32 %v6280_v42, %v6279_v35  ;;  %v6391_v39 = vadd.f32 %v6390_v23, %v6389_v15 }
 0x4c4   : > { %v6336_v22 = vadd.f32 %v6335_v53, %v6334_v57  ;;  %v6446_v41 = vadd.f32 %v6445_v52, %v6444_v61 }
 0x4c5   : > { %v6282_v16 = vrot.slane %v6281_v62, 1  ;;  %v6392_v24 = vrot.slane %v6391_v39, 1 }
 0x4c6   : > { %v6337_v26 = vrot.slane %v6336_v22, 1  ;;  %v6447_v1 = vrot.slane %v6446_v41, 1 }
 0x4c7   : > { %v6283_v17 = vadd.f32 %v6282_v16, %v6281_v62  ;;  %v6393_v33 = vadd.f32 %v6392_v24, %v6391_v39 }
 0x4c8   : > { %v6338_v5 = vadd.f32 %v6337_v26, %v6336_v22  ;;  %v6448_v50 = vadd.f32 %v6447_v1, %v6446_v41 }
 0x4c9   : > { %v6459_v43 = vadd.f32 %v6458_v20, %v6283_v17  ;;  %v6461_v44 = vadd.f32 %v6458_v20, %v6393_v33 }
 0x4ca   : > { %v6460_v49 = vadd.f32 %v6458_v20, %v6338_v5  ;;  %v6462_v19 = vadd.f32 %v6458_v20, %v6448_v50 }
 0x4cb   : > { %v7006_v7 = vmul.f32 -1.442695, %v6459_v43  ;;  %v7008_v4 = vmul.f32 -1.442695, %v6461_v44 }
 0x4cc   : > { %v7007_v58 = vmul.f32 -1.442695, %v6460_v49  ;;  %v7009_v40 = vmul.f32 -1.442695, %v6462_v19 }
 0x4cd   : > { %8387 = vpow2.f32 %v7006_v7 }
 0x4ce   : > { %8389 = vpow2.f32 %v7008_v4 }
 0x4cf   : > { %8391 = vpow2.f32 %v7007_v58 }
 0x4d0   : > { %8393 = vpow2.f32 %v7009_v40 }
 0x4d7   : > { %v8388_v25 = vpop.eup %8387 }
 0x4d8   : > { %v8390_v32 = vpop.eup %8389  ;;  %v6475_v0 = vadd.f32 1.0, %v8388_v25 }
 0x4d9   : > { %v8392_v27 = vpop.eup %8391  ;;  %v6477_v36 = vadd.f32 1.0, %v8390_v32 }
 0x4da   : > { %v8394_v14 = vpop.eup %8393  ;;  %8395 = vrcp.f32 %v6475_v0  ;;  %v6476_v47 = vadd.f32 1.0, %v8392_v27 }
 0x4db   : > { %8397 = vrcp.f32 %v6477_v36  ;;  %v6478_v9 = vadd.f32 1.0, %v8394_v14 }
 0x4dc   : > { %8399 = vrcp.f32 %v6476_v47 }
 0x4dd   : > { %8401 = vrcp.f32 %v6478_v9 }
 0x4e4   : > { %v8396_v37 = vpop.eup %8395 }
 0x4e5   : > { %v8398_v54 = vpop.eup %8397 }
 0x4e6   : > { %v8400_v59 = vpop.eup %8399 }
 0x4e7   : > { %v8402_v12 = vpop.eup %8401  ;;  %v6491_v21 = vcombine.low %v8396_v37, %v8400_v59 }
 0x4e8   : > { %v6492_v28 = vcombine.low %v8398_v54, %v8402_v12 }
 0x4e9   : > { %v6499_v30 = vrot.slane %v6491_v21, %v6498_v38 }
 0x4ea   : > { %v6506_v60 = vrot.slane %v6492_v28, %v6498_v38 }
 0x4ec   : > { %v6507_v56 = vcombine.low %v6499_v30, %v6506_v60 }
 0x4ee   : > { %v6514_v31 = vrot.slane %v6507_v56, %v6498_v38 }
 0x4f0   : > { %6520 = vst.msk [vmem:[%s635_s9] sm:$0xf] %vm6518_vm1, %v6514_v31 }
 0x4f1 PF: > { %p14_p9 = scmp.ge.s32.totalorder %s8479_s23, 4   ;;  %s10382_s20 = smov %s8421_s21 }
 0x4f2   : > { %s10383_s21 = smov %s8488_s26  ;;  %s10384_s22 = smov %s8479_s23 }
 0x4f3   :  { %16 = sbr.rel (!%p14_p9) target bundleno = 5 (0x5), region = 98 }

</bundles_post_ra>
